<compile_context>
chip_gen: v7x
topology: tpu7x:2x2x1
jax: 0.10.0
libtpu: 0.0.40
codegen_flags: <defaults>
</compile_context>

<pallas_src>
import jax
import jax.numpy as jnp
from jax import lax
from jax.experimental import pallas as pl
from jax.experimental.pallas import tpu as pltpu

_LANES = 128
_MATMUL_DTYPE = jnp.float32   # jnp.bfloat16 for faster, looser math (relax test tol)


def _round_up(x, m):
    return (x + m - 1) // m * m


def _vmem_capacity_bytes():
    try:
        info = pltpu.get_tpu_info()
        return int(getattr(info, "vmem_capacity_bytes", 64 * 1024 * 1024))
    except Exception:
        return 64 * 1024 * 1024   # v7x-safe fallback


_VMEM_CAP = _vmem_capacity_bytes()
# v7x (64 MiB/TC) -> ~51 MiB limit; v5e/v6e (128 MiB) -> 100 MiB limit.
_VMEM_LIMIT_BYTES = min(int(_VMEM_CAP * 0.8), 100 * 1024 * 1024)
_TILE_BUDGET_BYTES = max(8 * 1024 * 1024, _VMEM_LIMIT_BYTES // 2)


def _conv_tile_bytes(th, W, cin_p, cout_p):
    """Conservative per-grid-step working set (double-buffered I/O + temporaries)."""
    f = 4
    xm = th * W * cin_p * f
    halo = 2 * W * cin_p * f
    out = th * W * cout_p * f
    wts = 3 * 3 * cin_p * cout_p * f
    tmp = (th + 2) * W * cin_p * f          # prologue activations
    tmp += (th + 2) * W * 3 * cin_p * f     # dx-shifted buffer
    tmp += th * W * 3 * cin_p * f           # lhs materialization
    tmp += 3 * th * W * cout_p * f          # taps / accumulator
    return 2 * (xm + halo + out + wts) + tmp


def _pick_tile_h(N, H, W, cin_p, cout_p, budget=_TILE_BUDGET_BYTES):
    """Largest row tile dividing H whose working set fits the budget.
    Only force >=2 row tiles when batch==1 (otherwise the batch axis already
    gives the megacore/pipeline its grid steps)."""
    divs = [d for d in range(1, H + 1) if H % d == 0]
    fits = [d for d in divs if _conv_tile_bytes(d, W, cin_p, cout_p) <= budget]
    if not fits:
        return divs[0]
    if N == 1:
        multi = [d for d in fits if d < H]
        if multi:
            return max(multi)
    return max(fits)


def _pick_rows(total, cout_p, budget=_TILE_BUDGET_BYTES):
    """Largest lane/sublane-dense row block dividing `total` for the BN+PReLU pass."""
    per_row = 4 * cout_p * 4   # in + out, double-buffered, f32
    target = max(8, budget // per_row)
    divs = [r for r in range(8, total + 1, 8) if total % r == 0]
    if not divs:
        return total
    fits = [r for r in divs if r <= target]
    return max(fits) if fits else min(divs)


def _conv_stats_kernel(xm_ref, xt_ref, xb_ref, w_ref, scale_ref, shift_ref,
                       alpha_ref, out_ref, stats_ref):
    """Fused [prev-block BN + PReLU] -> conv3x3(pad=1) for one (1,TH,W,Cout_p)
    row tile, plus per-tile per-channel [sum, sumsq] of the conv output.

    xm_ref   : (1, TH, W, Cin_p)  main rows [i*TH, i*TH+TH) of the raw input
    xt_ref   : (1, 1,  W, Cin_p)  row i*TH-1 (clamped; zeroed in-kernel if i==0)
    xb_ref   : (1, 1,  W, Cin_p)  row i*TH+TH (clamped; zeroed if last tile)
    w_ref    : (3, 3*Cin_p, Cout_p) per-dy weights, (dx, cin)-major
    scale_ref/shift_ref : (1, Cin_p) previous block's BN scale/shift (identity for block 0)
    alpha_ref: (1, 1) SMEM PReLU slope of the previous block (1.0 for block 0)
    out_ref  : (1, TH, W, Cout_p) raw conv output (no bias), f32
    stats_ref: (1, 1, 2, Cout_p)  per-tile [sum, sum of squares]
    """
    i = pl.program_id(1)
    n_h = pl.num_programs(1)
    _, th, w_out, cin_p = xm_ref.shape
    cout_p = out_ref.shape[-1]

    # ---- fused prologue: previous block's BN + PReLU on the loaded rows ------
    rows = jnp.concatenate([xt_ref[0], xm_ref[0], xb_ref[0]], axis=0)  # (TH+2,W,C)
    y = rows * scale_ref[...] + shift_ref[...]
    alpha = alpha_ref[0, 0]
    act = jnp.where(y >= 0, y, alpha * y)

    # ---- zero the 'same'-padding border rows in the activation domain --------
    r = lax.broadcasted_iota(jnp.int32, (th + 2, 1, 1), 0)
    row_ok = jnp.logical_and(jnp.logical_or(r != 0, i > 0),
                             jnp.logical_or(r != th + 1, i < n_h - 1))
    act = act * row_ok.astype(act.dtype)

    if act.dtype != w_ref.dtype:
        act = act.astype(w_ref.dtype)

    # ---- dx-shift / lane-concat buffer built ONCE per tile -------------------
    zcol = jnp.zeros((th + 2, 1, cin_p), act.dtype)
    left = jnp.concatenate([zcol, act[:, :w_out - 1, :]], axis=1)    # col w-1
    right = jnp.concatenate([act[:, 1:, :], zcol], axis=1)           # col w+1
    shifted = jnp.concatenate([left, act, right], axis=-1)           # (TH+2, W, 3C)

    # ---- 3 fat MXU matmuls (K = 3*Cin_p), value accumulation, single store ---
    acc = None
    for dy in range(3):
        lhs = shifted[dy:dy + th].reshape(th * w_out, 3 * cin_p)
        tap = jnp.dot(lhs, w_ref[dy], preferred_element_type=jnp.float32)
        acc = tap if acc is None else acc + tap
    out_ref[0] = acc.reshape(th, w_out, cout_p)

    # TODO(synk): E[x^2]-E[x]^2 is cancellation-prone for strongly off-center data;
    # a per-tile-centered accumulation would be more robust.
    stats_ref[0, 0] = jnp.concatenate(
        [jnp.sum(acc, axis=0, keepdims=True),
         jnp.sum(acc * acc, axis=0, keepdims=True)], axis=0)


def _bn_prelu_kernel(x_ref, scale_ref, shift_ref, alpha_ref, out_ref):
    """y = x*scale + shift; PReLU with a single shared slope (SMEM scalar)."""
    y = x_ref[...] * scale_ref[...] + shift_ref[...]
    a = alpha_ref[0, 0]
    out_ref[...] = jnp.where(y >= 0, y, a * y)


def _conv_block(z, scale, shift, alpha, w_hwio, gamma, beta):
    """One conv3x3 (with fused previous-block BN+PReLU prologue) + BN batch stats.

    Returns (raw conv output, next scale, next shift) -- the normalize/PReLU of
    THIS block is deferred into the next block's conv (or the final pass)."""
    N, H, W, cin_p = z.shape
    kh, kw, cin, cout = w_hwio.shape
    assert (kh, kw) == (3, 3)
    assert cin_p == _round_up(cin, _LANES)
    cout_p = _round_up(cout, _LANES)

    # Zero-pad params to lane-dense channel counts; padded channels stay exactly
    # zero through prologue (scale=shift=0), conv (zero weights) and stats.
    w_p = jnp.pad(w_hwio, ((0, 0), (0, 0), (0, cin_p - cin), (0, cout_p - cout)))
    wk = w_p.reshape(3, 3 * cin_p, cout_p).astype(_MATMUL_DTYPE)
    gamma_p = jnp.pad(gamma, (0, cout_p - cout)).astype(jnp.float32)
    beta_p = jnp.pad(beta, (0, cout_p - cout)).astype(jnp.float32)

    th = _pick_tile_h(N, H, W, cin_p, cout_p)
    n_h = H // th
    alpha_arr = jnp.asarray(alpha, jnp.float32).reshape(1, 1)

    conv_out, part = pl.pallas_call(
        _conv_stats_kernel,
        grid=(N, n_h),
        in_specs=[
            pl.BlockSpec((1, th, W, cin_p), lambda n, i: (n, i, 0, 0)),
            pl.BlockSpec((1, 1, W, cin_p),
                         lambda n, i, _t=th: (n, jnp.maximum(i * _t - 1, 0), 0, 0)),
            pl.BlockSpec((1, 1, W, cin_p),
                         lambda n, i, _t=th, _h=H:
                             (n, jnp.minimum((i + 1) * _t, _h - 1), 0, 0)),
            pl.BlockSpec((3, 3 * cin_p, cout_p), lambda n, i: (0, 0, 0)),
            pl.BlockSpec((1, cin_p), lambda n, i: (0, 0)),
            pl.BlockSpec((1, cin_p), lambda n, i: (0, 0)),
            pl.BlockSpec(memory_space=pltpu.MemorySpace.SMEM),
        ],
        out_specs=(
            pl.BlockSpec((1, th, W, cout_p), lambda n, i: (n, i, 0, 0)),
            pl.BlockSpec((1, 1, 2, cout_p), lambda n, i: (n, i, 0, 0)),
        ),
        out_shape=(
            jax.ShapeDtypeStruct((N, H, W, cout_p), jnp.float32),
            jax.ShapeDtypeStruct((N, n_h, 2, cout_p), jnp.float32),
        ),
        compiler_params=pltpu.CompilerParams(
            dimension_semantics=("parallel", "parallel"),
            vmem_limit_bytes=_VMEM_LIMIT_BYTES),
    )(z, z, z, wk, scale, shift, alpha_arr)

    # ---- finalize batch statistics (tiny per-channel XLA math) ---------------
    count = N * H * W
    tot = jnp.sum(part, axis=(0, 1))                  # (2, Cout_p)
    mean = tot[0] / count
    var = tot[1] / count - mean * mean                # biased variance (BN training)
    inv = lax.rsqrt(var + 1e-5)
    new_scale = (gamma_p * inv).reshape(1, cout_p)
    new_shift = (beta_p - mean * gamma_p * inv).reshape(1, cout_p)
    return conv_out, new_scale, new_shift


def _bn_prelu_pass(z, scale, shift, alpha):
    """Standalone BN-normalize + PReLU for the FINAL block, on a flattened view."""
    N, H, W, c = z.shape
    total = N * H * W
    z2 = z.reshape(total, c)
    rows = _pick_rows(total, c)
    alpha_arr = jnp.asarray(alpha, jnp.float32).reshape(1, 1)
    out = pl.pallas_call(
        _bn_prelu_kernel,
        grid=(total // rows,),
        in_specs=[
            pl.BlockSpec((rows, c), lambda i: (i, 0)),
            pl.BlockSpec((1, c), lambda i: (0, 0)),
            pl.BlockSpec((1, c), lambda i: (0, 0)),
            pl.BlockSpec(memory_space=pltpu.MemorySpace.SMEM),
        ],
        out_specs=pl.BlockSpec((rows, c), lambda i: (i, 0)),
        out_shape=jax.ShapeDtypeStruct((total, c), jnp.float32),
        compiler_params=pltpu.CompilerParams(
            dimension_semantics=("parallel",),
            vmem_limit_bytes=_VMEM_LIMIT_BYTES),
    )(z2, scale, shift, alpha_arr)
    return out.reshape(N, H, W, c)


def double_conv_apply(x_nchw, params):
    """Forward pass of double_conv. Input/output NCHW, like the PyTorch module."""
    x = jnp.transpose(x_nchw, (0, 2, 3, 1)).astype(jnp.float32)   # NCHW -> NHWC
    cin = x.shape[-1]
    cin_p = _round_up(cin, _LANES)
    # TODO(synk): for small real Cin (first layer), pack the 3x3xCin patch into K
    # instead of padding Cin to 128 (saves ~Cin_p/Cin HBM traffic and MXU work).
    z = jnp.pad(x, ((0, 0), (0, 0), (0, 0), (0, cin_p - cin)))

    # Identity prologue for the first block (scale=1, shift=0, PReLU slope 1).
    scale = jnp.ones((1, cin_p), jnp.float32)
    shift = jnp.zeros((1, cin_p), jnp.float32)
    alpha = jnp.float32(1.0)

    for (w, b, gamma, beta, a) in params:
        # Conv bias `b` is omitted: training-mode BN's mean subtraction cancels it.
        z, scale, shift = _conv_block(z, scale, shift, alpha, w, gamma, beta)
        alpha = a

    y = _bn_prelu_pass(z, scale, shift, alpha)
    out_ch = params[-1][0].shape[-1]
    return jnp.transpose(y[..., :out_ch], (0, 3, 1, 2))           # NHWC -> NCHW


def init_params(key, in_ch, out_ch):
    """Deterministic synthetic parameters matching the module's shapes."""
    def block(k, cin, cout):
        kw_, kb = jax.random.split(k)
        bound = 1.0 / jnp.sqrt(cin * 9.0)
        w = jax.random.uniform(kw_, (3, 3, cin, cout), jnp.float32, -bound, bound)  # HWIO
        b = jax.random.uniform(kb, (cout,), jnp.float32, -bound, bound)
        gamma = jnp.ones((cout,), jnp.float32)   # BN weight init
        beta = jnp.zeros((cout,), jnp.float32)   # BN bias init
        alpha = jnp.array(0.25, jnp.float32)     # PReLU default init
        return (w, b, gamma, beta, alpha)

    k1, k2 = jax.random.split(key)
    return (block(k1, in_ch, out_ch), block(k2, out_ch, out_ch))


def reference_apply(x_nchw, params):
    """Pure-JAX reference (same math as the PyTorch module, incl. conv bias)."""
    x = jnp.transpose(x_nchw, (0, 2, 3, 1))
    for (w, b, gamma, beta, alpha) in params:
        y = lax.conv_general_dilated(
            x, w, window_strides=(1, 1), padding=((1, 1), (1, 1)),
            dimension_numbers=("NHWC", "HWIO", "NHWC"))
        y = y + b[None, None, None, :]
        mean = jnp.mean(y, axis=(0, 1, 2), keepdims=True)
        var = jnp.mean((y - mean) ** 2, axis=(0, 1, 2), keepdims=True)
        y = (y - mean) * lax.rsqrt(var + 1e-5)
        y = y * gamma[None, None, None, :] + beta[None, None, None, :]
        x = jnp.where(y >= 0, y, alpha * y)
    return jnp.transpose(x, (0, 3, 1, 2))


if __name__ == "__main__":
    key = jax.random.PRNGKey(0)
    k_x, k_p = jax.random.split(key)

    N, in_ch, out_ch, H, W = 2, 4, 8, 16, 16
    x = jax.random.normal(k_x, (N, in_ch, H, W), jnp.float32)   # NCHW input
    params = init_params(k_p, in_ch, out_ch)

    apply_fn = jax.jit(double_conv_apply)
    out = jax.block_until_ready(apply_fn(x, params))
    ref = jax.block_until_ready(reference_apply(x, params))

    assert out.shape == (N, out_ch, H, W)
    max_err = float(jnp.max(jnp.abs(out - ref)))
    assert jnp.allclose(out, ref, atol=1e-4, rtol=1e-4), max_err
    print("KERNEL_OK")
</pallas_src>

<mosaic_0001>
module attributes {stable_mosaic.version = 11 : i64} {
  func.func @_conv_stats_kernel(%arg0: i32, %arg1: i32, %arg2: memref<1x16x16x128xf32, #tpu.memory_space<vmem>>, %arg3: memref<1x1x16x128xf32, #tpu.memory_space<vmem>>, %arg4: memref<1x1x16x128xf32, #tpu.memory_space<vmem>>, %arg5: memref<3x384x128xf32, #tpu.memory_space<vmem>>, %arg6: memref<1x128xf32, #tpu.memory_space<vmem>>, %arg7: memref<1x128xf32, #tpu.memory_space<vmem>>, %arg8: memref<1x1xf32, #tpu.memory_space<smem>>, %arg9: memref<1x16x16x128xf32, #tpu.memory_space<vmem>>, %arg10: memref<1x1x2x128xf32, #tpu.memory_space<vmem>>) attributes {dimension_semantics = [#tpu.dimension_semantics<parallel>, #tpu.dimension_semantics<parallel>], iteration_bounds = array<i64: 2, 1>, scalar_prefetch = 0 : i64, scratch_operands = 0 : i64, tpu.core_type = #tpu.core_type<tc>, window_params = [{transform_indices = @transform_0, window_bounds = array<i64: 1, 16, 16, 128>}, {transform_indices = @transform_1, window_bounds = array<i64: 1, 1, 16, 128>}, {transform_indices = @transform_2, window_bounds = array<i64: 1, 1, 16, 128>}, {pipeline_mode = #tpu.pipeline_mode<synchronous>, transform_indices = @transform_3, window_bounds = array<i64: 3, 384, 128>}, {pipeline_mode = #tpu.pipeline_mode<synchronous>, transform_indices = @transform_4, window_bounds = array<i64: 1, 128>}, {pipeline_mode = #tpu.pipeline_mode<synchronous>, transform_indices = @transform_5, window_bounds = array<i64: 1, 128>}, {transform_indices = @transform_6, window_bounds = array<i64: 1, 1>}, {transform_indices = @transform_7, window_bounds = array<i64: 1, 16, 16, 128>}, {transform_indices = @transform_8, window_bounds = array<i64: 1, 1, 2, 128>}]} {
    %c0 = arith.constant 0 : index
    %c0_0 = arith.constant 0 : index
    %c0_1 = arith.constant 0 : index
    %c0_2 = arith.constant 0 : index
    %0 = vector.load %arg3[%c0, %c0_0, %c0_1, %c0_2] : memref<1x1x16x128xf32, #tpu.memory_space<vmem>>, vector<1x1x16x128xf32>
    %1 = vector.shape_cast %0 : vector<1x1x16x128xf32> to vector<1x16x128xf32>
    %c0_3 = arith.constant 0 : index
    %c0_4 = arith.constant 0 : index
    %c0_5 = arith.constant 0 : index
    %c0_6 = arith.constant 0 : index
    %2 = vector.load %arg2[%c0_3, %c0_4, %c0_5, %c0_6] : memref<1x16x16x128xf32, #tpu.memory_space<vmem>>, vector<1x16x16x128xf32>
    %3 = vector.shape_cast %2 : vector<1x16x16x128xf32> to vector<16x16x128xf32>
    %c0_7 = arith.constant 0 : index
    %c0_8 = arith.constant 0 : index
    %c0_9 = arith.constant 0 : index
    %c0_10 = arith.constant 0 : index
    %4 = vector.load %arg4[%c0_7, %c0_8, %c0_9, %c0_10] : memref<1x1x16x128xf32, #tpu.memory_space<vmem>>, vector<1x1x16x128xf32>
    %5 = vector.shape_cast %4 : vector<1x1x16x128xf32> to vector<1x16x128xf32>
    %6 = tpu.concatenate %1, %3, %5 in 0 : vector<1x16x128xf32>, vector<16x16x128xf32>, vector<1x16x128xf32> -> vector<18x16x128xf32>
    %c0_11 = arith.constant 0 : index
    %c0_12 = arith.constant 0 : index
    %7 = vector.load %arg6[%c0_11, %c0_12] : memref<1x128xf32, #tpu.memory_space<vmem>>, vector<1x128xf32>
    %8 = vector.shape_cast %7 : vector<1x128xf32> to vector<1x1x128xf32>
    %9 = vector.broadcast %8 : vector<1x1x128xf32> to vector<18x16x128xf32>
    %10 = arith.mulf %6, %9 : vector<18x16x128xf32>
    %c0_13 = arith.constant 0 : index
    %c0_14 = arith.constant 0 : index
    %11 = vector.load %arg7[%c0_13, %c0_14] : memref<1x128xf32, #tpu.memory_space<vmem>>, vector<1x128xf32>
    %12 = vector.shape_cast %11 : vector<1x128xf32> to vector<1x1x128xf32>
    %13 = vector.broadcast %12 : vector<1x1x128xf32> to vector<18x16x128xf32>
    %14 = arith.addf %10, %13 : vector<18x16x128xf32>
    %c0_15 = arith.constant 0 : index
    %c0_16 = arith.constant 0 : index
    %15 = memref.load %arg8[%c0_15, %c0_16] : memref<1x1xf32, #tpu.memory_space<smem>>
    %cst = arith.constant 0.000000e+00 : f32
    %16 = vector.broadcast %cst : f32 to vector<18x16x128xf32>
    %17 = arith.cmpf oge, %14, %16 : vector<18x16x128xf32>
    %18 = vector.broadcast %15 : f32 to vector<18x16x128xf32>
    %19 = arith.mulf %18, %14 : vector<18x16x128xf32>
    %20 = arith.select %17, %14, %19 : vector<18x16x128xi1>, vector<18x16x128xf32>
    %21 = tpu.iota {dimensions = array<i32: 0>} : vector<18x1x1xi32>
    %c0_i32 = arith.constant 0 : i32
    %22 = vector.broadcast %c0_i32 : i32 to vector<18x1x1xi32>
    %23 = arith.cmpi ne, %21, %22 : vector<18x1x1xi32>
    %c0_i32_17 = arith.constant 0 : i32
    %24 = arith.cmpi sgt, %arg1, %c0_i32_17 : i32
    %25 = vector.broadcast %24 : i1 to vector<18x1x1xi1>
    %26 = arith.ori %23, %25 : vector<18x1x1xi1>
    %c17_i32 = arith.constant 17 : i32
    %27 = vector.broadcast %c17_i32 : i32 to vector<18x1x1xi32>
    %28 = arith.cmpi ne, %21, %27 : vector<18x1x1xi32>
    %c0_i32_18 = arith.constant 0 : i32
    %29 = arith.cmpi slt, %arg1, %c0_i32_18 : i32
    %30 = vector.broadcast %29 : i1 to vector<18x1x1xi1>
    %31 = arith.ori %28, %30 : vector<18x1x1xi1>
    %32 = arith.andi %26, %31 : vector<18x1x1xi1>
    %33 = arith.extui %32 : vector<18x1x1xi1> to vector<18x1x1xi32>
    %34 = arith.sitofp %33 : vector<18x1x1xi32> to vector<18x1x1xf32>
    %35 = vector.broadcast %34 : vector<18x1x1xf32> to vector<18x16x128xf32>
    %36 = arith.mulf %20, %35 : vector<18x16x128xf32>
    %cst_19 = arith.constant 0.000000e+00 : f32
    %37 = vector.broadcast %cst_19 : f32 to vector<18x1x128xf32>
    %38 = vector.extract_strided_slice %36 {offsets = [0, 0, 0], sizes = [18, 15, 128], strides = [1, 1, 1]} : vector<18x16x128xf32> to vector<18x15x128xf32>
    %39 = tpu.concatenate %37, %38 in 1 : vector<18x1x128xf32>, vector<18x15x128xf32> -> vector<18x16x128xf32>
    %40 = vector.extract_strided_slice %36 {offsets = [0, 1, 0], sizes = [18, 15, 128], strides = [1, 1, 1]} : vector<18x16x128xf32> to vector<18x15x128xf32>
    %41 = tpu.concatenate %40, %37 in 1 : vector<18x15x128xf32>, vector<18x1x128xf32> -> vector<18x16x128xf32>
    %42 = tpu.concatenate %39, %36, %41 in 2 : vector<18x16x128xf32>, vector<18x16x128xf32>, vector<18x16x128xf32> -> vector<18x16x384xf32>
    %43 = vector.extract_strided_slice %42 {offsets = [0, 0, 0], sizes = [16, 16, 384], strides = [1, 1, 1]} : vector<18x16x384xf32> to vector<16x16x384xf32>
    %44 = vector.shape_cast %43 : vector<16x16x384xf32> to vector<256x384xf32>
    %c0_20 = arith.constant 0 : index
    %c0_21 = arith.constant 0 : index
    %c0_22 = arith.constant 0 : index
    %45 = vector.load %arg5[%c0_20, %c0_21, %c0_22] : memref<3x384x128xf32, #tpu.memory_space<vmem>>, vector<1x384x128xf32>
    %46 = vector.shape_cast %45 : vector<1x384x128xf32> to vector<384x128xf32>
    %cst_23 = arith.constant dense<0.000000e+00> : vector<256x128xf32>
    %47 = tpu.matmul %44, %46, %cst_23 {dimension_numbers = #tpu.dot_dimension_numbers<[1], [0], [0], [1], [0, 0, 1, 1], [], []>} : vector<256x384xf32>, vector<384x128xf32>, vector<256x128xf32> -> vector<256x128xf32>
    %48 = vector.extract_strided_slice %42 {offsets = [1, 0, 0], sizes = [16, 16, 384], strides = [1, 1, 1]} : vector<18x16x384xf32> to vector<16x16x384xf32>
    %49 = vector.shape_cast %48 : vector<16x16x384xf32> to vector<256x384xf32>
    %c1 = arith.constant 1 : index
    %c0_24 = arith.constant 0 : index
    %c0_25 = arith.constant 0 : index
    %50 = vector.load %arg5[%c1, %c0_24, %c0_25] : memref<3x384x128xf32, #tpu.memory_space<vmem>>, vector<1x384x128xf32>
    %51 = vector.shape_cast %50 : vector<1x384x128xf32> to vector<384x128xf32>
    %cst_26 = arith.constant dense<0.000000e+00> : vector<256x128xf32>
    %52 = tpu.matmul %49, %51, %cst_26 {dimension_numbers = #tpu.dot_dimension_numbers<[1], [0], [0], [1], [0, 0, 1, 1], [], []>} : vector<256x384xf32>, vector<384x128xf32>, vector<256x128xf32> -> vector<256x128xf32>
    %53 = arith.addf %47, %52 : vector<256x128xf32>
    %54 = vector.extract_strided_slice %42 {offsets = [2, 0, 0], sizes = [16, 16, 384], strides = [1, 1, 1]} : vector<18x16x384xf32> to vector<16x16x384xf32>
    %55 = vector.shape_cast %54 : vector<16x16x384xf32> to vector<256x384xf32>
    %c2 = arith.constant 2 : index
    %c0_27 = arith.constant 0 : index
    %c0_28 = arith.constant 0 : index
    %56 = vector.load %arg5[%c2, %c0_27, %c0_28] : memref<3x384x128xf32, #tpu.memory_space<vmem>>, vector<1x384x128xf32>
    %57 = vector.shape_cast %56 : vector<1x384x128xf32> to vector<384x128xf32>
    %cst_29 = arith.constant dense<0.000000e+00> : vector<256x128xf32>
    %58 = tpu.matmul %55, %57, %cst_29 {dimension_numbers = #tpu.dot_dimension_numbers<[1], [0], [0], [1], [0, 0, 1, 1], [], []>} : vector<256x384xf32>, vector<384x128xf32>, vector<256x128xf32> -> vector<256x128xf32>
    %59 = arith.addf %53, %58 : vector<256x128xf32>
    %60 = vector.shape_cast %59 : vector<256x128xf32> to vector<16x16x128xf32>
    %c0_30 = arith.constant 0 : index
    %c0_31 = arith.constant 0 : index
    %c0_32 = arith.constant 0 : index
    %c0_33 = arith.constant 0 : index
    %61 = vector.load %arg9[%c0_30, %c0_31, %c0_32, %c0_33] : memref<1x16x16x128xf32, #tpu.memory_space<vmem>>, vector<1x16x16x128xf32>
    %62 = vector.shape_cast %61 : vector<1x16x16x128xf32> to vector<16x16x128xf32>
    %63 = vector.shape_cast %60 : vector<16x16x128xf32> to vector<1x16x16x128xf32>
    tpu.vector_store %arg9[%c0_30, %c0_31, %c0_32, %c0_33], %63 {strides = array<i32>} : memref<1x16x16x128xf32, #tpu.memory_space<vmem>>, vector<1x16x16x128xf32>,
    %cst_34 = arith.constant dense<0.000000e+00> : vector<128xf32>
    %64 = vector.multi_reduction <add>, %59, %cst_34 [0] : vector<256x128xf32> to vector<128xf32>
    %65 = vector.shape_cast %64 : vector<128xf32> to vector<1x128xf32>
    %66 = arith.mulf %59, %59 : vector<256x128xf32>
    %cst_35 = arith.constant dense<0.000000e+00> : vector<128xf32>
    %67 = vector.multi_reduction <add>, %66, %cst_35 [0] : vector<256x128xf32> to vector<128xf32>
    %68 = vector.shape_cast %67 : vector<128xf32> to vector<1x128xf32>
    %69 = tpu.concatenate %65, %68 in 0 : vector<1x128xf32>, vector<1x128xf32> -> vector<2x128xf32>
    %c0_36 = arith.constant 0 : index
    %c0_37 = arith.constant 0 : index
    %c0_38 = arith.constant 0 : index
    %c0_39 = arith.constant 0 : index
    %70 = vector.load %arg10[%c0_36, %c0_37, %c0_38, %c0_39] : memref<1x1x2x128xf32, #tpu.memory_space<vmem>>, vector<1x1x2x128xf32>
    %71 = vector.shape_cast %70 : vector<1x1x2x128xf32> to vector<2x128xf32>
    %72 = vector.shape_cast %69 : vector<2x128xf32> to vector<1x1x2x128xf32>
    tpu.vector_store %arg10[%c0_36, %c0_37, %c0_38, %c0_39], %72 {strides = array<i32>} : memref<1x1x2x128xf32, #tpu.memory_space<vmem>>, vector<1x1x2x128xf32>,
    return
  }
  func.func @transform_0(%arg0: i32, %arg1: i32) -> (i32, i32, i32, i32) {
    %c0_i32 = arith.constant 0 : i32
    %c0_i32_0 = arith.constant 0 : i32
    %c0_i32_1 = arith.constant 0 : i32
    return %arg0, %arg1, %c0_i32, %c0_i32_0 : i32, i32, i32, i32
  }
  func.func @transform_1(%arg0: i32, %arg1: i32) -> (i32, i32, i32, i32) {
    %c16_i32 = arith.constant 16 : i32
    %0 = arith.muli %arg1, %c16_i32 : i32
    %c1_i32 = arith.constant 1 : i32
    %1 = arith.subi %0, %c1_i32 : i32
    %c0_i32 = arith.constant 0 : i32
    %2 = arith.maxsi %1, %c0_i32 : i32
    %c0_i32_0 = arith.constant 0 : i32
    %c0_i32_1 = arith.constant 0 : i32
    %c0_i32_2 = arith.constant 0 : i32
    return %arg0, %2, %c0_i32_0, %c0_i32_1 : i32, i32, i32, i32
  }
  func.func @transform_2(%arg0: i32, %arg1: i32) -> (i32, i32, i32, i32) {
    %c1_i32 = arith.constant 1 : i32
    %0 = arith.addi %arg1, %c1_i32 : i32
    %c16_i32 = arith.constant 16 : i32
    %1 = arith.muli %0, %c16_i32 : i32
    %c15_i32 = arith.constant 15 : i32
    %2 = arith.minsi %1, %c15_i32 : i32
    %c0_i32 = arith.constant 0 : i32
    %c0_i32_0 = arith.constant 0 : i32
    %c0_i32_1 = arith.constant 0 : i32
    return %arg0, %2, %c0_i32, %c0_i32_0 : i32, i32, i32, i32
  }
  func.func @transform_3(%arg0: i32, %arg1: i32) -> (i32, i32, i32) {
    %c0_i32 = arith.constant 0 : i32
    %c0_i32_0 = arith.constant 0 : i32
    %c0_i32_1 = arith.constant 0 : i32
    %c0_i32_2 = arith.constant 0 : i32
    return %c0_i32, %c0_i32_0, %c0_i32_1 : i32, i32, i32
  }
  func.func @transform_4(%arg0: i32, %arg1: i32) -> (i32, i32) {
    %c0_i32 = arith.constant 0 : i32
    %c0_i32_0 = arith.constant 0 : i32
    %c0_i32_1 = arith.constant 0 : i32
    return %c0_i32, %c0_i32_0 : i32, i32
  }
  func.func @transform_5(%arg0: i32, %arg1: i32) -> (i32, i32) {
    %c0_i32 = arith.constant 0 : i32
    %c0_i32_0 = arith.constant 0 : i32
    %c0_i32_1 = arith.constant 0 : i32
    return %c0_i32, %c0_i32_0 : i32, i32
  }
  func.func @transform_6(%arg0: i32, %arg1: i32) -> (i32, i32) {
    %c0_i32 = arith.constant 0 : i32
    %c0_i32_0 = arith.constant 0 : i32
    %c0_i32_1 = arith.constant 0 : i32
    return %c0_i32, %c0_i32_0 : i32, i32
  }
  func.func @transform_7(%arg0: i32, %arg1: i32) -> (i32, i32, i32, i32) {
    %c0_i32 = arith.constant 0 : i32
    %c0_i32_0 = arith.constant 0 : i32
    %c0_i32_1 = arith.constant 0 : i32
    return %arg0, %arg1, %c0_i32, %c0_i32_0 : i32, i32, i32, i32
  }
  func.func @transform_8(%arg0: i32, %arg1: i32) -> (i32, i32, i32, i32) {
    %c0_i32 = arith.constant 0 : i32
    %c0_i32_0 = arith.constant 0 : i32
    %c0_i32_1 = arith.constant 0 : i32
    return %arg0, %arg1, %c0_i32, %c0_i32_0 : i32, i32, i32, i32
  }
}

module attributes {stable_mosaic.version = 11 : i64} {
  func.func @_bn_prelu_kernel(%arg0: i32, %arg1: memref<512x128xf32, #tpu.memory_space<vmem>>, %arg2: memref<1x128xf32, #tpu.memory_space<vmem>>, %arg3: memref<1x128xf32, #tpu.memory_space<vmem>>, %arg4: memref<1x1xf32, #tpu.memory_space<smem>>, %arg5: memref<512x128xf32, #tpu.memory_space<vmem>>) attributes {dimension_semantics = [#tpu.dimension_semantics<parallel>], iteration_bounds = array<i64: 1>, scalar_prefetch = 0 : i64, scratch_operands = 0 : i64, tpu.core_type = #tpu.core_type<tc>, window_params = [{transform_indices = @transform_0, window_bounds = array<i64: 512, 128>}, {pipeline_mode = #tpu.pipeline_mode<synchronous>, transform_indices = @transform_1, window_bounds = array<i64: 1, 128>}, {pipeline_mode = #tpu.pipeline_mode<synchronous>, transform_indices = @transform_2, window_bounds = array<i64: 1, 128>}, {transform_indices = @transform_3, window_bounds = array<i64: 1, 1>}, {transform_indices = @transform_4, window_bounds = array<i64: 512, 128>}]} {
    %c0 = arith.constant 0 : index
    %c0_0 = arith.constant 0 : index
    %0 = vector.load %arg1[%c0, %c0_0] : memref<512x128xf32, #tpu.memory_space<vmem>>, vector<512x128xf32>
    %c0_1 = arith.constant 0 : index
    %c0_2 = arith.constant 0 : index
    %1 = vector.load %arg2[%c0_1, %c0_2] : memref<1x128xf32, #tpu.memory_space<vmem>>, vector<1x128xf32>
    %2 = vector.broadcast %1 : vector<1x128xf32> to vector<512x128xf32>
    %3 = arith.mulf %0, %2 : vector<512x128xf32>
    %c0_3 = arith.constant 0 : index
    %c0_4 = arith.constant 0 : index
    %4 = vector.load %arg3[%c0_3, %c0_4] : memref<1x128xf32, #tpu.memory_space<vmem>>, vector<1x128xf32>
    %5 = vector.broadcast %4 : vector<1x128xf32> to vector<512x128xf32>
    %6 = arith.addf %3, %5 : vector<512x128xf32>
    %c0_5 = arith.constant 0 : index
    %c0_6 = arith.constant 0 : index
    %7 = memref.load %arg4[%c0_5, %c0_6] : memref<1x1xf32, #tpu.memory_space<smem>>
    %cst = arith.constant 0.000000e+00 : f32
    %8 = vector.broadcast %cst : f32 to vector<512x128xf32>
    %9 = arith.cmpf oge, %6, %8 : vector<512x128xf32>
    %10 = vector.broadcast %7 : f32 to vector<512x128xf32>
    %11 = arith.mulf %10, %6 : vector<512x128xf32>
    %12 = arith.select %9, %6, %11 : vector<512x128xi1>, vector<512x128xf32>
    %c0_7 = arith.constant 0 : index
    %c0_8 = arith.constant 0 : index
    %13 = vector.load %arg5[%c0_7, %c0_8] : memref<512x128xf32, #tpu.memory_space<vmem>>, vector<512x128xf32>
    tpu.vector_store %arg5[%c0_7, %c0_8], %12 {strides = array<i32>} : memref<512x128xf32, #tpu.memory_space<vmem>>, vector<512x128xf32>,
    return
  }
  func.func @transform_0(%arg0: i32) -> (i32, i32) {
    %c0_i32 = arith.constant 0 : i32
    %c0_i32_0 = arith.constant 0 : i32
    return %arg0, %c0_i32 : i32, i32
  }
  func.func @transform_1(%arg0: i32) -> (i32, i32) {
    %c0_i32 = arith.constant 0 : i32
    %c0_i32_0 = arith.constant 0 : i32
    %c0_i32_1 = arith.constant 0 : i32
    return %c0_i32, %c0_i32_0 : i32, i32
  }
  func.func @transform_2(%arg0: i32) -> (i32, i32) {
    %c0_i32 = arith.constant 0 : i32
    %c0_i32_0 = arith.constant 0 : i32
    %c0_i32_1 = arith.constant 0 : i32
    return %c0_i32, %c0_i32_0 : i32, i32
  }
  func.func @transform_3(%arg0: i32) -> (i32, i32) {
    %c0_i32 = arith.constant 0 : i32
    %c0_i32_0 = arith.constant 0 : i32
    %c0_i32_1 = arith.constant 0 : i32
    return %c0_i32, %c0_i32_0 : i32, i32
  }
  func.func @transform_4(%arg0: i32) -> (i32, i32) {
    %c0_i32 = arith.constant 0 : i32
    %c0_i32_0 = arith.constant 0 : i32
    return %arg0, %c0_i32 : i32, i32
  }
}

</mosaic_0001>

<bundles_post_ra>
// kernel: double_conv_apply.5
= control target key start
LH: loop header
LB: loop body
LE: loop exit
PB: predicated region body
PF: predicated region fallthrough
CT: control target
= control target key end

     0   :  { %s1111_s0 = inlined_call_operand.vmem [shape: f32[512,128], index: 0, kind: input, shape index: {}]   ;;  %s1112_s1 = inlined_call_operand.vmem [shape: f32[1,128], index: 1, kind: input, shape index: {}]   ;;  %s1113_s2 = inlined_call_operand.vmem [shape: f32[1,128], index: 2, kind: input, shape index: {}]   ;;  %s1114_s3 = inlined_call_operand.<no memory space> [shape: f32[1,1], index: 3, kind: input, shape index: {}]   ;;  %s1115_s4 = inlined_call_operand.vmem [shape: f32[512,128], index: 4, kind: output, shape index: {}]  }
   0x1   :  { %v18_v0 = vld [vmem:[%s1111_s0] sm:$0xff]  ;;  %v19_v4 = vld [vmem:[%s1111_s0 + $0x8] sm:$0xff]  ;;  %v20_v5 = vld [vmem:[%s1111_s0 + $0x10] sm:$0xff]  ;;  %v539_v7 = vstv %s1114_s3 }
   0x2   :  { %v519_v1 = vld [vmem:[%s1112_s1] ss:$0 sm:$0xff]  ;;  %v21_v6 = vld [vmem:[%s1111_s0 + $0x18] sm:$0xff]  ;;  %v23_v12 = vld [vmem:[%s1111_s0 + $0x28] sm:$0xff] }
   0x3   :  { %v524_v2 = vld [vmem:[%s1113_s2] ss:$0 sm:$0xff]  ;;  %v89_v3 = vmul.f32 %v519_v1, %v18_v0  ;;  %v90_v8 = vmul.f32 %v519_v1, %v19_v4  ;;  %v91_v9 = vmul.f32 %v519_v1, %v20_v5  ;;  %v92_v10 = vmul.f32 %v519_v1, %v21_v6  ;;  %v24_v13 = vld [vmem:[%s1111_s0 + $0x30] sm:$0xff]  ;;  %v25_v18 = vld [vmem:[%s1111_s0 + $0x38] sm:$0xff] }
   0x4   :  { %v22_v11 = vld [vmem:[%s1111_s0 + $0x20] sm:$0xff]  ;;  %v94_v16 = vmul.f32 %v519_v1, %v23_v12  ;;  %v95_v17 = vmul.f32 %v519_v1, %v24_v13  ;;  %v96_v22 = vmul.f32 %v519_v1, %v25_v18  ;;  %v27_v31 = vld [vmem:[%s1111_s0 + $0x48] sm:$0xff]  ;;  %v28_v32 = vld [vmem:[%s1111_s0 + $0x50] sm:$0xff] }
   0x5   :  { %v160_v14 = vadd.f32 %v524_v2, %v89_v3  ;;  %v93_v15 = vmul.f32 %v519_v1, %v22_v11  ;;  %v161_v19 = vadd.f32 %v524_v2, %v90_v8  ;;  %v162_v20 = vadd.f32 %v524_v2, %v91_v9  ;;  %v26_v30 = vld [vmem:[%s1111_s0 + $0x40] sm:$0xff]  ;;  %v29_v44 = vld [vmem:[%s1111_s0 + $0x58] sm:$0xff]  ;;  %v31_v46 = vld [vmem:[%s1111_s0 + $0x68] sm:$0xff] }
   0x6   :  { %v163_v21 = vadd.f32 %v524_v2, %v92_v10  ;;  %v165_v25 = vadd.f32 %v524_v2, %v94_v16  ;;  %v166_v38 = vadd.f32 %v524_v2, %v95_v17  ;;  %v167_v39 = vadd.f32 %v524_v2, %v96_v22  ;;  %v30_v45 = vld [vmem:[%s1111_s0 + $0x60] sm:$0xff]  ;;  %v32_v57 = vld [vmem:[%s1111_s0 + $0x70] sm:$0xff]  ;;  %v33_v5 = vld [vmem:[%s1111_s0 + $0x78] sm:$0xff] }
   0x7   :  { %vm225_vm0 = vcmp.ge.f32.partialorder %v160_v14, 0.0  ;;  %v290_v23 = vmul.f32 %v539_v7, %v160_v14  ;;  %v164_v24 = vadd.f32 %v524_v2, %v93_v15  ;;  %vm226_vm1 = vcmp.ge.f32.partialorder %v161_v19, 0.0  ;;  %v34_v6 = vld [vmem:[%s1111_s0 + $0x80] sm:$0xff]  ;;  %v35_v11 = vld [vmem:[%s1111_s0 + $0x88] sm:$0xff]  ;;  %v36_v12 = vld [vmem:[%s1111_s0 + $0x90] sm:$0xff] }
   0x8   :  { %v291_v26 = vmul.f32 %v539_v7, %v161_v19  ;;  %vm227_vm2 = vcmp.ge.f32.partialorder %v162_v20, 0.0  ;;  %v292_v27 = vmul.f32 %v539_v7, %v162_v20  ;;  %vm228_vm3 = vcmp.ge.f32.partialorder %v163_v21, 0.0 }
   0x9   :  { %v354_v28 = vsel %vm225_vm0, %v160_v14, %v290_v23  ;;  %v293_v29 = vmul.f32 %v539_v7, %v163_v21  ;;  %vm229_vm4 = vcmp.ge.f32.partialorder %v164_v24, 0.0  ;;  %v294_v35 = vmul.f32 %v539_v7, %v164_v24 }
   0xa   :  { %418 = vst [vmem:[%s1115_s4] sm:$0xff] %v354_v28  ;;  %v355_v33 = vsel %vm226_vm1, %v161_v19, %v291_v26  ;;  %v356_v34 = vsel %vm227_vm2, %v162_v20, %v292_v27  ;;  %vm230_vm5 = vcmp.ge.f32.partialorder %v165_v25, 0.0  ;;  %v295_v37 = vmul.f32 %v539_v7, %v165_v25  ;;  %v37_v19 = vld [vmem:[%s1111_s0 + $0x98] sm:$0xff]  ;;  %v38_v20 = vld [vmem:[%s1111_s0 + $0xa0] sm:$0xff] }
   0xb   :  { %419 = vst [vmem:[%s1115_s4 + $0x8] sm:$0xff] %v355_v33  ;;  %420 = vst [vmem:[%s1115_s4 + $0x10] sm:$0xff] %v356_v34  ;;  %v357_v36 = vsel %vm228_vm3, %v163_v21, %v293_v29  ;;  %v358_v40 = vsel %vm229_vm4, %v164_v24, %v294_v35  ;;  %v97_v41 = vmul.f32 %v519_v1, %v26_v30  ;;  %vm231_vm6 = vcmp.ge.f32.partialorder %v166_v38, 0.0  ;;  %v39_v34 = vld [vmem:[%s1111_s0 + $0xa8] sm:$0xff]  ;;  %v40_v35 = vld [vmem:[%s1111_s0 + $0xb0] sm:$0xff] }
   0xc   :  { %421 = vst [vmem:[%s1115_s4 + $0x18] sm:$0xff] %v357_v36  ;;  %v98_v42 = vmul.f32 %v519_v1, %v27_v31  ;;  %v99_v43 = vmul.f32 %v519_v1, %v28_v32  ;;  %422 = vst [vmem:[%s1115_s4 + $0x20] sm:$0xff] %v358_v40  ;;  %v359_v47 = vsel %vm230_vm5, %v165_v25, %v295_v37  ;;  %vm232_vm7 = vcmp.ge.f32.partialorder %v167_v39, 0.0 }
   0xd   :  { %v296_v48 = vmul.f32 %v539_v7, %v166_v38  ;;  %423 = vst [vmem:[%s1115_s4 + $0x28] sm:$0xff] %v359_v47  ;;  %v297_v49 = vmul.f32 %v539_v7, %v167_v39  ;;  %v168_v50 = vadd.f32 %v524_v2, %v97_v41  ;;  %v100_v54 = vmul.f32 %v519_v1, %v29_v44  ;;  %v42_v47 = vld [vmem:[%s1111_s0 + $0xc0] sm:$0xff] }
   0xe   :  { %v169_v51 = vadd.f32 %v524_v2, %v98_v42  ;;  %v170_v52 = vadd.f32 %v524_v2, %v99_v43  ;;  %v101_v55 = vmul.f32 %v519_v1, %v30_v45  ;;  %v102_v56 = vmul.f32 %v519_v1, %v31_v46  ;;  %v41_v42 = vld [vmem:[%s1111_s0 + $0xb8] sm:$0xff] }
   0xf   :  { %v360_v53 = vsel %vm231_vm6, %v166_v38, %v296_v48  ;;  %v361_v58 = vsel %vm232_vm7, %v167_v39, %v297_v49  ;;  %vm233_vm8 = vcmp.ge.f32.partialorder %v168_v50, 0.0  ;;  %v298_v59 = vmul.f32 %v539_v7, %v168_v50  ;;  %v43_v48 = vld [vmem:[%s1111_s0 + $0xc8] sm:$0xff]  ;;  %v44_v49 = vld [vmem:[%s1111_s0 + $0xd0] sm:$0xff] }
  0x10   :  { %424 = vst [vmem:[%s1115_s4 + $0x30] sm:$0xff] %v360_v53  ;;  %vm234_vm9 = vcmp.ge.f32.partialorder %v169_v51, 0.0  ;;  %425 = vst [vmem:[%s1115_s4 + $0x38] sm:$0xff] %v361_v58  ;;  %v299_v60 = vmul.f32 %v539_v7, %v169_v51  ;;  %vm235_vm10 = vcmp.ge.f32.partialorder %v170_v52, 0.0  ;;  %v300_v61 = vmul.f32 %v539_v7, %v170_v52 }
  0x11   :  { %v171_v62 = vadd.f32 %v524_v2, %v100_v54  ;;  %v362_v63 = vsel %vm233_vm8, %v168_v50, %v298_v59  ;;  %v172_v0 = vadd.f32 %v524_v2, %v101_v55  ;;  %v173_v3 = vadd.f32 %v524_v2, %v102_v56 }
  0x12   :  { %v103_v4 = vmul.f32 %v519_v1, %v32_v57  ;;  %426 = vst [vmem:[%s1115_s4 + $0x40] sm:$0xff] %v362_v63  ;;  %v363_v8 = vsel %vm234_vm9, %v169_v51, %v299_v60  ;;  %v364_v9 = vsel %vm235_vm10, %v170_v52, %v300_v61  ;;  %v104_v17 = vmul.f32 %v519_v1, %v33_v5  ;;  %v45_v60 = vld [vmem:[%s1111_s0 + $0xd8] sm:$0xff]  ;;  %v46_v61 = vld [vmem:[%s1111_s0 + $0xe0] sm:$0xff] }
  0x13   :  { %vm236_vm11 = vcmp.ge.f32.partialorder %v171_v62, 0.0  ;;  %v301_v10 = vmul.f32 %v539_v7, %v171_v62  ;;  %427 = vst [vmem:[%s1115_s4 + $0x48] sm:$0xff] %v363_v8  ;;  %428 = vst [vmem:[%s1115_s4 + $0x50] sm:$0xff] %v364_v9  ;;  %vm237_vm12 = vcmp.ge.f32.partialorder %v172_v0, 0.0  ;;  %v302_v13 = vmul.f32 %v539_v7, %v172_v0 }
  0x14   :  { %vm238_vm13 = vcmp.ge.f32.partialorder %v173_v3, 0.0  ;;  %v303_v14 = vmul.f32 %v539_v7, %v173_v3  ;;  %v174_v16 = vadd.f32 %v524_v2, %v103_v4  ;;  %v105_v18 = vmul.f32 %v519_v1, %v34_v6 }
  0x15   :  { %v365_v15 = vsel %vm236_vm11, %v171_v62, %v301_v10  ;;  %v366_v21 = vsel %vm237_vm12, %v172_v0, %v302_v13  ;;  %v106_v23 = vmul.f32 %v519_v1, %v35_v11  ;;  %v107_v24 = vmul.f32 %v519_v1, %v36_v12  ;;  %v47_v13 = vld [vmem:[%s1111_s0 + $0xe8] sm:$0xff] }
  0x16   :  { %429 = vst [vmem:[%s1115_s4 + $0x58] sm:$0xff] %v365_v15  ;;  %v367_v22 = vsel %vm238_vm13, %v173_v3, %v303_v14  ;;  %430 = vst [vmem:[%s1115_s4 + $0x60] sm:$0xff] %v366_v21  ;;  %vm239_vm14 = vcmp.ge.f32.partialorder %v174_v16, 0.0  ;;  %v304_v25 = vmul.f32 %v539_v7, %v174_v16  ;;  %v175_v26 = vadd.f32 %v524_v2, %v104_v17  ;;  %v48_v14 = vld [vmem:[%s1111_s0 + $0xf0] sm:$0xff]  ;;  %v49_v21 = vld [vmem:[%s1111_s0 + $0xf8] sm:$0xff] }
  0x17   :  { %431 = vst [vmem:[%s1115_s4 + $0x68] sm:$0xff] %v367_v22  ;;  %v176_v27 = vadd.f32 %v524_v2, %v105_v18  ;;  %v177_v28 = vadd.f32 %v524_v2, %v106_v23  ;;  %v178_v29 = vadd.f32 %v524_v2, %v107_v24  ;;  %v108_v30 = vmul.f32 %v519_v1, %v37_v19 }
  0x18   :  { %v109_v31 = vmul.f32 %v519_v1, %v38_v20  ;;  %v368_v32 = vsel %vm239_vm14, %v174_v16, %v304_v25  ;;  %vm240_vm15 = vcmp.ge.f32.partialorder %v175_v26, 0.0  ;;  %v305_v33 = vmul.f32 %v539_v7, %v175_v26 }
  0x19   :  { %vm241_vm0 = vcmp.ge.f32.partialorder %v176_v27, 0.0  ;;  %432 = vst [vmem:[%s1115_s4 + $0x70] sm:$0xff] %v368_v32  ;;  %v306_v36 = vmul.f32 %v539_v7, %v176_v27  ;;  %vm242_vm1 = vcmp.ge.f32.partialorder %v177_v28, 0.0  ;;  %v307_v37 = vmul.f32 %v539_v7, %v177_v28 }
  0x1a   :  { %vm243_vm2 = vcmp.ge.f32.partialorder %v178_v29, 0.0  ;;  %v369_v38 = vsel %vm240_vm15, %v175_v26, %v305_v33  ;;  %v308_v39 = vmul.f32 %v539_v7, %v178_v29  ;;  %v179_v40 = vadd.f32 %v524_v2, %v108_v30  ;;  %v50_v26 = vld [vmem:[%s1111_s0 + $0x100] sm:$0xff] }
  0x1b   :  { %v180_v41 = vadd.f32 %v524_v2, %v109_v31  ;;  %433 = vst [vmem:[%s1115_s4 + $0x78] sm:$0xff] %v369_v38  ;;  %v370_v43 = vsel %vm241_vm0, %v176_v27, %v306_v36  ;;  %v371_v44 = vsel %vm242_vm1, %v177_v28, %v307_v37  ;;  %v110_v45 = vmul.f32 %v519_v1, %v39_v34  ;;  %v51_v27 = vld [vmem:[%s1111_s0 + $0x108] sm:$0xff]  ;;  %v52_v28 = vld [vmem:[%s1111_s0 + $0x110] sm:$0xff] }
  0x1c   :  { %v111_v46 = vmul.f32 %v519_v1, %v40_v35  ;;  %434 = vst [vmem:[%s1115_s4 + $0x80] sm:$0xff] %v370_v43  ;;  %435 = vst [vmem:[%s1115_s4 + $0x88] sm:$0xff] %v371_v44  ;;  %v372_v50 = vsel %vm243_vm2, %v178_v29, %v308_v39  ;;  %vm244_vm3 = vcmp.ge.f32.partialorder %v179_v40, 0.0  ;;  %v309_v51 = vmul.f32 %v539_v7, %v179_v40  ;;  %v53_v39 = vld [vmem:[%s1111_s0 + $0x118] sm:$0xff] }
  0x1d   :  { %vm245_vm4 = vcmp.ge.f32.partialorder %v180_v41, 0.0  ;;  %436 = vst [vmem:[%s1115_s4 + $0x90] sm:$0xff] %v372_v50  ;;  %v310_v52 = vmul.f32 %v539_v7, %v180_v41  ;;  %v181_v53 = vadd.f32 %v524_v2, %v110_v45  ;;  %v112_v55 = vmul.f32 %v519_v1, %v41_v42 }
  0x1e   :  { %v182_v54 = vadd.f32 %v524_v2, %v111_v46  ;;  %v373_v56 = vsel %vm244_vm3, %v179_v40, %v309_v51  ;;  %v113_v57 = vmul.f32 %v519_v1, %v42_v47  ;;  %v114_v58 = vmul.f32 %v519_v1, %v43_v48  ;;  %v54_v40 = vld [vmem:[%s1111_s0 + $0x120] sm:$0xff] }
  0x1f   :  { %v115_v59 = vmul.f32 %v519_v1, %v44_v49  ;;  %437 = vst [vmem:[%s1115_s4 + $0x98] sm:$0xff] %v373_v56  ;;  %v374_v62 = vsel %vm245_vm4, %v180_v41, %v310_v52  ;;  %vm246_vm5 = vcmp.ge.f32.partialorder %v181_v53, 0.0  ;;  %v311_v63 = vmul.f32 %v539_v7, %v181_v53 }
  0x20   :  { %vm247_vm6 = vcmp.ge.f32.partialorder %v182_v54, 0.0  ;;  %438 = vst [vmem:[%s1115_s4 + $0xa0] sm:$0xff] %v374_v62  ;;  %v312_v0 = vmul.f32 %v539_v7, %v182_v54  ;;  %v183_v3 = vadd.f32 %v524_v2, %v112_v55  ;;  %v184_v4 = vadd.f32 %v524_v2, %v113_v57 }
  0x21   :  { %v185_v5 = vadd.f32 %v524_v2, %v114_v58  ;;  %v375_v6 = vsel %vm246_vm5, %v181_v53, %v311_v63  ;;  %v186_v8 = vadd.f32 %v524_v2, %v115_v59  ;;  %v116_v9 = vmul.f32 %v519_v1, %v45_v60  ;;  %v55_v53 = vld [vmem:[%s1111_s0 + $0x128] sm:$0xff] }
  0x22   :  { %v117_v10 = vmul.f32 %v519_v1, %v46_v61  ;;  %439 = vst [vmem:[%s1115_s4 + $0xa8] sm:$0xff] %v375_v6  ;;  %v376_v11 = vsel %vm247_vm6, %v182_v54, %v312_v0  ;;  %vm248_vm7 = vcmp.ge.f32.partialorder %v183_v3, 0.0  ;;  %v313_v12 = vmul.f32 %v539_v7, %v183_v3  ;;  %v56_v54 = vld [vmem:[%s1111_s0 + $0x130] sm:$0xff]  ;;  %v57_v61 = vld [vmem:[%s1111_s0 + $0x138] sm:$0xff] }
  0x23   :  { %vm249_vm8 = vcmp.ge.f32.partialorder %v184_v4, 0.0  ;;  %440 = vst [vmem:[%s1115_s4 + $0xb0] sm:$0xff] %v376_v11  ;;  %v314_v15 = vmul.f32 %v539_v7, %v184_v4  ;;  %vm250_vm9 = vcmp.ge.f32.partialorder %v185_v5, 0.0  ;;  %v315_v16 = vmul.f32 %v539_v7, %v185_v5  ;;  %v60_v6 = vld [vmem:[%s1111_s0 + $0x150] sm:$0xff] }
  0x24   :  { %vm251_vm10 = vcmp.ge.f32.partialorder %v186_v8, 0.0  ;;  %v377_v17 = vsel %vm248_vm7, %v183_v3, %v313_v12  ;;  %v316_v18 = vmul.f32 %v539_v7, %v186_v8  ;;  %v187_v19 = vadd.f32 %v524_v2, %v116_v9 }
  0x25   :  { %v188_v20 = vadd.f32 %v524_v2, %v117_v10  ;;  %441 = vst [vmem:[%s1115_s4 + $0xb8] sm:$0xff] %v377_v17  ;;  %v378_v22 = vsel %vm249_vm8, %v184_v4, %v314_v15  ;;  %v379_v23 = vsel %vm250_vm9, %v185_v5, %v315_v16  ;;  %v118_v24 = vmul.f32 %v519_v1, %v47_v13  ;;  %v58_v4 = vld [vmem:[%s1111_s0 + $0x140] sm:$0xff]  ;;  %v59_v5 = vld [vmem:[%s1111_s0 + $0x148] sm:$0xff] }
  0x26   :  { %v119_v25 = vmul.f32 %v519_v1, %v48_v14  ;;  %442 = vst [vmem:[%s1115_s4 + $0xc0] sm:$0xff] %v378_v22  ;;  %443 = vst [vmem:[%s1115_s4 + $0xc8] sm:$0xff] %v379_v23  ;;  %v380_v29 = vsel %vm251_vm10, %v186_v8, %v316_v18  ;;  %vm252_vm11 = vcmp.ge.f32.partialorder %v187_v19, 0.0  ;;  %v317_v30 = vmul.f32 %v539_v7, %v187_v19  ;;  %v61_v18 = vld [vmem:[%s1111_s0 + $0x158] sm:$0xff] }
  0x27   :  { %vm253_vm12 = vcmp.ge.f32.partialorder %v188_v20, 0.0  ;;  %444 = vst [vmem:[%s1115_s4 + $0xd0] sm:$0xff] %v380_v29  ;;  %v318_v31 = vmul.f32 %v539_v7, %v188_v20  ;;  %v189_v32 = vadd.f32 %v524_v2, %v118_v24  ;;  %v120_v34 = vmul.f32 %v519_v1, %v49_v21 }
  0x28   :  { %v190_v33 = vadd.f32 %v524_v2, %v119_v25  ;;  %v381_v35 = vsel %vm252_vm11, %v187_v19, %v317_v30  ;;  %v121_v36 = vmul.f32 %v519_v1, %v50_v26  ;;  %v122_v37 = vmul.f32 %v519_v1, %v51_v27  ;;  %v62_v19 = vld [vmem:[%s1111_s0 + $0x160] sm:$0xff] }
  0x29   :  { %v123_v38 = vmul.f32 %v519_v1, %v52_v28  ;;  %445 = vst [vmem:[%s1115_s4 + $0xd8] sm:$0xff] %v381_v35  ;;  %v382_v41 = vsel %vm253_vm12, %v188_v20, %v318_v31  ;;  %vm254_vm13 = vcmp.ge.f32.partialorder %v189_v32, 0.0  ;;  %v319_v42 = vmul.f32 %v539_v7, %v189_v32 }
  0x2a   :  { %vm255_vm14 = vcmp.ge.f32.partialorder %v190_v33, 0.0  ;;  %446 = vst [vmem:[%s1115_s4 + $0xe0] sm:$0xff] %v382_v41  ;;  %v320_v43 = vmul.f32 %v539_v7, %v190_v33  ;;  %v191_v44 = vadd.f32 %v524_v2, %v120_v34  ;;  %v192_v45 = vadd.f32 %v524_v2, %v121_v36 }
  0x2b   :  { %v193_v46 = vadd.f32 %v524_v2, %v122_v37  ;;  %v383_v47 = vsel %vm254_vm13, %v189_v32, %v319_v42  ;;  %v194_v48 = vadd.f32 %v524_v2, %v123_v38  ;;  %v124_v49 = vmul.f32 %v519_v1, %v53_v39  ;;  %v63_v32 = vld [vmem:[%s1111_s0 + $0x168] sm:$0xff] }
  0x2c   :  { %v125_v50 = vmul.f32 %v519_v1, %v54_v40  ;;  %447 = vst [vmem:[%s1115_s4 + $0xe8] sm:$0xff] %v383_v47  ;;  %v384_v51 = vsel %vm255_vm14, %v190_v33, %v320_v43  ;;  %vm256_vm15 = vcmp.ge.f32.partialorder %v191_v44, 0.0  ;;  %v321_v52 = vmul.f32 %v539_v7, %v191_v44  ;;  %v64_v33 = vld [vmem:[%s1111_s0 + $0x170] sm:$0xff]  ;;  %v65_v40 = vld [vmem:[%s1111_s0 + $0x178] sm:$0xff] }
  0x2d   :  { %vm257_vm0 = vcmp.ge.f32.partialorder %v192_v45, 0.0  ;;  %448 = vst [vmem:[%s1115_s4 + $0xf0] sm:$0xff] %v384_v51  ;;  %v322_v55 = vmul.f32 %v539_v7, %v192_v45  ;;  %vm258_vm1 = vcmp.ge.f32.partialorder %v193_v46, 0.0  ;;  %v323_v56 = vmul.f32 %v539_v7, %v193_v46  ;;  %v68_v47 = vld [vmem:[%s1111_s0 + $0x190] sm:$0xff] }
  0x2e   :  { %vm259_vm2 = vcmp.ge.f32.partialorder %v194_v48, 0.0  ;;  %v385_v57 = vsel %vm256_vm15, %v191_v44, %v321_v52  ;;  %v324_v58 = vmul.f32 %v539_v7, %v194_v48  ;;  %v195_v59 = vadd.f32 %v524_v2, %v124_v49 }
  0x2f   :  { %v196_v60 = vadd.f32 %v524_v2, %v125_v50  ;;  %449 = vst [vmem:[%s1115_s4 + $0xf8] sm:$0xff] %v385_v57  ;;  %v386_v62 = vsel %vm257_vm0, %v192_v45, %v322_v55  ;;  %v387_v63 = vsel %vm258_vm1, %v193_v46, %v323_v56  ;;  %v126_v0 = vmul.f32 %v519_v1, %v55_v53  ;;  %v66_v45 = vld [vmem:[%s1111_s0 + $0x180] sm:$0xff]  ;;  %v67_v46 = vld [vmem:[%s1111_s0 + $0x188] sm:$0xff] }
  0x30   :  { %v127_v3 = vmul.f32 %v519_v1, %v56_v54  ;;  %450 = vst [vmem:[%s1115_s4 + $0x100] sm:$0xff] %v386_v62  ;;  %451 = vst [vmem:[%s1115_s4 + $0x108] sm:$0xff] %v387_v63  ;;  %v388_v8 = vsel %vm259_vm2, %v194_v48, %v324_v58  ;;  %vm260_vm3 = vcmp.ge.f32.partialorder %v195_v59, 0.0  ;;  %v325_v9 = vmul.f32 %v539_v7, %v195_v59  ;;  %v69_v58 = vld [vmem:[%s1111_s0 + $0x198] sm:$0xff] }
  0x31   :  { %vm261_vm4 = vcmp.ge.f32.partialorder %v196_v60, 0.0  ;;  %452 = vst [vmem:[%s1115_s4 + $0x110] sm:$0xff] %v388_v8  ;;  %v326_v10 = vmul.f32 %v539_v7, %v196_v60  ;;  %v197_v11 = vadd.f32 %v524_v2, %v126_v0  ;;  %v128_v13 = vmul.f32 %v519_v1, %v57_v61 }
  0x32   :  { %v198_v12 = vadd.f32 %v524_v2, %v127_v3  ;;  %v389_v14 = vsel %vm260_vm3, %v195_v59, %v325_v9  ;;  %v129_v15 = vmul.f32 %v519_v1, %v58_v4  ;;  %v130_v16 = vmul.f32 %v519_v1, %v59_v5  ;;  %v70_v59 = vld [vmem:[%s1111_s0 + $0x1a0] sm:$0xff] }
  0x33   :  { %v131_v17 = vmul.f32 %v519_v1, %v60_v6  ;;  %453 = vst [vmem:[%s1115_s4 + $0x118] sm:$0xff] %v389_v14  ;;  %v390_v20 = vsel %vm261_vm4, %v196_v60, %v326_v10  ;;  %vm262_vm5 = vcmp.ge.f32.partialorder %v197_v11, 0.0  ;;  %v327_v21 = vmul.f32 %v539_v7, %v197_v11 }
  0x34   :  { %vm263_vm6 = vcmp.ge.f32.partialorder %v198_v12, 0.0  ;;  %454 = vst [vmem:[%s1115_s4 + $0x120] sm:$0xff] %v390_v20  ;;  %v328_v22 = vmul.f32 %v539_v7, %v198_v12  ;;  %v199_v23 = vadd.f32 %v524_v2, %v128_v13  ;;  %v200_v24 = vadd.f32 %v524_v2, %v129_v15 }
  0x35   :  { %v201_v25 = vadd.f32 %v524_v2, %v130_v16  ;;  %v391_v26 = vsel %vm262_vm5, %v197_v11, %v327_v21  ;;  %v202_v27 = vadd.f32 %v524_v2, %v131_v17  ;;  %v132_v28 = vmul.f32 %v519_v1, %v61_v18  ;;  %v71_v11 = vld [vmem:[%s1111_s0 + $0x1a8] sm:$0xff] }
  0x36   :  { %v133_v29 = vmul.f32 %v519_v1, %v62_v19  ;;  %455 = vst [vmem:[%s1115_s4 + $0x128] sm:$0xff] %v391_v26  ;;  %v392_v30 = vsel %vm263_vm6, %v198_v12, %v328_v22  ;;  %vm264_vm7 = vcmp.ge.f32.partialorder %v199_v23, 0.0  ;;  %v329_v31 = vmul.f32 %v539_v7, %v199_v23  ;;  %v72_v12 = vld [vmem:[%s1111_s0 + $0x1b0] sm:$0xff]  ;;  %v73_v19 = vld [vmem:[%s1111_s0 + $0x1b8] sm:$0xff] }
  0x37   :  { %vm265_vm8 = vcmp.ge.f32.partialorder %v200_v24, 0.0  ;;  %456 = vst [vmem:[%s1115_s4 + $0x130] sm:$0xff] %v392_v30  ;;  %v330_v34 = vmul.f32 %v539_v7, %v200_v24  ;;  %vm266_vm9 = vcmp.ge.f32.partialorder %v201_v25, 0.0  ;;  %v331_v35 = vmul.f32 %v539_v7, %v201_v25  ;;  %v76_v26 = vld [vmem:[%s1111_s0 + $0x1d0] sm:$0xff] }
  0x38   :  { %vm267_vm10 = vcmp.ge.f32.partialorder %v202_v27, 0.0  ;;  %v393_v36 = vsel %vm264_vm7, %v199_v23, %v329_v31  ;;  %v332_v37 = vmul.f32 %v539_v7, %v202_v27  ;;  %v203_v38 = vadd.f32 %v524_v2, %v132_v28 }
  0x39   :  { %v204_v39 = vadd.f32 %v524_v2, %v133_v29  ;;  %457 = vst [vmem:[%s1115_s4 + $0x138] sm:$0xff] %v393_v36  ;;  %v394_v41 = vsel %vm265_vm8, %v200_v24, %v330_v34  ;;  %v395_v42 = vsel %vm266_vm9, %v201_v25, %v331_v35  ;;  %v134_v43 = vmul.f32 %v519_v1, %v63_v32  ;;  %v74_v24 = vld [vmem:[%s1111_s0 + $0x1c0] sm:$0xff]  ;;  %v75_v25 = vld [vmem:[%s1111_s0 + $0x1c8] sm:$0xff] }
  0x3a   :  { %v135_v44 = vmul.f32 %v519_v1, %v64_v33  ;;  %458 = vst [vmem:[%s1115_s4 + $0x140] sm:$0xff] %v394_v41  ;;  %459 = vst [vmem:[%s1115_s4 + $0x148] sm:$0xff] %v395_v42  ;;  %v396_v48 = vsel %vm267_vm10, %v202_v27, %v332_v37  ;;  %vm268_vm11 = vcmp.ge.f32.partialorder %v203_v38, 0.0  ;;  %v333_v49 = vmul.f32 %v539_v7, %v203_v38  ;;  %v77_v37 = vld [vmem:[%s1111_s0 + $0x1d8] sm:$0xff] }
  0x3b   :  { %vm269_vm12 = vcmp.ge.f32.partialorder %v204_v39, 0.0  ;;  %460 = vst [vmem:[%s1115_s4 + $0x150] sm:$0xff] %v396_v48  ;;  %v334_v50 = vmul.f32 %v539_v7, %v204_v39  ;;  %v205_v51 = vadd.f32 %v524_v2, %v134_v43  ;;  %v136_v53 = vmul.f32 %v519_v1, %v65_v40 }
  0x3c   :  { %v206_v52 = vadd.f32 %v524_v2, %v135_v44  ;;  %v397_v54 = vsel %vm268_vm11, %v203_v38, %v333_v49  ;;  %v137_v55 = vmul.f32 %v519_v1, %v66_v45  ;;  %v138_v56 = vmul.f32 %v519_v1, %v67_v46  ;;  %v78_v38 = vld [vmem:[%s1111_s0 + $0x1e0] sm:$0xff] }
  0x3d   :  { %v139_v57 = vmul.f32 %v519_v1, %v68_v47  ;;  %461 = vst [vmem:[%s1115_s4 + $0x158] sm:$0xff] %v397_v54  ;;  %v398_v60 = vsel %vm269_vm12, %v204_v39, %v334_v50  ;;  %vm270_vm13 = vcmp.ge.f32.partialorder %v205_v51, 0.0  ;;  %v335_v61 = vmul.f32 %v539_v7, %v205_v51 }
  0x3e   :  { %vm271_vm14 = vcmp.ge.f32.partialorder %v206_v52, 0.0  ;;  %462 = vst [vmem:[%s1115_s4 + $0x160] sm:$0xff] %v398_v60  ;;  %v336_v62 = vmul.f32 %v539_v7, %v206_v52  ;;  %v207_v63 = vadd.f32 %v524_v2, %v136_v53  ;;  %v208_v0 = vadd.f32 %v524_v2, %v137_v55 }
  0x3f   :  { %v209_v3 = vadd.f32 %v524_v2, %v138_v56  ;;  %v399_v4 = vsel %vm270_vm13, %v205_v51, %v335_v61  ;;  %v210_v5 = vadd.f32 %v524_v2, %v139_v57  ;;  %v140_v6 = vmul.f32 %v519_v1, %v69_v58  ;;  %v79_v51 = vld [vmem:[%s1111_s0 + $0x1e8] sm:$0xff] }
  0x40   :  { %v141_v8 = vmul.f32 %v519_v1, %v70_v59  ;;  %463 = vst [vmem:[%s1115_s4 + $0x168] sm:$0xff] %v399_v4  ;;  %v400_v9 = vsel %vm271_vm14, %v206_v52, %v336_v62  ;;  %vm272_vm15 = vcmp.ge.f32.partialorder %v207_v63, 0.0  ;;  %v337_v10 = vmul.f32 %v539_v7, %v207_v63  ;;  %v80_v52 = vld [vmem:[%s1111_s0 + $0x1f0] sm:$0xff]  ;;  %v81_v59 = vld [vmem:[%s1111_s0 + $0x1f8] sm:$0xff] }
  0x41   :  { %vm273_vm0 = vcmp.ge.f32.partialorder %v208_v0, 0.0  ;;  %464 = vst [vmem:[%s1115_s4 + $0x170] sm:$0xff] %v400_v9  ;;  %v338_v13 = vmul.f32 %v539_v7, %v208_v0  ;;  %vm274_vm1 = vcmp.ge.f32.partialorder %v209_v3, 0.0  ;;  %v339_v14 = vmul.f32 %v539_v7, %v209_v3 }
  0x42   :  { %vm275_vm2 = vcmp.ge.f32.partialorder %v210_v5, 0.0  ;;  %v401_v15 = vsel %vm272_vm15, %v207_v63, %v337_v10  ;;  %v340_v16 = vmul.f32 %v539_v7, %v210_v5  ;;  %v211_v17 = vadd.f32 %v524_v2, %v140_v6 }
  0x43   :  { %v212_v18 = vadd.f32 %v524_v2, %v141_v8  ;;  %465 = vst [vmem:[%s1115_s4 + $0x178] sm:$0xff] %v401_v15  ;;  %v402_v20 = vsel %vm273_vm0, %v208_v0, %v338_v13  ;;  %v403_v21 = vsel %vm274_vm1, %v209_v3, %v339_v14  ;;  %v142_v22 = vmul.f32 %v519_v1, %v71_v11 }
  0x44   :  { %v143_v23 = vmul.f32 %v519_v1, %v72_v12  ;;  %466 = vst [vmem:[%s1115_s4 + $0x180] sm:$0xff] %v402_v20  ;;  %467 = vst [vmem:[%s1115_s4 + $0x188] sm:$0xff] %v403_v21  ;;  %v404_v27 = vsel %vm275_vm2, %v210_v5, %v340_v16  ;;  %vm276_vm3 = vcmp.ge.f32.partialorder %v211_v17, 0.0  ;;  %v341_v28 = vmul.f32 %v539_v7, %v211_v17 }
  0x45   :  { %vm277_vm4 = vcmp.ge.f32.partialorder %v212_v18, 0.0  ;;  %468 = vst [vmem:[%s1115_s4 + $0x190] sm:$0xff] %v404_v27  ;;  %v342_v29 = vmul.f32 %v539_v7, %v212_v18  ;;  %v213_v30 = vadd.f32 %v524_v2, %v142_v22  ;;  %v144_v32 = vmul.f32 %v519_v1, %v73_v19 }
  0x46   :  { %v214_v31 = vadd.f32 %v524_v2, %v143_v23  ;;  %v405_v33 = vsel %vm276_vm3, %v211_v17, %v341_v28  ;;  %v145_v34 = vmul.f32 %v519_v1, %v74_v24  ;;  %v146_v35 = vmul.f32 %v519_v1, %v75_v25 }
  0x47   :  { %v147_v36 = vmul.f32 %v519_v1, %v76_v26  ;;  %469 = vst [vmem:[%s1115_s4 + $0x198] sm:$0xff] %v405_v33  ;;  %v406_v39 = vsel %vm277_vm4, %v212_v18, %v342_v29  ;;  %vm278_vm5 = vcmp.ge.f32.partialorder %v213_v30, 0.0  ;;  %v343_v40 = vmul.f32 %v539_v7, %v213_v30 }
  0x48   :  { %vm279_vm6 = vcmp.ge.f32.partialorder %v214_v31, 0.0  ;;  %470 = vst [vmem:[%s1115_s4 + $0x1a0] sm:$0xff] %v406_v39  ;;  %v344_v41 = vmul.f32 %v539_v7, %v214_v31  ;;  %v215_v42 = vadd.f32 %v524_v2, %v144_v32  ;;  %v216_v43 = vadd.f32 %v524_v2, %v145_v34 }
  0x49   :  { %v217_v44 = vadd.f32 %v524_v2, %v146_v35  ;;  %v407_v45 = vsel %vm278_vm5, %v213_v30, %v343_v40  ;;  %v218_v46 = vadd.f32 %v524_v2, %v147_v36  ;;  %v148_v47 = vmul.f32 %v519_v1, %v77_v37 }
  0x4a   :  { %v149_v48 = vmul.f32 %v519_v1, %v78_v38  ;;  %471 = vst [vmem:[%s1115_s4 + $0x1a8] sm:$0xff] %v407_v45  ;;  %v408_v49 = vsel %vm279_vm6, %v214_v31, %v344_v41  ;;  %vm280_vm7 = vcmp.ge.f32.partialorder %v215_v42, 0.0  ;;  %v345_v50 = vmul.f32 %v539_v7, %v215_v42 }
  0x4b   :  { %vm281_vm8 = vcmp.ge.f32.partialorder %v216_v43, 0.0  ;;  %472 = vst [vmem:[%s1115_s4 + $0x1b0] sm:$0xff] %v408_v49  ;;  %v346_v53 = vmul.f32 %v539_v7, %v216_v43  ;;  %vm282_vm9 = vcmp.ge.f32.partialorder %v217_v44, 0.0  ;;  %v347_v54 = vmul.f32 %v539_v7, %v217_v44 }
  0x4c   :  { %vm283_vm10 = vcmp.ge.f32.partialorder %v218_v46, 0.0  ;;  %v409_v55 = vsel %vm280_vm7, %v215_v42, %v345_v50  ;;  %v348_v56 = vmul.f32 %v539_v7, %v218_v46  ;;  %v219_v57 = vadd.f32 %v524_v2, %v148_v47 }
  0x4d   :  { %v220_v58 = vadd.f32 %v524_v2, %v149_v48  ;;  %473 = vst [vmem:[%s1115_s4 + $0x1b8] sm:$0xff] %v409_v55  ;;  %v410_v60 = vsel %vm281_vm8, %v216_v43, %v346_v53  ;;  %v411_v61 = vsel %vm282_vm9, %v217_v44, %v347_v54  ;;  %v150_v62 = vmul.f32 %v519_v1, %v79_v51 }
  0x4e   :  { %v151_v63 = vmul.f32 %v519_v1, %v80_v52  ;;  %474 = vst [vmem:[%s1115_s4 + $0x1c0] sm:$0xff] %v410_v60  ;;  %475 = vst [vmem:[%s1115_s4 + $0x1c8] sm:$0xff] %v411_v61  ;;  %v412_v0 = vsel %vm283_vm10, %v218_v46, %v348_v56  ;;  %vm284_vm11 = vcmp.ge.f32.partialorder %v219_v57, 0.0  ;;  %v349_v3 = vmul.f32 %v539_v7, %v219_v57 }
  0x4f   :  { %vm285_vm12 = vcmp.ge.f32.partialorder %v220_v58, 0.0  ;;  %476 = vst [vmem:[%s1115_s4 + $0x1d0] sm:$0xff] %v412_v0  ;;  %v350_v4 = vmul.f32 %v539_v7, %v220_v58  ;;  %v221_v5 = vadd.f32 %v524_v2, %v150_v62  ;;  %v152_v8 = vmul.f32 %v519_v1, %v81_v59 }
  0x50   :  { %v222_v6 = vadd.f32 %v524_v2, %v151_v63  ;;  %v413_v9 = vsel %vm284_vm11, %v219_v57, %v349_v3 }
  0x51   :  { %477 = vst [vmem:[%s1115_s4 + $0x1d8] sm:$0xff] %v413_v9  ;;  %v414_v10 = vsel %vm285_vm12, %v220_v58, %v350_v4  ;;  %vm286_vm13 = vcmp.ge.f32.partialorder %v221_v5, 0.0  ;;  %v351_v11 = vmul.f32 %v539_v7, %v221_v5  ;;  %v223_v13 = vadd.f32 %v524_v2, %v152_v8 }
  0x52   :  { %vm287_vm14 = vcmp.ge.f32.partialorder %v222_v6, 0.0  ;;  %478 = vst [vmem:[%s1115_s4 + $0x1e0] sm:$0xff] %v414_v10  ;;  %v352_v12 = vmul.f32 %v539_v7, %v222_v6 }
  0x53   :  { %v415_v14 = vsel %vm286_vm13, %v221_v5, %v351_v11  ;;  %vm288_vm15 = vcmp.ge.f32.partialorder %v223_v13, 0.0  ;;  %v353_v15 = vmul.f32 %v539_v7, %v223_v13 }
  0x54   :  { %479 = vst [vmem:[%s1115_s4 + $0x1e8] sm:$0xff] %v415_v14  ;;  %v416_v1 = vsel %vm287_vm14, %v222_v6, %v352_v12 }
  0x55   :  { %480 = vst [vmem:[%s1115_s4 + $0x1f0] sm:$0xff] %v416_v1  ;;  %v417_v16 = vsel %vm288_vm15, %v223_v13, %v353_v15 }
  0x56   :  { %481 = vst [vmem:[%s1115_s4 + $0x1f8] sm:$0xff] %v417_v16 }

// kernel: double_conv_apply.3
= control target key start
LH: loop header
LB: loop body
LE: loop exit
PB: predicated region body
PF: predicated region fallthrough
CT: control target
= control target key end

     0   :  { %s3864_s29 = smov 0   ;;  %s3866_s30 = smov 0   ;;  %s5737_s0 = inlined_call_operand.vmem [shape: f32[2,16,16,128], index: 0, kind: input, shape index: {}, may-alias: {0,1,2}]   ;;  %s5738_s1 = inlined_call_operand.vmem [shape: f32[2,16,16,128], index: 1, kind: input, shape index: {}, may-alias: {0,1,2}]   ;;  %s5739_s2 = inlined_call_operand.vmem [shape: f32[2,16,16,128], index: 2, kind: input, shape index: {}, may-alias: {0,1,2}]   ;;  %s5740_s3 = inlined_call_operand.vmem [shape: f32[3,384,128], index: 3, kind: input, shape index: {}]   ;;  %s5741_s4 = inlined_call_operand.vmem [shape: f32[1,128], index: 4, kind: input, shape index: {}]   ;;  %s5742_s5 = inlined_call_operand.vmem [shape: f32[1,128], index: 5, kind: input, shape index: {}]   ;;  %s5743_s6 = inlined_call_operand.<no memory space> [shape: f32[1,1], index: 6, kind: input, shape index: {}]   ;;  %s5744_s7 = inlined_call_operand.vmem [shape: f32[2,16,16,128], index: 7, kind: output, shape index: {0}]   ;;  %s5745_s8 = inlined_call_operand.vmem [shape: f32[2,1,2,128], index: 8, kind: output, shape index: {1}]  }
   0x1   :  { %14 = sst [smem:[#allocation2]] %s5743_s6  ;;  %s3868_s9 = smov 0  }
   0x2 LB: > { %s32_s6 = sadd.s32 1, %s3809_s30  ;;  %p2880_p0 = scmp.ge.s32.totalorder %s3813_s9, 1  ;;  %s3813_s9 = sphi %s3868_s9, %s20_s9   ;;  %s3809_s30 = sphi %s3866_s30, %s5931_s30   ;;  %s3805_s29 = sphi %s3864_s29, %s5930_s29  }
   0x3   : > { %p34_p1 = scmp.ge.s32.totalorder %s32_s6, 2  ;;  %p354_p2 = scmp.lt.s32.totalorder %s3813_s9, 3 }
   0x5   : > { %s5933_s6 = smov (%p34_p1, %s32_s6), 0  ;;  %p355_p3 = pnand %p2880_p0, %p354_p2 }
   0x7   : > { %358 = sbr.rel (%p355_p3) target bundleno = 600 (0x258), region = 48 }
   0xe   : > { %v2892_v0 = vld [vmem:[%s5740_s3 + $0x180] sm:$0xff]  ;;  %v2893_v1 = vld [vmem:[%s5740_s3 + $0x188] sm:$0xff]  ;;  %p432_p4 = scmp.lt.s32.totalorder %s3805_s29, 1  ;;  %v5748_v3 = vmov 0.0|0.0   ;;  %v2894_v6 = vld [vmem:[%s5740_s3 + $0x190] sm:$0xff]  ;;  %s616_s16 = sld [smem:[#allocation2]] }
   0xf   : > { %v2924_v2 = vld [vmem:[%s5740_s3 + $0x280] sm:$0xff]  ;;  %3524 = vmatprep.subr.bf16.mxu0 %v5748_v3  ;;  %v3525_v4 = vpack.c.bf16 %v2893_v1, %v2892_v0  ;;  %v2925_v5 = vld [vmem:[%s5740_s3 + $0x288] sm:$0xff]  ;;  %v2895_v7 = vld [vmem:[%s5740_s3 + $0x198] sm:$0xff]  ;;  %vm920_vm2 = vcmask 1046528  }
  0x10   : > { %v3572_v8 = vpack.c.bf16 %v2925_v5, %v2924_v2  ;;  %v2926_v9 = vld [vmem:[%s5740_s3 + $0x290] sm:$0xff]  ;;  %v2927_v10 = vld [vmem:[%s5740_s3 + $0x298] sm:$0xff]  ;;  %s5935_s29 = smov (!%p432_p4, %s3805_s29), 1  ;;  %v3528_v11 = vpack.c.bf16 %v2895_v7, %v2894_v6  ;;  %v2928_v13 = vld [vmem:[%s5740_s3 + $0x2a0] sm:$0xff] }
  0x11   : > { %3526 = vmatpush1.bf16.msra.mxu0 %v3525_v4  ;;  %v3576_v12 = vpack.c.bf16 %v2927_v10, %v2926_v9  ;;  %v2929_v14 = vld [vmem:[%s5740_s3 + $0x2a8] sm:$0xff]  ;;  %v2896_v15 = vld [vmem:[%s5740_s3 + $0x1a0] sm:$0xff]  ;;  %s3923_s15 = sshll.u32 %s5935_s29, 8  ;;  %v2930_v19 = vld [vmem:[%s5740_s3 + $0x2b0] sm:$0xff] }
  0x12   : > { %3573 = vmatprep.subr.bf16.mxu1 %v3572_v8  ;;  %3527 = vmatprep.subr.bf16.mxu0 %v5748_v3  ;;  %v2897_v16 = vld [vmem:[%s5740_s3 + $0x1a8] sm:$0xff]  ;;  %v3580_v17 = vpack.c.bf16 %v2929_v14, %v2928_v13  ;;  %v2931_v20 = vld [vmem:[%s5740_s3 + $0x2b8] sm:$0xff]  ;;  %s3935_s23 = scalar_lea.vmem %s5737_s0, %s3923_s15  ;;  %v2898_v21 = vld [vmem:[%s5740_s3 + $0x1b0] sm:$0xff]  ;;  %s454_s27 = scalar_lea.vmem %s5738_s1, %s3923_s15 }
  0x13   : > { %3575 = vmatpush3.bf16.msra.mxu1 %v3572_v8  ;;  %v3531_v18 = vpack.c.bf16 %v2897_v16, %v2896_v15  ;;  %v2899_v22 = vld [vmem:[%s5740_s3 + $0x1b8] sm:$0xff]  ;;  %v3584_v23 = vpack.c.bf16 %v2931_v20, %v2930_v19  ;;  %v2932_v24 = vld [vmem:[%s5740_s3 + $0x2c0] sm:$0xff]  ;;  %v2933_v25 = vld [vmem:[%s5740_s3 + $0x2c8] sm:$0xff]  ;;  %s5651_s20 = scalar_lea.vmem %s5744_s7, %s3923_s15 }
  0x14   : > { %3577 = vmatprep.subr.bf16.mxu1 %v3576_v12  ;;  %v496_v26 = vld [vmem:[%s3935_s23] sm:$0xff]  ;;  %v3534_v27 = vpack.c.bf16 %v2899_v22, %v2898_v21  ;;  %v497_v28 = vld [vmem:[%s3935_s23 + $0x8] sm:$0xff]  ;;  %v3971_v35 = vstv %s616_s16  ;;  %v498_v36 = vld [vmem:[%s3935_s23 + $0x10] sm:$0xff]  ;;  %v3588_v38 = vpack.c.bf16 %v2933_v25, %v2932_v24  ;;  %s3137_s16 = sadd.s32 240, %s3923_s15  ;;  %s2889_s15 = sshll.u32 %s5935_s29, 1 }
  0x15   : > { %3529 = vmatpush1.bf16.msra.mxu0 %v3528_v11  ;;  %v3955_v29 = vld [vmem:[%s5741_s4] ss:$0 sm:$0xff]  ;;  %v2901_v32 = vld [vmem:[%s5740_s3 + $0x1c8] sm:$0xff]  ;;  %5826 = vst [vmem:[#allocation3_spill] sm:$0xff] %v3971_v35  ;;  %v499_v37 = vld [vmem:[%s3935_s23 + $0x18] sm:$0xff]  ;;  %s471_s11 = scalar_lea.vmem %s5739_s2, %s3137_s16  ;;  %s493_s24 = scalar_lea.vmem %s5745_s8, %s2889_s15 }
  0x16   : > { %3530 = vmatprep.subr.bf16.mxu0 %v5748_v3  ;;  %v3960_v30 = vld [vmem:[%s5742_s5] ss:$0 sm:$0xff]  ;;  %v539_v33 = vmul.f32 %v3955_v29, %v496_v26  ;;  %v540_v34 = vmul.f32 %v3955_v29, %v497_v28  ;;  %v2934_v39 = vld [vmem:[%s5740_s3 + $0x2d0] sm:$0xff]  ;;  %v2935_v40 = vld [vmem:[%s5740_s3 + $0x2d8] sm:$0xff]  ;;  %v541_v43 = vmul.f32 %v3955_v29, %v498_v36  ;;  %v542_v45 = vmul.f32 %v3955_v29, %v499_v37 }
  0x17   : > { %3579 = vmatpush3.bf16.msra.mxu1 %v3576_v12  ;;  %v2900_v31 = vld [vmem:[%s5740_s3 + $0x1c0] sm:$0xff]  ;;  %v501_v47 = vld [vmem:[%s3935_s23 + $0x28] sm:$0xff]  ;;  %v2902_v48 = vld [vmem:[%s5740_s3 + $0x1d0] sm:$0xff]  ;;  %v3592_v52 = vpack.c.bf16 %v2935_v40, %v2934_v39 }
  0x18   : > { %3581 = vmatprep.subr.bf16.mxu1 %v3580_v17  ;;  %v582_v41 = vadd.f32 %v3960_v30, %v539_v33  ;;  %v583_v42 = vadd.f32 %v3960_v30, %v540_v34  ;;  %v3537_v44 = vpack.c.bf16 %v2901_v32, %v2900_v31  ;;  %v500_v46 = vld [vmem:[%s3935_s23 + $0x20] sm:$0xff]  ;;  %v2903_v49 = vld [vmem:[%s5740_s3 + $0x1d8] sm:$0xff]  ;;  %v584_v53 = vadd.f32 %v3960_v30, %v541_v43  ;;  %v502_v59 = vld [vmem:[%s3935_s23 + $0x30] sm:$0xff] }
  0x19   : > { %3532 = vmatpush1.bf16.msra.mxu0 %v3531_v18  ;;  %v543_v54 = vmul.f32 %v3955_v29, %v500_v46  ;;  %v585_v57 = vadd.f32 %v3960_v30, %v542_v45  ;;  %v544_v58 = vmul.f32 %v3955_v29, %v501_v47  ;;  %v503_v60 = vld [vmem:[%s3935_s23 + $0x38] sm:$0xff]  ;;  %v3540_v61 = vpack.c.bf16 %v2903_v49, %v2902_v48  ;;  %v2936_v62 = vld [vmem:[%s5740_s3 + $0x2e0] sm:$0xff]  ;;  %v2937_v63 = vld [vmem:[%s5740_s3 + $0x2e8] sm:$0xff] }
  0x1a   : > { %3533 = vmatprep.subr.bf16.mxu0 %v5748_v3  ;;  %vm619_vm0 = vcmp.ge.f32.partialorder %v582_v41, 0.0  ;;  %vm620_vm1 = vcmp.ge.f32.partialorder %v583_v42, 0.0  ;;  %v656_v50 = vmul.f32 %v3971_v35, %v582_v41  ;;  %v657_v51 = vmul.f32 %v3971_v35, %v583_v42  ;;  %v2904_v2 = vld [vmem:[%s5740_s3 + $0x1e0] sm:$0xff]  ;;  %v2905_v4 = vld [vmem:[%s5740_s3 + $0x1e8] sm:$0xff]  ;;  %v2938_v11 = vld [vmem:[%s5740_s3 + $0x2f0] sm:$0xff] }
  0x1b   : > { %3583 = vmatpush3.bf16.msra.mxu1 %v3580_v17  ;;  %v658_v5 = vmul.f32 %v3971_v35, %v584_v53  ;;  %v586_v7 = vadd.f32 %v3960_v30, %v543_v54  ;;  %v545_v8 = vmul.f32 %v3955_v29, %v502_v59  ;;  %v546_v9 = vmul.f32 %v3955_v29, %v503_v60  ;;  %v2939_v12 = vld [vmem:[%s5740_s3 + $0x2f8] sm:$0xff]  ;;  %v504_v16 = vld [vmem:[%s3935_s23 + $0x40] sm:$0xff]  ;;  %v2906_v17 = vld [vmem:[%s5740_s3 + $0x1f0] sm:$0xff] }
  0x1c   : > { %3585 = vmatprep.subr.bf16.mxu1 %v3584_v23  ;;  %v3998_v55 = vsel %vm619_vm0, %v582_v41, %v656_v50  ;;  %v4000_v56 = vsel %vm620_vm1, %v583_v42, %v657_v51  ;;  %v3596_v10 = vpack.c.bf16 %v2937_v63, %v2936_v62  ;;  %vm621_vm3 = vcmp.ge.f32.partialorder %v584_v53, 0.0  ;;  %v2907_v18 = vld [vmem:[%s5740_s3 + $0x1f8] sm:$0xff]  ;;  %v505_v20 = vld [vmem:[%s3935_s23 + $0x48] sm:$0xff]  ;;  %v506_v25 = vld [vmem:[%s3935_s23 + $0x50] sm:$0xff] }
  0x1d   : > { %3535 = vmatpush1.bf16.msra.mxu0 %v3534_v27  ;;  %v924_v0 = vrot.slane %v3998_v55, 1  ;;  %v4014_v1 = vrot.slane %v4000_v56, 1  ;;  %1190 = vmatprep.mubr.f32.mxu0 %v3998_v55  ;;  %v659_v13 = vmul.f32 %v3971_v35, %v585_v57  ;;  %v587_v14 = vadd.f32 %v3960_v30, %v544_v58  ;;  %v2908_v32 = vld [vmem:[%s5740_s3 + $0x200] sm:$0xff]  ;;  %v2909_v33 = vld [vmem:[%s5740_s3 + $0x208] sm:$0xff]  ;;  %v507_v37 = vld [vmem:[%s3935_s23 + $0x58] sm:$0xff] }
  0x1e   : > { %3536 = vmatprep.subr.bf16.mxu0 %v5748_v3  ;;  %v3543_v15 = vpack.c.bf16 %v2905_v4, %v2904_v2  ;;  %vm622_vm4 = vcmp.ge.f32.partialorder %v585_v57, 0.0  ;;  %v588_v19 = vadd.f32 %v3960_v30, %v545_v8  ;;  %v3600_v21 = vpack.c.bf16 %v2939_v12, %v2938_v11  ;;  %v1030_v39 = vld [vmem:[%s5740_s3 + $0x8] sm:$0xff]  ;;  %v4079_v40 = vld [vmem:[%s5740_s3 + $0x210] sm:$0xff]  ;;  %v4099_v46 = vld [vmem:[%s5740_s3 + $0x18] sm:$0xff] }
  0x1f   : > { %3587 = vmatpush3.bf16.msra.mxu1 %v3584_v23  ;;  %5827 = vst [vmem:[#allocation4_spill] sm:$0xff] %v4014_v1  ;;  %v4027_v6 = vsel %vm920_vm2, %v924_v0, %v4014_v1  ;;  %v4051_v22 = vsel %vm621_vm3, %v584_v53, %v658_v5  ;;  %v660_v23 = vmul.f32 %v3971_v35, %v586_v7  ;;  %vm623_vm5 = vcmp.ge.f32.partialorder %v586_v7, 0.0  ;;  %v4094_v45 = vld [vmem:[%s5740_s3 + $0x10] sm:$0xff]  ;;  %v508_v58 = vld [vmem:[%s3935_s23 + $0x60] sm:$0xff]  ;;  %v509_v63 = vld [vmem:[%s3935_s23 + $0x68] sm:$0xff] }
  0x20   : > { %3589 = vmatprep.subr.bf16.mxu1 %v3588_v38  ;;  %3316 = vmatprep.mubr.f32.mxu1 %v4027_v6  ;;  %v589_v24 = vadd.f32 %v3960_v30, %v546_v9  ;;  %v4056_v26 = vsel %vm622_vm4, %v585_v57, %v659_v13  ;;  %v661_v27 = vmul.f32 %v3971_v35, %v587_v14  ;;  %vm624_vm6 = vcmp.ge.f32.partialorder %v587_v14, 0.0  ;;  %v510_v11 = vld [vmem:[%s3935_s23 + $0x70] sm:$0xff]  ;;  %v511_v12 = vld [vmem:[%s3935_s23 + $0x78] sm:$0xff]  ;;  %v2913_v13 = vld [vmem:[%s5740_s3 + $0x228] sm:$0xff] }
  0x21   : > { %3538 = vmatpush1.bf16.msra.mxu0 %v3537_v44  ;;  %v547_v28 = vmul.f32 %v3955_v29, %v504_v16  ;;  %v3546_v31 = vpack.c.bf16 %v2907_v18, %v2906_v17  ;;  %v662_v34 = vmul.f32 %v3971_v35, %v588_v19  ;;  %v548_v36 = vmul.f32 %v3955_v29, %v505_v20  ;;  %v4089_v44 = vld [vmem:[%s5740_s3 + $0x218] sm:$0xff] }
  0x22   : > { %3539 = vmatprep.subr.bf16.mxu0 %v5748_v3  ;;  %vm625_vm7 = vcmp.ge.f32.partialorder %v588_v19, 0.0  ;;  %v549_v41 = vmul.f32 %v3955_v29, %v506_v25  ;;  %v927_v42 = vrot.slane %v4051_v22, 1  ;;  %v4084_v43 = vrot.slane %v4056_v26, 1 }
  0x23   : > { %3591 = vmatpush3.bf16.msra.mxu1 %v3588_v38  ;;  %v1029_v38 = vld [vmem:[%s5740_s3] sm:$0xff]  ;;  %v4102_v47 = vsel %vm623_vm5, %v586_v7, %v660_v23  ;;  %v663_v48 = vmul.f32 %v3971_v35, %v589_v24  ;;  %v4106_v49 = vsel %vm624_vm6, %v587_v14, %v661_v27  ;;  %vm626_vm8 = vcmp.ge.f32.partialorder %v589_v24, 0.0 }
  0x24   : > { %3593 = vmatprep.subr.bf16.mxu1 %v3592_v52  ;;  %5828 = vst [vmem:[#allocation5_spill] sm:$0xff] %v4084_v43  ;;  %v590_v50 = vadd.f32 %v3960_v30, %v547_v28  ;;  %v550_v51 = vmul.f32 %v3955_v29, %v507_v37  ;;  %v4111_v53 = vsel %vm625_vm7, %v588_v19, %v662_v34  ;;  %v930_v2 = vrot.slane %v4102_v47, 1  ;;  %v2912_v7 = vld [vmem:[%s5740_s3 + $0x220] sm:$0xff]  ;;  %v2915_v34 = vld [vmem:[%s5740_s3 + $0x238] sm:$0xff] }
  0x25   : > { %3541 = vmatpush1.bf16.msra.mxu0 %v3540_v61  ;;  %v591_v54 = vadd.f32 %v3960_v30, %v548_v36  ;;  %v592_v57 = vadd.f32 %v3960_v30, %v549_v41  ;;  %v3605_v59 = vpack.c.bf16 %v1030_v39, %v1029_v38  ;;  %v3552_v60 = vpack.c.bf16 %v4089_v44, %v4079_v40  ;;  %v4149_v14 = vld [vmem:[%s5740_s3 + $0x20] sm:$0xff]  ;;  %v513_v41 = vld [vmem:[%s3935_s23 + $0x88] sm:$0xff]  ;;  %v1036_v44 = vld [vmem:[%s5740_s3 + $0x38] sm:$0xff] }
  0x26   : > { %3542 = vmatprep.subr.bf16.mxu0 %v5748_v3  ;;  %v3608_v61 = vpack.c.bf16 %v4099_v46, %v4094_v45  ;;  %v593_v62 = vadd.f32 %v3960_v30, %v550_v51  ;;  %v4125_v0 = vsel %vm920_vm2, %v927_v42, %v4084_v43  ;;  %v4129_v4 = vrot.slane %v4106_v49, 1  ;;  %v512_v27 = vld [vmem:[%s3935_s23 + $0x80] sm:$0xff]  ;;  %v1035_v42 = vld [vmem:[%s5740_s3 + $0x30] sm:$0xff] }
  0x27   : > { %3595 = vmatpush3.bf16.msra.mxu1 %v3592_v52  ;;  %v3549_v52 = vpack.c.bf16 %v2909_v33, %v2908_v32  ;;  %5829 = vst [vmem:[#allocation6_spill] sm:$0xff] %v4125_v0  ;;  %v4132_v5 = vsel %vm626_vm8, %v589_v24, %v663_v48  ;;  %v933_v8 = vrot.slane %v4111_v53, 1  ;;  %vm627_vm9 = vcmp.ge.f32.partialorder %v590_v50, 0.0  ;;  %v2914_v33 = vld [vmem:[%s5740_s3 + $0x230] sm:$0xff] }
  0x28   : > { %3597 = vmatprep.subr.bf16.mxu1 %v3596_v10  ;;  %5830 = vst [vmem:[#allocation7_spill] sm:$0xff] %v4129_v4  ;;  %v664_v9 = vmul.f32 %v3971_v35, %v590_v50  ;;  %v665_v16 = vmul.f32 %v3971_v35, %v591_v54  ;;  %v666_v17 = vmul.f32 %v3971_v35, %v592_v57  ;;  %vm628_vm10 = vcmp.ge.f32.partialorder %v591_v54, 0.0 }
  0x29   : > { %3544 = vmatpush1.bf16.msra.mxu0 %v3543_v15  ;;  %v4154_v15 = vld [vmem:[%s5740_s3 + $0x28] sm:$0xff]  ;;  %v667_v18 = vmul.f32 %v3971_v35, %v593_v62  ;;  %v552_v19 = vmul.f32 %v3955_v29, %v509_v63  ;;  %vm629_vm11 = vcmp.ge.f32.partialorder %v592_v57, 0.0  ;;  %vm630_vm12 = vcmp.ge.f32.partialorder %v593_v62, 0.0 }
  0x2a   : > { %3545 = vmatprep.subr.bf16.mxu0 %v5748_v3  ;;  %v553_v24 = vmul.f32 %v3955_v29, %v510_v11  ;;  %v554_v25 = vmul.f32 %v3955_v29, %v511_v12  ;;  %v4175_v28 = vsel %vm920_vm2, %v930_v2, %v4129_v4  ;;  %v3611_v32 = vpack.c.bf16 %v4154_v15, %v4149_v14  ;;  %v514_v2 = vld [vmem:[%s3935_s23 + $0x90] sm:$0xff] }
  0x2b   : > { %3599 = vmatpush3.bf16.msra.mxu1 %v3596_v10  ;;  %v551_v10 = vmul.f32 %v3955_v29, %v508_v58  ;;  %v595_v23 = vadd.f32 %v3960_v30, %v552_v19  ;;  %5832 = vst [vmem:[#allocation9_spill] sm:$0xff] %v4175_v28  ;;  %v4186_v36 = vsel %vm627_vm9, %v590_v50, %v664_v9  ;;  %v1037_v9 = vld [vmem:[%s5740_s3 + $0x40] sm:$0xff]  ;;  %vm811_vm8 = vcmask 1040384  }
  0x2c   : > { %3601 = vmatprep.subr.bf16.mxu1 %v3600_v21  ;;  %v4189_v37 = vsel %vm628_vm10, %v591_v54, %v665_v16  ;;  %v4192_v38 = vsel %vm629_vm11, %v592_v57, %v666_v17  ;;  %v4195_v39 = vsel %vm630_vm12, %v593_v62, %v667_v18  ;;  %v596_v45 = vadd.f32 %v3960_v30, %v553_v24  ;;  %v516_v19 = vld [vmem:[%s3935_s23 + $0xa0] sm:$0xff]  ;;  %vm4429_vm11 = vmneg %vm811_vm8 }
  0x2d   : > { %3547 = vmatpush1.bf16.msra.mxu0 %v3546_v31  ;;  %v594_v20 = vadd.f32 %v3960_v30, %v551_v10  ;;  %v3555_v31 = vpack.c.bf16 %v2913_v13, %v2912_v7  ;;  %5833 = vst [vmem:[#allocation10_spill] sm:$0xff] %v4192_v38  ;;  %5834 = vst [vmem:[#allocation11_spill] sm:$0xff] %v4195_v39  ;;  %v597_v46 = vadd.f32 %v3960_v30, %v554_v25  ;;  %v515_v7 = vld [vmem:[%s3935_s23 + $0x98] sm:$0xff]  ;;  %v1038_v10 = vld [vmem:[%s5740_s3 + $0x48] sm:$0xff] }
  0x2e   : > { %3548 = vmatprep.subr.bf16.mxu0 %v5748_v3  ;;  %v555_v48 = vmul.f32 %v3955_v29, %v512_v27  ;;  %v3558_v51 = vpack.c.bf16 %v2915_v34, %v2914_v33  ;;  %v936_v54 = vrot.slane %v4186_v36, 1  ;;  %v4220_v57 = vrot.slane %v4189_v37, 1  ;;  %v2918_v27 = vld [vmem:[%s5740_s3 + $0x250] sm:$0xff]  ;;  %v1040_v34 = vld [vmem:[%s5740_s3 + $0x58] sm:$0xff] }
  0x2f   : > { %3603 = vmatpush3.bf16.msra.mxu1 %v3600_v21  ;;  %v4166_v21 = vrot.slane %v4132_v5, 1  ;;  %v668_v40 = vmul.f32 %v3971_v35, %v594_v20  ;;  %vm631_vm13 = vcmp.ge.f32.partialorder %v594_v20, 0.0  ;;  %vm632_vm14 = vcmp.ge.f32.partialorder %v595_v23, 0.0  ;;  %v1039_v33 = vld [vmem:[%s5740_s3 + $0x50] sm:$0xff] }
  0x30   : > { %3604 = vmatprep.subr.bf16.mxu1 %v5748_v3  ;;  %5836 = vst [vmem:[#allocation13_spill] sm:$0xff] %v4220_v57  ;;  %v556_v58 = vmul.f32 %v3955_v29, %v513_v41  ;;  %v4228_v62 = vrot.slane %v4195_v39, 1  ;;  %v670_v11 = vmul.f32 %v3971_v35, %v596_v45  ;;  %v671_v12 = vmul.f32 %v3971_v35, %v597_v46 }
  0x31   : > { %3550 = vmatpush1.bf16.msra.mxu0 %v3549_v52  ;;  %5831 = vst [vmem:[#allocation8_spill] sm:$0xff] %v4166_v21  ;;  %v4214_v50 = vsel %vm920_vm2, %v933_v8, %v4166_v21  ;;  %v669_v52 = vmul.f32 %v3971_v35, %v595_v23  ;;  %v4231_v63 = vsel %vm631_vm13, %v594_v20, %v668_v40  ;;  %v2917_v8 = vld [vmem:[%s5740_s3 + $0x248] sm:$0xff]  ;;  %vm633_vm15 = vcmp.ge.f32.partialorder %v596_v45, 0.0 }
  0x32   : > { %3317 = vmatmul.mubr.msk.f32.vlgmr.msra.gmra.mrb[0].mxu1 %vm920_vm2, %v4014_v1  ;;  %3551 = vmatprep.subr.bf16.mxu0 %v5748_v3  ;;  %5835 = vst [vmem:[#allocation12_spill] sm:$0xff] %v4214_v50  ;;  %5837 = vst [vmem:[#allocation14_spill] sm:$0xff] %v4228_v62  ;;  %v598_v13 = vadd.f32 %v3960_v30, %v555_v48  ;;  %vm634_vm0 = vcmp.ge.f32.partialorder %v597_v46, 0.0  ;;  %v599_v15 = vadd.f32 %v3960_v30, %v556_v58  ;;  %v517_v20 = vld [vmem:[%s3935_s23 + $0xa8] sm:$0xff]  ;;  %v4298_v48 = vld [vmem:[%s5740_s3 + $0x260] sm:$0xff] }
  0x33   : > { %3606 = vmatpush1.bf16.msra.mxu1 %v3605_v59  ;;  %3319 = vmatprep.mubr.f32.mxu1 %v4125_v0  ;;  %v3614_v59 = vpack.c.bf16 %v1036_v44, %v1035_v42  ;;  %v4252_v14 = vsel %vm632_vm14, %v595_v23, %v669_v52  ;;  %v4258_v16 = vsel %vm920_vm2, %v936_v54, %v4220_v57  ;;  %v518_v54 = vld [vmem:[%s3935_s23 + $0xb0] sm:$0xff] }
  0x34   : > { %3607 = vmatprep.subr.bf16.mxu1 %v5748_v3  ;;  %5838 = vst [vmem:[#allocation15_spill] sm:$0xff] %v4258_v16  ;;  %v557_v17 = vmul.f32 %v3955_v29, %v514_v2  ;;  %v558_v18 = vmul.f32 %v3955_v29, %v515_v7  ;;  %v3617_v23 = vpack.c.bf16 %v1038_v10, %v1037_v9  ;;  %v4285_v40 = vrot.slane %v4252_v14, 1  ;;  %v1071_v1 = vld [vmem:[%s5740_s3 + $0x150] sm:$0xff] }
  0x35   : > { %3553 = vmatpush1.bf16.msra.mxu0 %v3552_v60  ;;  %v2916_v60 = vld [vmem:[%s5740_s3 + $0x240] sm:$0xff]  ;;  %v4288_v41 = vsel %vm633_vm15, %v596_v45, %v670_v11  ;;  %v4291_v42 = vsel %vm634_vm0, %v597_v46, %v671_v12  ;;  %v672_v44 = vmul.f32 %v3971_v35, %v598_v13  ;;  %v673_v45 = vmul.f32 %v3971_v35, %v599_v15 }
  0x36   : > { %3320 = vmatmul.mubr.msk.f32.gmra.mrb[2].mxu1 %vm920_vm2, %v4084_v43  ;;  %3554 = vmatprep.subr.bf16.mxu0 %v5748_v3  ;;  %v3561_v24 = vpack.c.bf16 %v2917_v8, %v2916_v60  ;;  %5840 = vst [vmem:[#allocation17_spill] sm:$0xff] %v4285_v40  ;;  %v559_v46 = vmul.f32 %v3955_v29, %v516_v19  ;;  %vm635_vm1 = vcmp.ge.f32.partialorder %v598_v13, 0.0  ;;  %vm636_vm3 = vcmp.ge.f32.partialorder %v599_v15, 0.0  ;;  %v519_v8 = vld [vmem:[%s3935_s23 + $0xb8] sm:$0xff]  ;;  %v1041_v11 = vld [vmem:[%s5740_s3 + $0x60] sm:$0xff] }
  0x37   : > { %3609 = vmatpush1.bf16.msra.mxu1 %v3608_v61  ;;  %3322 = vmatprep.mubr.f32.mxu1 %v4175_v28  ;;  %v939_v61 = vrot.slane %v4192_v38, 1  ;;  %v560_v52 = vmul.f32 %v3955_v29, %v517_v20  ;;  %v600_v58 = vadd.f32 %v3960_v30, %v557_v17  ;;  %v561_v12 = vmul.f32 %v3955_v29, %v518_v54  ;;  %v1042_v17 = vld [vmem:[%s5740_s3 + $0x68] sm:$0xff]  ;;  %v2922_v20 = vld [vmem:[%s5740_s3 + $0x270] sm:$0xff] }
  0x38   : > { %3610 = vmatprep.subr.bf16.mxu1 %v5748_v3  ;;  %v602_v2 = vadd.f32 %v3960_v30, %v559_v46  ;;  %v4334_v19 = vrot.slane %v4291_v42, 1  ;;  %v3623_v54 = vpack.c.bf16 %v1042_v17, %v1041_v11  ;;  %v4568_v43 = vrot.slane %v4102_v47, 7 }
  0x39   : > { %3556 = vmatpush1.bf16.msra.mxu0 %v3555_v31  ;;  %v4266_v25 = vsel %vm920_vm2, %v939_v61, %v4228_v62  ;;  %v942_v31 = vrot.slane %v4231_v63, 1  ;;  %v3620_v61 = vpack.c.bf16 %v1040_v34, %v1039_v33  ;;  %v603_v7 = vadd.f32 %v3960_v30, %v560_v52 }
  0x3a   : > { %3323 = vmatmul.mubr.msk.f32.gmra.mrb[4].mxu1 %vm920_vm2, %v4129_v4  ;;  %3557 = vmatprep.subr.bf16.mxu0 %v5748_v3  ;;  %5839 = vst [vmem:[#allocation16_spill] sm:$0xff] %v4266_v25  ;;  %5842 = vst [vmem:[#allocation19_spill] sm:$0xff] %v4334_v19  ;;  %vm637_vm4 = vcmp.ge.f32.partialorder %v600_v58, 0.0  ;;  %v562_v33 = vmul.f32 %v3955_v29, %v519_v8  ;;  %vm639_vm6 = vcmp.ge.f32.partialorder %v602_v2, 0.0 }
  0x3b   : > { %3612 = vmatpush1.bf16.msra.mxu1 %v3611_v32  ;;  %3325 = vmatprep.mubr.f32.mxu1 %v4214_v50  ;;  %v2919_v32 = vld [vmem:[%s5740_s3 + $0x258] sm:$0xff]  ;;  %v4320_v9 = vsel %vm920_vm2, %v942_v31, %v4285_v40  ;;  %vm640_vm7 = vcmp.ge.f32.partialorder %v603_v7, 0.0 }
  0x3c   : > { %3613 = vmatprep.subr.bf16.mxu1 %v5748_v3  ;;  %v3564_v60 = vpack.c.bf16 %v2919_v32, %v2918_v27  ;;  %5841 = vst [vmem:[#allocation18_spill] sm:$0xff] %v4320_v9  ;;  %v520_v27 = vld [vmem:[%s3935_s23 + $0xc0] sm:$0xff]  ;;  %v2923_v31 = vld [vmem:[%s5740_s3 + $0x278] sm:$0xff]  ;;  %v4353_v32 = vld [vmem:[%s5740_s3 + $0x70] sm:$0xff]  ;;  %v605_v46 = vadd.f32 %v3960_v30, %v562_v33 }
  0x3d   : > { %3559 = vmatpush1.bf16.msra.mxu0 %v3558_v51  ;;  %v4303_v51 = vld [vmem:[%s5740_s3 + $0x268] sm:$0xff]  ;;  %v563_v52 = vmul.f32 %v3955_v29, %v520_v27  ;;  %v522_v33 = vld [vmem:[%s3935_s23 + $0xd0] sm:$0xff] }
  0x3e   : > { %3326 = vmatmul.mubr.msk.f32.gmra.mrb[6].mxu1 %vm920_vm2, %v4166_v21  ;;  %3560 = vmatprep.subr.bf16.mxu0 %v5748_v3  ;;  %v3567_v10 = vpack.c.bf16 %v4303_v51, %v4298_v48  ;;  %v677_v48 = vmul.f32 %v3971_v35, %v603_v7  ;;  %v521_v51 = vld [vmem:[%s3935_s23 + $0xc8] sm:$0xff]  ;;  %vm642_vm10 = vcmp.ge.f32.partialorder %v605_v46, 0.0 }
  0x3f   : > { %3615 = vmatpush1.bf16.msra.mxu1 %v3614_v59  ;;  %3328 = vmatprep.mubr.f32.mxu1 %v4258_v16  ;;  %v601_v59 = vadd.f32 %v3960_v30, %v558_v18  ;;  %v945_v18 = vrot.slane %v4288_v41, 1 }
  0x40   : > { %3616 = vmatprep.subr.bf16.mxu1 %v5748_v3 }
  0x41   : > { %3562 = vmatpush1.bf16.msra.mxu0 %v3561_v24  ;;  %v4340_v24 = vsel %vm635_vm1, %v598_v13, %v672_v44  ;;  %v4358_v13 = vld [vmem:[%s5740_s3 + $0x78] sm:$0xff]  ;;  %vm638_vm5 = vcmp.ge.f32.partialorder %v601_v59, 0.0  ;;  %v675_v34 = vmul.f32 %v3971_v35, %v601_v59  ;;  %v676_v44 = vmul.f32 %v3971_v35, %v602_v2 }
  0x42   : > { %3329 = vmatmul.mubr.msk.f32.gmra.mrb[8].mxu1 %vm920_vm2, %v4220_v57  ;;  %3563 = vmatprep.subr.bf16.mxu0 %v5748_v3  ;;  %v3626_v8 = vpack.c.bf16 %v4358_v13, %v4353_v32  ;;  %v606_v32 = vadd.f32 %v3960_v30, %v563_v52  ;;  %v524_v52 = vld [vmem:[%s3935_s23 + $0xe0] sm:$0xff] }
  0x43   : > { %3618 = vmatpush1.bf16.msra.mxu1 %v3617_v23  ;;  %3331 = vmatprep.mubr.f32.mxu1 %v4266_v25  ;;  %v4343_v23 = vsel %vm636_vm3, %v599_v15, %v673_v45  ;;  %v674_v15 = vmul.f32 %v3971_v35, %v600_v58  ;;  %v604_v45 = vadd.f32 %v3960_v30, %v561_v12  ;;  %v948_v12 = vrot.slane %v4340_v24, 1 }
  0x44   : > { %3619 = vmatprep.subr.bf16.mxu1 %v5748_v3  ;;  %v4382_v27 = vrot.slane %v4343_v23, 1  ;;  %v4390_v17 = vsel %vm638_vm5, %v601_v59, %v675_v34  ;;  %v1046_v59 = vld [vmem:[%s5740_s3 + $0x88] sm:$0xff]  ;;  %vm643_vm12 = vcmp.ge.f32.partialorder %v606_v32, 0.0  ;;  %v567_v25 = vmul.f32 %v3955_v29, %v524_v52 }
  0x45   : > { %3565 = vmatpush1.bf16.msra.mxu0 %v3564_v60  ;;  %v3570_v60 = vpack.c.bf16 %v2923_v31, %v2922_v20  ;;  %v4387_v11 = vsel %vm637_vm4, %v600_v58, %v674_v15  ;;  %v4393_v20 = vsel %vm639_vm6, %v602_v2, %v676_v44  ;;  %v523_v31 = vld [vmem:[%s3935_s23 + $0xd8] sm:$0xff]  ;;  %v1045_v58 = vld [vmem:[%s5740_s3 + $0x80] sm:$0xff]  ;;  %v678_v2 = vmul.f32 %v3971_v35, %v604_v45 }
  0x46   : > { %3332 = vmatmul.mubr.msk.f32.gmra.mrb[10].mxu1 %vm920_vm2, %v4228_v62  ;;  %3566 = vmatprep.subr.bf16.mxu0 %v5748_v3  ;;  %v4378_v62 = vsel %vm920_vm2, %v945_v18, %v4334_v19  ;;  %5844 = vst [vmem:[#allocation21_spill] sm:$0xff] %v4382_v27  ;;  %5845 = vst [vmem:[#allocation22_spill] sm:$0xff] %v4387_v11  ;;  %v4396_v18 = vsel %vm640_vm7, %v603_v7, %v677_v48  ;;  %vm641_vm9 = vcmp.ge.f32.partialorder %v604_v45, 0.0 }
  0x47   : > { %3621 = vmatpush1.bf16.msra.mxu1 %v3620_v61  ;;  %3334 = vmatprep.mubr.f32.mxu1 %v4320_v9  ;;  %5843 = vst [vmem:[#allocation20_spill] sm:$0xff] %v4378_v62  ;;  %v564_v61 = vmul.f32 %v3955_v29, %v521_v51  ;;  %5846 = vst [vmem:[#allocation23_spill] sm:$0xff] %v4393_v20  ;;  %v679_v7 = vmul.f32 %v3971_v35, %v605_v46  ;;  %v951_v44 = vrot.slane %v4387_v11, 1 }
  0x48   : > { %3622 = vmatprep.subr.bf16.mxu1 %v5748_v3  ;;  %5847 = vst [vmem:[#allocation24_spill] sm:$0xff] %v4396_v18  ;;  %v565_v15 = vmul.f32 %v3955_v29, %v522_v33  ;;  %v4420_v34 = vsel %vm920_vm2, %v948_v12, %v4382_v27  ;;  %v4424_v48 = vrot.slane %v4390_v17, 1  ;;  %v566_v51 = vmul.f32 %v3955_v29, %v523_v31  ;;  %v1047_v31 = vld [vmem:[%s5740_s3 + $0x90] sm:$0xff] }
  0x49   : > { %3568 = vmatpush1.bf16.msra.mxu0 %v3567_v10  ;;  %v4403_v10 = vrot.slane %v3998_v55, 7  ;;  %v607_v13 = vadd.f32 %v3960_v30, %v564_v61  ;;  %5848 = vst [vmem:[#allocation25_spill] sm:$0xff] %v4420_v34  ;;  %v3629_v61 = vpack.c.bf16 %v1046_v59, %v1045_v58  ;;  %v816_v33 = vrot.slane %v4000_v56, 7 }
  0x4a   : > { %3335 = vmatmul.mubr.msk.f32.gmra.mrb[12].mxu1 %vm920_vm2, %v4285_v40  ;;  %3569 = vmatprep.subr.bf16.mxu0 %v5748_v3  ;;  %5849 = vst [vmem:[#allocation26_spill] sm:$0xff] %v4424_v48  ;;  %v954_v12 = vrot.slane %v4393_v20, 1  ;;  %v4448_v58 = vsel %vm641_vm9, %v604_v45, %v678_v2  ;;  %v4451_v59 = vsel %vm642_vm10, %v605_v46, %v679_v7  ;;  %v5853_v45 = vmov 0.0|0.0  }
  0x4b   : > { %3624 = vmatpush1.bf16.msra.mxu1 %v3623_v54  ;;  %3337 = vmatprep.mubr.f32.mxu1 %v4378_v62  ;;  %v4445_v62 = vrot.slane %v4396_v18, 1  ;;  %v680_v40 = vmul.f32 %v3971_v35, %v606_v32  ;;  %v608_v9 = vadd.f32 %v3960_v30, %v565_v15  ;;  %v4464_v46 = vsel %vm920_vm2, %v951_v44, %v4424_v48 }
  0x4c   : > { %3625 = vmatprep.subr.bf16.mxu1 %v5748_v3  ;;  %v525_v3 = vld [vmem:[%s3935_s23 + $0xe8] sm:$0xff]  ;;  %5854 = vst [vmem:[#allocation28_spill] sm:$0xff] %v4464_v46  ;;  %vm644_vm13 = vcmp.ge.f32.partialorder %v607_v13, 0.0  ;;  %v4471_v7 = vsel %vm811_vm8, %v4403_v10, %v816_v33  ;;  %v819_v52 = vrot.slane %v4056_v26, 7 }
  0x4d   : > { %3571 = vmatpush1.bf16.msra.mxu0 %v3570_v60  ;;  %v1048_v60 = vld [vmem:[%s5740_s3 + $0x98] sm:$0xff]  ;;  %5852 = vst [vmem:[#allocation27_spill] sm:$0xff] %v4445_v62  ;;  %v568_v2 = vmul.f32 %v3955_v29, %v525_v3  ;;  %v4479_v44 = vsel %vm920_vm2, %v954_v12, %v4445_v62  ;;  %v957_v3 = vrot.slane %v4448_v58, 1  ;;  %v4486_v33 = vsel %vm643_vm12, %v606_v32, %v680_v40  ;;  %v1049_v40 = vld [vmem:[%s5740_s3 + $0xa0] sm:$0xff]  ;;  %v1050_v32 = vld [vmem:[%s5740_s3 + $0xa8] sm:$0xff] }
  0x4e   : > { %3338 = vmatmul.mubr.msk.f32.gmra.mrb[14].mxu1 %vm920_vm2, %v4334_v19  ;;  %v681_v19 = vmul.f32 %v3971_v35, %v607_v13  ;;  %v3632_v15 = vpack.c.bf16 %v1048_v60, %v1047_v31  ;;  %5855 = vst [vmem:[#allocation29_spill] sm:$0xff] %v4479_v44  ;;  %5857 = vst [vmem:[#allocation31_spill] sm:$0xff] %v4486_v33  ;;  %v527_v31 = vld [vmem:[%s3935_s23 + $0xf8] sm:$0xff]  ;;  %v1061_v60 = vld [vmem:[%s5740_s3 + $0x100] sm:$0xff]  ;;  %v4497_v12 = vrot.slane %v4051_v22, 7  ;;  %vm645_vm14 = vcmp.ge.f32.partialorder %v608_v9, 0.0 }
  0x4f   : > { %3627 = vmatpush1.bf16.msra.mxu1 %v3626_v8  ;;  %3340 = vmatprep.mubr.f32.mxu1 %v4420_v34  ;;  %v609_v8 = vadd.f32 %v3960_v30, %v566_v51  ;;  %v526_v34 = vld [vmem:[%s3935_s23 + $0xf0] sm:$0xff]  ;;  %v4483_v51 = vrot.slane %v4451_v59, 1  ;;  %v682_v16 = vmul.f32 %v3971_v35, %v608_v9  ;;  %v611_v21 = vadd.f32 %v3960_v30, %v568_v2  ;;  %v494_v2 = vld [vmem:[%s454_s27] sm:$0xff] }
  0x50   : > { %2941 = vmatmul.mubr.msk.f32.vlgmr.msra.gmra.mrb[0].mxu0 %vm4429_vm11, %v4403_v10  ;;  %3628 = vmatprep.subr.bf16.mxu1 %v5853_v45  ;;  %v4506_v57 = vsel %vm644_vm13, %v607_v13, %v681_v19  ;;  %v569_v19 = vmul.f32 %v3955_v29, %v526_v34  ;;  %v3635_v50 = vpack.c.bf16 %v1050_v32, %v1049_v40  ;;  %v495_v34 = vld [vmem:[%s454_s27 + $0x8] sm:$0xff] }
  0x51   : > { %1195 = vmatprep.mubr.f32.mxu0 %v4000_v56  ;;  %5856 = vst [vmem:[#allocation30_spill] sm:$0xff] %v4483_v51  ;;  %5858 = vst [vmem:[#allocation32_spill] sm:$0xff] %v4506_v57  ;;  %vm646_vm15 = vcmp.ge.f32.partialorder %v609_v8, 0.0  ;;  %v4525_v4 = vsel %vm811_vm8, %v4497_v12, %v819_v52  ;;  %v4529_v28 = vsel %vm920_vm2, %v957_v3, %v4483_v51  ;;  %v960_v52 = vrot.slane %v4486_v33, 1 }
  0x52   : > { %3341 = vmatmul.mubr.msk.f32.gmra.mrb[16].mxu1 %vm920_vm2, %v4382_v27  ;;  %v1062_v27 = vld [vmem:[%s5740_s3 + $0x108] sm:$0xff]  ;;  %5859 = vst [vmem:[#allocation33_spill] sm:$0xff] %v4529_v28  ;;  %v4543_v3 = vsel %vm645_vm14, %v608_v9, %v682_v16  ;;  %v685_v32 = vmul.f32 %v3971_v35, %v611_v21  ;;  %vm648_vm1 = vcmp.ge.f32.partialorder %v611_v21, 0.0  ;;  %v537_v9 = vmul.f32 %v3955_v29, %v494_v2 }
  0x53   : > { %3630 = vmatpush1.bf16.msra.mxu1 %v3629_v61  ;;  %3343 = vmatprep.mubr.f32.mxu1 %v4464_v46  ;;  %v610_v61 = vadd.f32 %v3960_v30, %v567_v25  ;;  %v683_v46 = vmul.f32 %v3971_v35, %v609_v8  ;;  %v570_v25 = vmul.f32 %v3955_v29, %v527_v31  ;;  %v1052_v31 = vld [vmem:[%s5740_s3 + $0xb8] sm:$0xff]  ;;  %v822_v2 = vrot.slane %v4106_v49, 7 }
  0x54   : > { %1196 = vmatmul.mubr.f32.gmra.mrb[2].mxu0 %v4471_v7  ;;  %3631 = vmatprep.subr.bf16.mxu1 %v5853_v45  ;;  %v3652_v13 = vpack.c.bf16 %v1062_v27, %v1061_v60  ;;  %v1051_v27 = vld [vmem:[%s5740_s3 + $0xb0] sm:$0xff]  ;;  %v4540_v60 = vrot.slane %v4506_v57, 1  ;;  %5861 = vst [vmem:[#allocation35_spill] sm:$0xff] %v4543_v3  ;;  %v580_v0 = vadd.f32 %v3960_v30, %v537_v9 }
  0x55   : > { %1200 = vmatprep.mubr.f32.mxu0 %v4051_v22  ;;  %v4551_v40 = vsel %vm646_vm15, %v609_v8, %v683_v46  ;;  %vm647_vm0 = vcmp.ge.f32.partialorder %v610_v61, 0.0  ;;  %v613_v16 = vadd.f32 %v3960_v30, %v570_v25  ;;  %v1063_v46 = vld [vmem:[%s5740_s3 + $0x110] sm:$0xff]  ;;  %v1064_v8 = vld [vmem:[%s5740_s3 + $0x118] sm:$0xff]  ;;  %v1053_v25 = vld [vmem:[%s5740_s3 + $0xc0] sm:$0xff] }
  0x56   : > { %3344 = vmatmul.mubr.msk.f32.gmra.mrb[18].mxu1 %vm920_vm2, %v4424_v48  ;;  %5860 = vst [vmem:[#allocation34_spill] sm:$0xff] %v4540_v60  ;;  %5862 = vst [vmem:[#allocation36_spill] sm:$0xff] %v4551_v40  ;;  %3653 = vmatprep.subr.bf16.mxu0 %v3652_v13  ;;  %v538_v48 = vmul.f32 %v3955_v29, %v495_v34  ;;  %v4573_v29 = vsel %vm920_vm2, %v960_v52, %v4540_v60  ;;  %v963_v34 = vrot.slane %v4543_v3, 1  ;;  %v1067_v9 = vld [vmem:[%s5740_s3 + $0x130] sm:$0xff] }
  0x57   : > { %3633 = vmatpush1.bf16.msra.mxu1 %v3632_v15  ;;  %3346 = vmatprep.mubr.f32.mxu1 %v4479_v44  ;;  %v684_v15 = vmul.f32 %v3971_v35, %v610_v61  ;;  %v612_v44 = vadd.f32 %v3960_v30, %v569_v19  ;;  %v3638_v19 = vpack.c.bf16 %v1052_v31, %v1051_v27  ;;  %vm650_vm4 = vcmp.ge.f32.partialorder %v613_v16, 0.0 }
  0x58   : > { %2943 = vmatmul.mubr.msk.f32.gmra.mrb[4].mxu0 %vm4429_vm11, %v4497_v12  ;;  %3634 = vmatprep.subr.bf16.mxu1 %v5853_v45  ;;  %5863 = vst [vmem:[#allocation37_spill] sm:$0xff] %v4573_v29  ;;  %v4592_v31 = vsel %vm648_vm1, %v611_v21, %v685_v32  ;;  %v581_v21 = vadd.f32 %v3960_v30, %v538_v48  ;;  %v1068_v30 = vld [vmem:[%s5740_s3 + $0x138] sm:$0xff]  ;;  %vm617_vm5 = vcmp.ge.f32.partialorder %v580_v0, 0.0 }
  0x59   : > { %1205 = vmatprep.mubr.f32.mxu0 %v4056_v26  ;;  %3655 = vmatpush3.bf16.msra.mxu0 %v3652_v13  ;;  %v4581_v27 = vsel %vm647_vm0, %v610_v61, %v684_v15  ;;  %v4589_v13 = vrot.slane %v4551_v40, 1  ;;  %5865 = vst [vmem:[#allocation39_spill] sm:$0xff] %v4592_v31  ;;  %v686_v52 = vmul.f32 %v3971_v35, %v612_v44  ;;  %v1065_v61 = vld [vmem:[%s5740_s3 + $0x120] sm:$0xff]  ;;  %v1066_v15 = vld [vmem:[%s5740_s3 + $0x128] sm:$0xff]  ;;  %vm649_vm3 = vcmp.ge.f32.partialorder %v612_v44, 0.0 }
  0x5a   : > { %3347 = vmatmul.mubr.msk.f32.gmra.mrb[20].mxu1 %vm920_vm2, %v4445_v62  ;;  %5864 = vst [vmem:[#allocation38_spill] sm:$0xff] %v4581_v27  ;;  %v687_v62 = vmul.f32 %v3971_v35, %v613_v16  ;;  %vm618_vm6 = vcmp.ge.f32.partialorder %v581_v21, 0.0 }
  0x5b   : > { %3636 = vmatpush1.bf16.msra.mxu1 %v3635_v50  ;;  %3349 = vmatprep.mubr.f32.mxu1 %v4529_v28  ;;  %v1054_v50 = vld [vmem:[%s5740_s3 + $0xc8] sm:$0xff]  ;;  %v3656_v28 = vpack.c.bf16 %v1064_v8, %v1063_v46  ;;  %v4610_v46 = vsel %vm811_vm8, %v4568_v43, %v822_v2  ;;  %v3660_v8 = vpack.c.bf16 %v1066_v15, %v1065_v61  ;;  %v966_v2 = vrot.slane %v4581_v27, 1 }
  0x5c   : > { %1206 = vmatmul.mubr.f32.gmra.mrb[6].mxu0 %v4525_v4  ;;  %3637 = vmatprep.subr.bf16.mxu1 %v5853_v45  ;;  %v3641_v32 = vpack.c.bf16 %v1054_v50, %v1053_v25  ;;  %v4624_v48 = vsel %vm920_vm2, %v963_v34, %v4589_v13  ;;  %v1056_v25 = vld [vmem:[%s5740_s3 + $0xd8] sm:$0xff]  ;;  %v4634_v50 = vrot.slane %v4592_v31, 1  ;;  %v4637_v61 = vsel %vm649_vm3, %v612_v44, %v686_v52 }
  0x5d   : > { %1210 = vmatprep.mubr.f32.mxu0 %v4102_v47  ;;  %3657 = vmatprep.subr.bf16.mxu0 %v3656_v28  ;;  %5866 = vst [vmem:[#allocation40_spill] sm:$0xff] %v4624_v48  ;;  %5868 = vst [vmem:[#allocation42_spill] sm:$0xff] %v4637_v61  ;;  %v4641_v34 = vsel %vm650_vm4, %v613_v16, %v687_v62  ;;  %v654_v15 = vmul.f32 %v3971_v35, %v580_v0  ;;  %v1069_v62 = vld [vmem:[%s5740_s3 + $0x140] sm:$0xff]  ;;  %v1070_v16 = vld [vmem:[%s5740_s3 + $0x148] sm:$0xff] }
  0x5e   : > { %3350 = vmatmul.mubr.msk.f32.gmra.mrb[22].mxu1 %vm920_vm2, %v4483_v51  ;;  %5867 = vst [vmem:[#allocation41_spill] sm:$0xff] %v4634_v50  ;;  %5869 = vst [vmem:[#allocation43_spill] sm:$0xff] %v4641_v34  ;;  %3659 = vmatpush3.bf16.msra.mxu0 %v3656_v28  ;;  %v3664_v51 = vpack.c.bf16 %v1068_v30, %v1067_v9  ;;  %v4657_v28 = vrot.slane %v4111_v53, 7  ;;  %v4661_v52 = vsel %vm920_vm2, %v966_v2, %v4634_v50  ;;  %v1058_v9 = vld [vmem:[%s5740_s3 + $0xe8] sm:$0xff] }
  0x5f   : > { %3639 = vmatpush1.bf16.msra.mxu1 %v3638_v19  ;;  %3352 = vmatprep.mubr.f32.mxu1 %v4573_v29  ;;  %v1055_v19 = vld [vmem:[%s5740_s3 + $0xd0] sm:$0xff]  ;;  %v655_v29 = vmul.f32 %v3971_v35, %v581_v21  ;;  %v969_v30 = vrot.slane %v4637_v61, 1  ;;  %v690_v2 = vsel %vm617_vm5, %v580_v0, %v654_v15  ;;  %v1072_v0 = vld [vmem:[%s5740_s3 + $0x158] sm:$0xff] }
  0x60   : > { %2945 = vmatmul.mubr.msk.f32.gmra.mrb[8].mxu0 %vm4429_vm11, %v4568_v43  ;;  %3640 = vmatprep.subr.bf16.mxu1 %v5853_v45  ;;  %v3644_v44 = vpack.c.bf16 %v1056_v25, %v1055_v19  ;;  %v4671_v19 = vrot.slane %v4641_v34, 1  ;;  %v825_v25 = vrot.slane %v4132_v5, 7  ;;  %v739_v15 = vmul.f32 0.0, %v690_v2 }
  0x61   : > { %1215 = vmatprep.mubr.f32.mxu0 %v4106_v49  ;;  %3661 = vmatprep.subr.bf16.mxu0 %v3660_v8  ;;  %v691_v35 = vsel %vm618_vm6, %v581_v21, %v655_v29  ;;  %v1059_v21 = vld [vmem:[%s5740_s3 + $0xf0] sm:$0xff] }
  0x62   : > { %3353 = vmatmul.mubr.msk.f32.gmra.mrb[24].mxu1 %vm920_vm2, %v4540_v60  ;;  %5870 = vst [vmem:[#allocation44_spill] sm:$0xff] %v4671_v19  ;;  %3663 = vmatpush3.bf16.msra.mxu0 %v3660_v8  ;;  %v4692_v29 = vsel %vm920_vm2, %v969_v30, %v4671_v19  ;;  %v1060_v8 = vld [vmem:[%s5740_s3 + $0xf8] sm:$0xff]  ;;  %v1073_v30 = vld [vmem:[%s5740_s3 + $0x160] sm:$0xff] }
  0x63   : > { %3642 = vmatpush1.bf16.msra.mxu1 %v3641_v32  ;;  %3355 = vmatprep.mubr.f32.mxu1 %v4624_v48  ;;  %v1057_v32 = vld [vmem:[%s5740_s3 + $0xe0] sm:$0xff]  ;;  %v3668_v48 = vpack.c.bf16 %v1070_v16, %v1069_v62  ;;  %5871 = vst [vmem:[#allocation45_spill] sm:$0xff] %v4692_v29  ;;  %v4705_v62 = vsel %vm811_vm8, %v4657_v28, %v825_v25  ;;  %v3037_v25 = vld [vmem:[%s5740_s3 + $0x308] sm:$0xff] }
  0x64   : > { %1216 = vmatmul.mubr.f32.gmra.mrb[10].mxu0 %v4610_v46  ;;  %3643 = vmatprep.subr.bf16.mxu1 %v5853_v45  ;;  %v3647_v60 = vpack.c.bf16 %v1058_v9, %v1057_v32  ;;  %v3672_v16 = vpack.c.bf16 %v1072_v0, %v1071_v1  ;;  %v921_v32 = vrot.slane %v739_v15, 1  ;;  %v4720_v1 = vrot.slane %v4186_v36, 7 }
  0x65   : > { %1220 = vmatprep.mubr.f32.mxu0 %v4111_v53  ;;  %3665 = vmatprep.subr.bf16.mxu0 %v3664_v51  ;;  %v828_v0 = vrot.slane %v4189_v37, 7 }
  0x66   : > { %3356 = vmatmul.mubr.msk.f32.gmra.mrb[26].mxu1 %vm920_vm2, %v4589_v13  ;;  %3667 = vmatpush3.bf16.msra.mxu0 %v3664_v51  ;;  %v1074_v51 = vld [vmem:[%s5740_s3 + $0x168] sm:$0xff] }
  0x67   : > { %3645 = vmatpush1.bf16.msra.mxu1 %v3644_v44  ;;  %3358 = vmatprep.mubr.f32.mxu1 %v4661_v52  ;;  %v4700_v44 = vmul.f32 0.0, %v691_v35  ;;  %v3650_v35 = vpack.c.bf16 %v1060_v8, %v1059_v21  ;;  %v812_v21 = vrot.slane %v739_v15, 7  ;;  %v3676_v8 = vpack.c.bf16 %v1074_v51, %v1073_v30 }
  0x68   : > { %2947 = vmatmul.mubr.msk.f32.gmra.mrb[12].mxu0 %vm4429_vm11, %v4657_v28  ;;  %3646 = vmatprep.subr.bf16.mxu1 %v5853_v45 }
  0x69   : > { %1225 = vmatprep.mubr.f32.mxu0 %v4132_v5  ;;  %3669 = vmatprep.subr.bf16.mxu0 %v3668_v48  ;;  %v5804_v9 = vrot.slane %v4700_v44, 1 }
  0x6a   : > { %3359 = vmatmul.mubr.msk.f32.gmra.mrb[28].mxu1 %vm920_vm2, %v4634_v50  ;;  %3671 = vmatpush3.bf16.msra.mxu0 %v3668_v48  ;;  %v813_v50 = vrot.slane %v4700_v44, 7  ;;  %v3038_v48 = vld [vmem:[%s5740_s3 + $0x310] sm:$0xff] }
  0x6b   : > { %3648 = vmatpush1.bf16.msra.mxu1 %v3647_v60  ;;  %3361 = vmatprep.mubr.f32.mxu1 %v4692_v29  ;;  %v3036_v60 = vld [vmem:[%s5740_s3 + $0x300] sm:$0xff]  ;;  %v4731_v2 = vsel %vm920_vm2, %v921_v32, %v5804_v9  ;;  %v1075_v32 = vld [vmem:[%s5740_s3 + $0x170] sm:$0xff]  ;;  %v1076_v9 = vld [vmem:[%s5740_s3 + $0x178] sm:$0xff] }
  0x6c   : > { %1226 = vmatmul.mubr.f32.gmra.mrb[14].mxu0 %v4705_v62  ;;  %3649 = vmatprep.subr.bf16.mxu1 %v5853_v45  ;;  %v3685_v29 = vpack.c.bf16 %v3037_v25, %v3036_v60  ;;  %v3680_v30 = vpack.c.bf16 %v1076_v9, %v1075_v32  ;;  %v814_v51 = vsel %vm811_vm8, %v812_v21, %v813_v50  ;;  %v3068_v25 = vld [vmem:[%s5740_s3 + $0x400] sm:$0xff]  ;;  %v831_v9 = vrot.slane %v4195_v39, 7 }
  0x6d   : > { %1230 = vmatprep.mubr.f32.mxu0 %v4186_v36  ;;  %3673 = vmatprep.subr.bf16.mxu0 %v3672_v16  ;;  %v3040_v50 = vld [vmem:[%s5740_s3 + $0x320] sm:$0xff] }
  0x6e   : > { %3362 = vmatmul.mubr.msk.f32.gmra.mrb[30].mxu1 %vm920_vm2, %v4671_v19  ;;  %3675 = vmatpush3.bf16.msra.mxu0 %v3672_v16  ;;  %v4771_v16 = vrot.slane %v4192_v38, 7  ;;  %v3063_v19 = vld [vmem:[%s5740_s3 + $0x3d8] sm:$0xff] }
  0x6f   : > { %3651 = vmatpush1.bf16.msra.mxu1 %v3650_v35  ;;  %1640 = vmatprep.mubr.f32.mxu1 %v739_v15  ;;  %v3039_v15 = vld [vmem:[%s5740_s3 + $0x318] sm:$0xff]  ;;  %v4757_v35 = vsel %vm811_vm8, %v4720_v1, %v828_v0  ;;  %v3069_v0 = vld [vmem:[%s5740_s3 + $0x408] sm:$0xff] }
  0x70   : > { %2949 = vmatmul.mubr.msk.f32.gmra.mrb[16].mxu0 %vm4429_vm11, %v4720_v1  ;;  %3684 = vmatprep.subr.bf16.mxu1 %v5853_v45  ;;  %v3688_v60 = vpack.c.bf16 %v3039_v15, %v3038_v48  ;;  %v3042_v48 = vld [vmem:[%s5740_s3 + $0x330] sm:$0xff] }
  0x71   : > { %1235 = vmatprep.mubr.f32.mxu0 %v4189_v37  ;;  %3677 = vmatprep.subr.bf16.mxu0 %v3676_v8 }
  0x72   : > { %2989 = vmatmul.mubr.msk.f32.vlgmr.msra.gmra.mrb[32].mxu1 %vm4429_vm11, %v812_v21  ;;  %3679 = vmatpush3.bf16.msra.mxu0 %v3676_v8  ;;  %v4782_v21 = vpack.c.bf16 %v3069_v0, %v3068_v25  ;;  %v3043_v8 = vld [vmem:[%s5740_s3 + $0x338] sm:$0xff]  ;;  %v3046_v25 = vld [vmem:[%s5740_s3 + $0x350] sm:$0xff] }
  0x73   : > { %3686 = vmatpush1.bf16.msra.mxu1 %v3685_v29  ;;  %1645 = vmatprep.mubr.f32.mxu1 %v4700_v44  ;;  %v3041_v29 = vld [vmem:[%s5740_s3 + $0x328] sm:$0xff]  ;;  %v3694_v15 = vpack.c.bf16 %v3043_v8, %v3042_v48  ;;  %v3047_v0 = vld [vmem:[%s5740_s3 + $0x358] sm:$0xff]  ;;  %v837_v48 = vrot.slane %v4291_v42, 7 }
  0x74   : > { %1236 = vmatmul.mubr.f32.gmra.mrb[18].mxu0 %v4757_v35  ;;  %3687 = vmatprep.subr.bf16.mxu1 %v5853_v45  ;;  %v3691_v32 = vpack.c.bf16 %v3041_v29, %v3040_v50  ;;  %v3700_v50 = vpack.c.bf16 %v3047_v0, %v3046_v25  ;;  %v4841_v29 = vrot.slane %v4288_v41, 7  ;;  %v3052_v25 = vld [vmem:[%s5740_s3 + $0x380] sm:$0xff]  ;;  %v3053_v0 = vld [vmem:[%s5740_s3 + $0x388] sm:$0xff] }
  0x75   : > { %1240 = vmatprep.mubr.f32.mxu0 %v4192_v38  ;;  %3681 = vmatprep.subr.bf16.mxu0 %v3680_v30 }
  0x76   : > { %1646 = vmatmul.mubr.f32.gmra.mrb[34].mxu1 %v814_v51  ;;  %3683 = vmatpush3.bf16.msra.mxu0 %v3680_v30  ;;  %v4807_v51 = vrot.slane %v4231_v63, 7  ;;  %v3044_v30 = vld [vmem:[%s5740_s3 + $0x340] sm:$0xff] }
  0x77   : > { %1650 = vmatprep.mubr.f32.mxu1 %v3998_v55  ;;  %3689 = vmatpush1.bf16.msra.mxu1 %v3688_v60  ;;  %v4798_v55 = vsel %vm811_vm8, %v4771_v16, %v831_v9  ;;  %v3048_v9 = vld [vmem:[%s5740_s3 + $0x360] sm:$0xff] }
  0x78   : > { %2951 = vmatmul.mubr.msk.f32.gmra.mrb[20].mxu0 %vm4429_vm11, %v4771_v16  ;;  %3690 = vmatprep.subr.bf16.mxu1 %v5853_v45 }
  0x79   : > { %1245 = vmatprep.mubr.f32.mxu0 %v4195_v39  ;;  %3733 = vmatprep.subr.bf16.mxu0 %v4782_v21 }
  0x7a   : > { %2991 = vmatmul.mubr.msk.f32.gmra.mrb[36].mxu1 %vm4429_vm11, %v4403_v10  ;;  %v3045_v10 = vld [vmem:[%s5740_s3 + $0x348] sm:$0xff] }
  0x7b   : > { %1655 = vmatprep.mubr.f32.mxu1 %v4000_v56  ;;  %3692 = vmatpush1.bf16.msra.mxu1 %v3691_v32  ;;  %v834_v56 = vrot.slane %v4252_v14, 7  ;;  %v3697_v60 = vpack.c.bf16 %v3045_v10, %v3044_v30  ;;  %v3049_v32 = vld [vmem:[%s5740_s3 + $0x368] sm:$0xff]  ;;  %v3051_v30 = vld [vmem:[%s5740_s3 + $0x378] sm:$0xff]  ;;  %v4867_v10 = vsel %vm811_vm8, %v4841_v29, %v837_v48 }
  0x7c   : > { %1246 = vmatmul.mubr.f32.gmra.mrb[22].mxu0 %v4798_v55  ;;  %3693 = vmatprep.subr.bf16.mxu1 %v5853_v45  ;;  %v3703_v8 = vpack.c.bf16 %v3049_v32, %v3048_v9  ;;  %v3709_v9 = vpack.c.bf16 %v3053_v0, %v3052_v25  ;;  %v3054_v32 = vld [vmem:[%s5740_s3 + $0x390] sm:$0xff]  ;;  %v3055_v48 = vld [vmem:[%s5740_s3 + $0x398] sm:$0xff]  ;;  %v3057_v25 = vld [vmem:[%s5740_s3 + $0x3a8] sm:$0xff]  ;;  %v843_v0 = vrot.slane %v4390_v17, 7 }
  0x7d   : > { %1250 = vmatprep.mubr.f32.mxu0 %v4231_v63 }
  0x7e   : > { %1656 = vmatmul.mubr.f32.gmra.mrb[38].mxu1 %v4471_v7  ;;  %v4833_v7 = vsel %vm811_vm8, %v4807_v51, %v834_v56 }
  0x7f   : > { %1660 = vmatprep.mubr.f32.mxu1 %v4051_v22  ;;  %3695 = vmatpush1.bf16.msra.mxu1 %v3694_v15  ;;  %v3050_v15 = vld [vmem:[%s5740_s3 + $0x370] sm:$0xff] }
  0x80   : > { %2953 = vmatmul.mubr.msk.f32.gmra.mrb[24].mxu0 %vm4429_vm11, %v4807_v51  ;;  %3696 = vmatprep.subr.bf16.mxu1 %v5853_v45  ;;  %v3706_v56 = vpack.c.bf16 %v3051_v30, %v3050_v15  ;;  %v3712_v15 = vpack.c.bf16 %v3055_v48, %v3054_v32  ;;  %v4909_v30 = vrot.slane %v4387_v11, 7  ;;  %v3059_v32 = vld [vmem:[%s5740_s3 + $0x3b8] sm:$0xff] }
  0x81   : > { %1255 = vmatprep.mubr.f32.mxu0 %v4252_v14 }
  0x82   : > { %2993 = vmatmul.mubr.msk.f32.gmra.mrb[40].mxu1 %vm4429_vm11, %v4497_v12  ;;  %v4935_v48 = vsel %vm811_vm8, %v4909_v30, %v843_v0  ;;  %v3061_v0 = vld [vmem:[%s5740_s3 + $0x3c8] sm:$0xff] }
  0x83   : > { %1665 = vmatprep.mubr.f32.mxu1 %v4056_v26  ;;  %3698 = vmatpush1.bf16.msra.mxu1 %v3697_v60  ;;  %v4875_v60 = vrot.slane %v4340_v24, 7 }
  0x84   : > { %1256 = vmatmul.mubr.f32.gmra.mrb[26].mxu0 %v4833_v7  ;;  %3699 = vmatprep.subr.bf16.mxu1 %v5853_v45 }
  0x85   : > { %1260 = vmatprep.mubr.f32.mxu0 %v4288_v41 }
  0x86   : > { %1666 = vmatmul.mubr.f32.gmra.mrb[42].mxu1 %v4525_v4 }
  0x87   : > { %1670 = vmatprep.mubr.f32.mxu1 %v4102_v47  ;;  %3701 = vmatpush1.bf16.msra.mxu1 %v3700_v50  ;;  %v840_v50 = vrot.slane %v4343_v23, 7 }
  0x88   : > { %2955 = vmatmul.mubr.msk.f32.gmra.mrb[28].mxu0 %vm4429_vm11, %v4841_v29  ;;  %3702 = vmatprep.subr.bf16.mxu1 %v5853_v45 }
  0x89   : > { %1265 = vmatprep.mubr.f32.mxu0 %v4291_v42 }
  0x8a   : > { %2995 = vmatmul.mubr.msk.f32.gmra.mrb[44].mxu1 %vm4429_vm11, %v4568_v43 }
  0x8b   : > { %1675 = vmatprep.mubr.f32.mxu1 %v4106_v49  ;;  %3704 = vmatpush1.bf16.msra.mxu1 %v3703_v8  ;;  %v4901_v8 = vsel %vm811_vm8, %v4875_v60, %v840_v50 }
  0x8c   : > { %1266 = vmatmul.mubr.f32.gmra.mrb[30].mxu0 %v4867_v10  ;;  %3705 = vmatprep.subr.bf16.mxu1 %v5853_v45  ;;  %5872 = vst [vmem:[#allocation46_spill] sm:$0xff] %v4901_v8 }
  0x8d   : > { %1270 = vmatprep.mubr.f32.mxu0 %v4340_v24 }
  0x8e   : > { %1676 = vmatmul.mubr.f32.gmra.mrb[46].mxu1 %v4610_v46 }
  0x8f   : > { %1680 = vmatprep.mubr.f32.mxu1 %v4111_v53  ;;  %3707 = vmatpush1.bf16.msra.mxu1 %v3706_v56  ;;  %v3056_v56 = vld [vmem:[%s5740_s3 + $0x3a0] sm:$0xff] }
  0x90   : > { %2957 = vmatmul.mubr.msk.f32.gmra.mrb[32].mxu0 %vm4429_vm11, %v4875_v60  ;;  %3708 = vmatprep.subr.bf16.mxu1 %v5853_v45  ;;  %v3715_v50 = vpack.c.bf16 %v3057_v25, %v3056_v56  ;;  %v4943_v56 = vrot.slane %v4393_v20, 7  ;;  %v3060_v25 = vld [vmem:[%s5740_s3 + $0x3c0] sm:$0xff] }
  0x91   : > { %1275 = vmatprep.mubr.f32.mxu0 %v4343_v23 }
  0x92   : > { %2997 = vmatmul.mubr.msk.f32.gmra.mrb[48].mxu1 %vm4429_vm11, %v4657_v28 }
  0x93   : > { %1685 = vmatprep.mubr.f32.mxu1 %v4132_v5  ;;  %3710 = vmatpush1.bf16.msra.mxu1 %v3709_v9  ;;  %v3058_v9 = vld [vmem:[%s5740_s3 + $0x3b0] sm:$0xff] }
  0x94   : > { %1276 = vmatmul.mubr.f32.gmra.mrb[34].mxu0 %v4901_v8  ;;  %3711 = vmatprep.subr.bf16.mxu1 %v5853_v45 }
  0x95   : > { %1280 = vmatprep.mubr.f32.mxu0 %v4387_v11 }
  0x96   : > { %1686 = vmatmul.mubr.f32.gmra.mrb[50].mxu1 %v4705_v62 }
  0x97   : > { %1690 = vmatprep.mubr.f32.mxu1 %v4186_v36  ;;  %3713 = vmatpush1.bf16.msra.mxu1 %v3712_v15  ;;  %v3718_v15 = vpack.c.bf16 %v3059_v32, %v3058_v9  ;;  %v3721_v9 = vpack.c.bf16 %v3061_v0, %v3060_v25  ;;  %v3062_v32 = vld [vmem:[%s5740_s3 + $0x3d0] sm:$0xff]  ;;  %v4977_v0 = vrot.slane %v4448_v58, 7 }
  0x98   : > { %2959 = vmatmul.mubr.msk.f32.gmra.mrb[36].mxu0 %vm4429_vm11, %v4909_v30  ;;  %3714 = vmatprep.subr.bf16.mxu1 %v5853_v45  ;;  %v3724_v25 = vpack.c.bf16 %v3063_v19, %v3062_v32  ;;  %v3066_v32 = vld [vmem:[%s5740_s3 + $0x3f0] sm:$0xff] }
  0x99   : > { %1285 = vmatprep.mubr.f32.mxu0 %v4390_v17 }
  0x9a   : > { %2999 = vmatmul.mubr.msk.f32.gmra.mrb[52].mxu1 %vm4429_vm11, %v4720_v1 }
  0x9b   : > { %1695 = vmatprep.mubr.f32.mxu1 %v4189_v37  ;;  %3716 = vmatpush1.bf16.msra.mxu1 %v3715_v50  ;;  %v846_v50 = vrot.slane %v4396_v18, 7 }
  0x9c   : > { %1286 = vmatmul.mubr.f32.gmra.mrb[38].mxu0 %v4935_v48  ;;  %3717 = vmatprep.subr.bf16.mxu1 %v5853_v45 }
  0x9d   : > { %1290 = vmatprep.mubr.f32.mxu0 %v4393_v20 }
  0x9e   : > { %1696 = vmatmul.mubr.f32.gmra.mrb[54].mxu1 %v4757_v35 }
  0x9f   : > { %1700 = vmatprep.mubr.f32.mxu1 %v4192_v38  ;;  %3719 = vmatpush1.bf16.msra.mxu1 %v3718_v15  ;;  %v4969_v15 = vsel %vm811_vm8, %v4943_v56, %v846_v50  ;;  %v3064_v50 = vld [vmem:[%s5740_s3 + $0x3e0] sm:$0xff]  ;;  %v3065_v38 = vld [vmem:[%s5740_s3 + $0x3e8] sm:$0xff] }
  0xa0   : > { %2961 = vmatmul.mubr.msk.f32.gmra.mrb[40].mxu0 %vm4429_vm11, %v4943_v56  ;;  %3720 = vmatprep.subr.bf16.mxu1 %v5853_v45  ;;  %v3727_v19 = vpack.c.bf16 %v3065_v38, %v3064_v50  ;;  %v5011_v50 = vrot.slane %v4486_v33, 7 }
  0xa1   : > { %1295 = vmatprep.mubr.f32.mxu0 %v4396_v18 }
  0xa2   : > { %3001 = vmatmul.mubr.msk.f32.gmra.mrb[56].mxu1 %vm4429_vm11, %v4771_v16  ;;  %5873 = vst [vmem:[#allocation47_spill] sm:$0xff] %v5011_v50 }
  0xa3   : > { %1705 = vmatprep.mubr.f32.mxu1 %v4195_v39  ;;  %3722 = vmatpush1.bf16.msra.mxu1 %v3721_v9  ;;  %v849_v9 = vrot.slane %v4451_v59, 7  ;;  %v3067_v39 = vld [vmem:[%s5740_s3 + $0x3f8] sm:$0xff] }
  0xa4   : > { %1296 = vmatmul.mubr.f32.gmra.mrb[42].mxu0 %v4969_v15  ;;  %3723 = vmatprep.subr.bf16.mxu1 %v5853_v45  ;;  %v3730_v38 = vpack.c.bf16 %v3067_v39, %v3066_v32 }
  0xa5   : > { %1300 = vmatprep.mubr.f32.mxu0 %v4448_v58 }
  0xa6   : > { %1706 = vmatmul.mubr.f32.gmra.mrb[58].mxu1 %v4798_v55 }
  0xa7   : > { %1710 = vmatprep.mubr.f32.mxu1 %v4231_v63  ;;  %3725 = vmatpush1.bf16.msra.mxu1 %v3724_v25  ;;  %v5003_v25 = vsel %vm811_vm8, %v4977_v0, %v849_v9  ;;  %v852_v9 = vrot.slane %v4506_v57, 7 }
  0xa8   : > { %2963 = vmatmul.mubr.msk.f32.gmra.mrb[44].mxu0 %vm4429_vm11, %v4977_v0  ;;  %3726 = vmatprep.subr.bf16.mxu1 %v5853_v45 }
  0xa9   : > { %1305 = vmatprep.mubr.f32.mxu0 %v4451_v59  ;;  %v5024_v39 = vsel %vm811_vm8, %v5011_v50, %v852_v9  ;;  %v858_v9 = vrot.slane %v4592_v31, 7 }
  0xaa   : > { %3003 = vmatmul.mubr.msk.f32.gmra.mrb[60].mxu1 %vm4429_vm11, %v4807_v51 }
  0xab   : > { %1715 = vmatprep.mubr.f32.mxu1 %v4252_v14  ;;  %3728 = vmatpush1.bf16.msra.mxu1 %v3727_v19  ;;  %v855_v19 = vrot.slane %v4551_v40, 7 }
  0xac   : > { %1306 = vmatmul.mubr.f32.gmra.mrb[46].mxu0 %v5003_v25  ;;  %3729 = vmatprep.subr.bf16.mxu1 %v5853_v45  ;;  %v5032_v45 = vrot.slane %v4543_v3, 7 }
  0xad   : > { %1310 = vmatprep.mubr.f32.mxu0 %v4486_v33 }
  0xae   : > { %1716 = vmatmul.mubr.f32.gmra.mrb[62].mxu1 %v4833_v7  ;;  %v5044_v32 = vsel %vm811_vm8, %v5032_v45, %v855_v19 }
  0xaf   : > { %1720 = vmatprep.mubr.f32.mxu1 %v4288_v41  ;;  %3731 = vmatpush1.bf16.msra.mxu1 %v3730_v38  ;;  %5874 = vst [vmem:[#allocation48_spill] sm:$0xff] %v5044_v32  ;;  %v5052_v38 = vrot.slane %v4581_v27, 7 }
  0xb0   : > { %2965 = vmatmul.mubr.msk.f32.gmra.mrb[48].mxu0 %vm4429_vm11, %v5011_v50 }
  0xb1   : > { %1315 = vmatprep.mubr.f32.mxu0 %v4506_v57  ;;  %5875 = vst [vmem:[#allocation49_spill] sm:$0xff] %v5052_v38  ;;  %v5064_v19 = vsel %vm811_vm8, %v5052_v38, %v858_v9 }
  0xb2   : > { %3005 = vmatmul.mubr.msk.f32.gmra.mrb[64].mxu1 %vm4429_vm11, %v4841_v29  ;;  %5876 = vst [vmem:[#allocation50_spill] sm:$0xff] %v5064_v19 }
  0xb3   : > { %1725 = vmatprep.mubr.f32.mxu1 %v4291_v42 }
  0xb4   : > { %1316 = vmatmul.mubr.f32.gmra.mrb[50].mxu0 %v5024_v39 }
  0xb5   : > { %1320 = vmatprep.mubr.f32.mxu0 %v4543_v3 }
  0xb6   : > { %1726 = vmatmul.mubr.f32.gmra.mrb[66].mxu1 %v4867_v10 }
  0xb7   : > { %1730 = vmatprep.mubr.f32.mxu1 %v4340_v24 }
  0xb8   : > { %2967 = vmatmul.mubr.msk.f32.gmra.mrb[52].mxu0 %vm4429_vm11, %v5032_v45 }
  0xb9   : > { %1325 = vmatprep.mubr.f32.mxu0 %v4551_v40 }
  0xba   : > { %3007 = vmatmul.mubr.msk.f32.gmra.mrb[68].mxu1 %vm4429_vm11, %v4875_v60 }
  0xbb   : > { %1735 = vmatprep.mubr.f32.mxu1 %v4343_v23 }
  0xbc   : > { %1326 = vmatmul.mubr.f32.gmra.mrb[54].mxu0 %v5044_v32 }
  0xbd   : > { %1330 = vmatprep.mubr.f32.mxu0 %v4581_v27 }
  0xbe   : > { %1736 = vmatmul.mubr.f32.gmra.mrb[70].mxu1 %v4901_v8  ;;  %v861_v8 = vrot.slane %v4641_v34, 7 }
  0xbf   : > { %1740 = vmatprep.mubr.f32.mxu1 %v4387_v11  ;;  %v5072_v11 = vrot.slane %v4637_v61, 7 }
  0xc0   : > { %2969 = vmatmul.mubr.msk.f32.gmra.mrb[56].mxu0 %vm4429_vm11, %v5052_v38 }
  0xc1   : > { %1335 = vmatprep.mubr.f32.mxu0 %v4592_v31  ;;  %5877 = vst [vmem:[#allocation51_spill] sm:$0xff] %v5072_v11  ;;  %v5084_v9 = vsel %vm811_vm8, %v5072_v11, %v861_v8 }
  0xc2   : > { %3009 = vmatmul.mubr.msk.f32.gmra.mrb[72].mxu1 %vm4429_vm11, %v4909_v30  ;;  %5878 = vst [vmem:[#allocation52_spill] sm:$0xff] %v5084_v9 }
  0xc3   : > { %1745 = vmatprep.mubr.f32.mxu1 %v4390_v17 }
  0xc4   : > { %1336 = vmatmul.mubr.f32.gmra.mrb[58].mxu0 %v5064_v19 }
  0xc5   : > { %1340 = vmatprep.mubr.f32.mxu0 %v4637_v61  ;;  %v3070_v61 = vld [vmem:[%s5740_s3 + $0x410] sm:$0xff] }
  0xc6   : > { %1746 = vmatmul.mubr.f32.gmra.mrb[74].mxu1 %v4935_v48 }
  0xc7   : > { %1750 = vmatprep.mubr.f32.mxu1 %v4393_v20  ;;  %v3071_v20 = vld [vmem:[%s5740_s3 + $0x418] sm:$0xff] }
  0xc8   : > { %2971 = vmatmul.mubr.msk.f32.gmra.mrb[60].mxu0 %vm4429_vm11, %v5072_v11  ;;  %v3736_v8 = vpack.c.bf16 %v3071_v20, %v3070_v61  ;;  %v3073_v11 = vld [vmem:[%s5740_s3 + $0x428] sm:$0xff]  ;;  %v3074_v61 = vld [vmem:[%s5740_s3 + $0x430] sm:$0xff] }
  0xc9   : > { %1345 = vmatprep.mubr.f32.mxu0 %v4641_v34  ;;  %v3072_v34 = vld [vmem:[%s5740_s3 + $0x420] sm:$0xff] }
  0xca   : > { %3011 = vmatmul.mubr.msk.f32.gmra.mrb[76].mxu1 %vm4429_vm11, %v4943_v56  ;;  %v3740_v20 = vpack.c.bf16 %v3073_v11, %v3072_v34  ;;  %v3076_v34 = vld [vmem:[%s5740_s3 + $0x440] sm:$0xff] }
  0xcb   : > { %1755 = vmatprep.mubr.f32.mxu1 %v4396_v18  ;;  %v5879_v18 = vrot.slane %v4700_v44, 1  ;;  %v5880_v44 = vld [vmem:[#allocation4_spill] sm:$0xff] }
  0xcc   : > { %1346 = vmatmul.mubr.f32.gmra.mrb[62].mxu0 %v5084_v9  ;;  %v5884_v9 = vld [vmem:[#allocation7_spill] sm:$0xff] }
  0xcd   : > { %3396 = vmatprep.mubr.f32.mxu0 %v4731_v2  ;;  %v3077_v2 = vld [vmem:[%s5740_s3 + $0x448] sm:$0xff] }
  0xce   : > { %1756 = vmatmul.mubr.f32.gmra.mrb[78].mxu1 %v4969_v15 }
  0xcf   : > { %1760 = vmatprep.mubr.f32.mxu1 %v4448_v58 }
  0xd0   : > { %3397 = vmatmul.mubr.msk.f32.vlgmr.msra.gmra.mrb[64].mxu0 %vm920_vm2, %v5879_v18  ;;  %v3075_v18 = vld [vmem:[%s5740_s3 + $0x438] sm:$0xff] }
  0xd1   : > { %3399 = vmatprep.mubr.f32.mxu0 %v4027_v6  ;;  %3735 = vmatpush3.bf16.msra.mxu0 %v4782_v21  ;;  %v5881_v6 = vld [vmem:[#allocation6_spill] sm:$0xff]  ;;  %v3744_v11 = vpack.c.bf16 %v3075_v18, %v3074_v61  ;;  %v5882_v21 = vld [vmem:[#allocation5_spill] sm:$0xff] }
  0xd2   : > { %3013 = vmatmul.mubr.msk.f32.gmra.mrb[80].mxu1 %vm4429_vm11, %v4977_v0  ;;  %3737 = vmatprep.subr.bf16.mxu0 %v3736_v8  ;;  %v3078_v61 = vld [vmem:[%s5740_s3 + $0x450] sm:$0xff]  ;;  %v3079_v18 = vld [vmem:[%s5740_s3 + $0x458] sm:$0xff] }
  0xd3   : > { %1765 = vmatprep.mubr.f32.mxu1 %v4451_v59 }
  0xd4   : > { %3400 = vmatmul.mubr.msk.f32.gmra.mrb[66].mxu0 %vm920_vm2, %v5880_v44  ;;  %v5883_v44 = vld [vmem:[#allocation9_spill] sm:$0xff] }
  0xd5   : > { %3402 = vmatprep.mubr.f32.mxu0 %v5881_v6  ;;  %3739 = vmatpush3.bf16.msra.mxu0 %v3736_v8  ;;  %v3748_v8 = vpack.c.bf16 %v3077_v2, %v3076_v34  ;;  %v3752_v34 = vpack.c.bf16 %v3079_v18, %v3078_v61  ;;  %v3080_v2 = vld [vmem:[%s5740_s3 + $0x460] sm:$0xff]  ;;  %v3082_v61 = vld [vmem:[%s5740_s3 + $0x470] sm:$0xff]  ;;  %v3083_v18 = vld [vmem:[%s5740_s3 + $0x478] sm:$0xff] }
  0xd6   : > { %1766 = vmatmul.mubr.f32.gmra.mrb[82].mxu1 %v5003_v25  ;;  %3741 = vmatprep.subr.bf16.mxu0 %v3740_v20 }
  0xd7   : > { %1770 = vmatprep.mubr.f32.mxu1 %v4486_v33  ;;  %v5887_v33 = vld [vmem:[#allocation15_spill] sm:$0xff] }
  0xd8   : > { %3403 = vmatmul.mubr.msk.f32.gmra.mrb[68].mxu0 %vm920_vm2, %v5882_v21 }
  0xd9   : > { %3405 = vmatprep.mubr.f32.mxu0 %v5883_v44  ;;  %3743 = vmatpush3.bf16.msra.mxu0 %v3740_v20  ;;  %v5885_v20 = vld [vmem:[#allocation12_spill] sm:$0xff] }
  0xda   : > { %3015 = vmatmul.mubr.msk.f32.gmra.mrb[84].mxu1 %vm4429_vm11, %v5011_v50  ;;  %3745 = vmatprep.subr.bf16.mxu0 %v3744_v11  ;;  %v5886_v50 = vld [vmem:[#allocation8_spill] sm:$0xff] }
  0xdb   : > { %1775 = vmatprep.mubr.f32.mxu1 %v4506_v57  ;;  %v3081_v57 = vld [vmem:[%s5740_s3 + $0x468] sm:$0xff] }
  0xdc   : > { %3406 = vmatmul.mubr.msk.f32.gmra.mrb[70].mxu0 %vm920_vm2, %v5884_v9 }
  0xdd   : > { %3408 = vmatprep.mubr.f32.mxu0 %v5885_v20  ;;  %3747 = vmatpush3.bf16.msra.mxu0 %v3744_v11  ;;  %v3756_v11 = vpack.c.bf16 %v3081_v57, %v3080_v2  ;;  %v3760_v57 = vpack.c.bf16 %v3083_v18, %v3082_v61  ;;  %v5890_v2 = vld [vmem:[#allocation14_spill] sm:$0xff]  ;;  %v5894_v61 = vld [vmem:[#allocation19_spill] sm:$0xff]  ;;  %v5896_v18 = vld [vmem:[#allocation21_spill] sm:$0xff] }
  0xde   : > { %1776 = vmatmul.mubr.f32.gmra.mrb[86].mxu1 %v5024_v39  ;;  %3749 = vmatprep.subr.bf16.mxu0 %v3748_v8 }
  0xdf   : > { %1780 = vmatprep.mubr.f32.mxu1 %v4543_v3  ;;  %v5888_v3 = vld [vmem:[#allocation13_spill] sm:$0xff] }
  0xe0   : > { %3409 = vmatmul.mubr.msk.f32.gmra.mrb[72].mxu0 %vm920_vm2, %v5886_v50 }
  0xe1   : > { %3411 = vmatprep.mubr.f32.mxu0 %v5887_v33  ;;  %3751 = vmatpush3.bf16.msra.mxu0 %v3748_v8  ;;  %v5889_v8 = vld [vmem:[#allocation16_spill] sm:$0xff] }
  0xe2   : > { %3017 = vmatmul.mubr.msk.f32.gmra.mrb[88].mxu1 %vm4429_vm11, %v5032_v45  ;;  %3753 = vmatprep.subr.bf16.mxu0 %v3752_v34 }
  0xe3   : > { %1785 = vmatprep.mubr.f32.mxu1 %v4551_v40  ;;  %v5891_v40 = vld [vmem:[#allocation18_spill] sm:$0xff] }
  0xe4   : > { %3412 = vmatmul.mubr.msk.f32.gmra.mrb[74].mxu0 %vm920_vm2, %v5888_v3 }
  0xe5   : > { %3414 = vmatprep.mubr.f32.mxu0 %v5889_v8  ;;  %3755 = vmatpush3.bf16.msra.mxu0 %v3752_v34  ;;  %v5892_v34 = vld [vmem:[#allocation17_spill] sm:$0xff] }
  0xe6   : > { %1786 = vmatmul.mubr.f32.gmra.mrb[90].mxu1 %v5044_v32  ;;  %3757 = vmatprep.subr.bf16.mxu0 %v3756_v11  ;;  %v5893_v32 = vld [vmem:[#allocation20_spill] sm:$0xff] }
  0xe7   : > { %1790 = vmatprep.mubr.f32.mxu1 %v4581_v27 }
  0xe8   : > { %3415 = vmatmul.mubr.msk.f32.gmra.mrb[76].mxu0 %vm920_vm2, %v5890_v2 }
  0xe9   : > { %3417 = vmatprep.mubr.f32.mxu0 %v5891_v40  ;;  %3759 = vmatpush3.bf16.msra.mxu0 %v3756_v11  ;;  %v5895_v11 = vld [vmem:[#allocation25_spill] sm:$0xff] }
  0xea   : > { %3019 = vmatmul.mubr.msk.f32.gmra.mrb[92].mxu1 %vm4429_vm11, %v5052_v38  ;;  %3761 = vmatprep.subr.bf16.mxu0 %v3760_v57  ;;  %v5907_v38 = vld [vmem:[#allocation10_spill] sm:$0xff] }
  0xeb   : > { %1795 = vmatprep.mubr.f32.mxu1 %v4592_v31  ;;  %v5897_v31 = vld [vmem:[#allocation28_spill] sm:$0xff] }
  0xec   : > { %3418 = vmatmul.mubr.msk.f32.gmra.mrb[78].mxu0 %vm920_vm2, %v5892_v34 }
  0xed   : > { %3420 = vmatprep.mubr.f32.mxu0 %v5893_v32  ;;  %3763 = vmatpush3.bf16.msra.mxu0 %v3760_v57  ;;  %v5899_v57 = vld [vmem:[#allocation29_spill] sm:$0xff] }
  0xee   : > { %1796 = vmatmul.mubr.f32.gmra.mrb[94].mxu1 %v5064_v19  ;;  %v5905_v19 = vld [vmem:[#allocation40_spill] sm:$0xff] }
  0xef   : > { %2139 = vmatprep.mubr.f32.mxu1 %v4051_v22  ;;  %v5898_v22 = vld [vmem:[#allocation26_spill] sm:$0xff] }
  0xf0   : > { %3421 = vmatmul.mubr.msk.f32.gmra.mrb[80].mxu0 %vm920_vm2, %v5894_v61 }
  0xf1   : > { %3423 = vmatprep.mubr.f32.mxu0 %v5895_v11 }
  0xf2   : > { %3085 = vmatmul.mubr.msk.f32.vlgmr.msra.gmra.mrb[96].mxu1 %vm4429_vm11, %v4497_v12  ;;  %v5901_v12 = vld [vmem:[#allocation33_spill] sm:$0xff] }
  0xf3   : > { %2144 = vmatprep.mubr.f32.mxu1 %v4056_v26  ;;  %v5900_v26 = vld [vmem:[#allocation27_spill] sm:$0xff] }
  0xf4   : > { %3424 = vmatmul.mubr.msk.f32.gmra.mrb[82].mxu0 %vm920_vm2, %v5896_v18 }
  0xf5   : > { %3426 = vmatprep.mubr.f32.mxu0 %v5897_v31 }
  0xf6   : > { %2145 = vmatmul.mubr.f32.gmra.mrb[98].mxu1 %v4525_v4  ;;  %v5903_v4 = vld [vmem:[#allocation37_spill] sm:$0xff] }
  0xf7   : > { %2149 = vmatprep.mubr.f32.mxu1 %v4102_v47  ;;  %v5902_v47 = vld [vmem:[#allocation30_spill] sm:$0xff] }
  0xf8   : > { %3427 = vmatmul.mubr.msk.f32.gmra.mrb[84].mxu0 %vm920_vm2, %v5898_v22 }
  0xf9   : > { %3429 = vmatprep.mubr.f32.mxu0 %v5899_v57 }
  0xfa   : > { %3087 = vmatmul.mubr.msk.f32.gmra.mrb[100].mxu1 %vm4429_vm11, %v4568_v43  ;;  %v5904_v43 = vld [vmem:[#allocation34_spill] sm:$0xff] }
  0xfb   : > { %2154 = vmatprep.mubr.f32.mxu1 %v4106_v49 }
  0xfc   : > { %3430 = vmatmul.mubr.msk.f32.gmra.mrb[86].mxu0 %vm920_vm2, %v5900_v26 }
  0xfd   : > { %3432 = vmatprep.mubr.f32.mxu0 %v5901_v12 }
  0xfe   : > { %2155 = vmatmul.mubr.f32.gmra.mrb[102].mxu1 %v4610_v46 }
  0xff   : > { %2159 = vmatprep.mubr.f32.mxu1 %v4111_v53 }
 0x100   : > { %3433 = vmatmul.mubr.msk.f32.gmra.mrb[88].mxu0 %vm920_vm2, %v5902_v47 }
 0x101   : > { %3435 = vmatprep.mubr.f32.mxu0 %v5903_v4 }
 0x102   : > { %3089 = vmatmul.mubr.msk.f32.gmra.mrb[104].mxu1 %vm4429_vm11, %v4657_v28 }
 0x103   : > { %2164 = vmatprep.mubr.f32.mxu1 %v4132_v5  ;;  %v5906_v5 = vld [vmem:[#allocation41_spill] sm:$0xff] }
 0x104   : > { %3436 = vmatmul.mubr.msk.f32.gmra.mrb[90].mxu0 %vm920_vm2, %v5904_v43 }
 0x105   : > { %v3318_v49 = vpop.f32.mrb[0].mxu1  ;;  %3438 = vmatprep.mubr.f32.mxu0 %v5905_v19 }
 0x106   : > { %v1417_v46 = vpop.f32.mrb[1].mxu1  ;;  %2165 = vmatmul.mubr.f32.gmra.mrb[106].mxu1 %v4705_v62 }
 0x107   : > { %2169 = vmatprep.mubr.f32.mxu1 %v4186_v36 }
 0x108   : > { %3439 = vmatmul.mubr.msk.f32.gmra.mrb[92].mxu0 %vm920_vm2, %v4589_v13 }
 0x109   : > { %v5224_v53 = vpop.f32.mrb[2].mxu1  ;;  %3441 = vmatprep.mubr.f32.mxu0 %v4661_v52 }
 0x10a   : > { %v1427_v28 = vpop.f32.mrb[3].mxu1  ;;  %3091 = vmatmul.mubr.msk.f32.gmra.mrb[108].mxu1 %vm4429_vm11, %v4720_v1  ;;  %v5908_v1 = vld [vmem:[#allocation11_spill] sm:$0xff] }
 0x10b   : > { %2174 = vmatprep.mubr.f32.mxu1 %v4189_v37 }
 0x10c   : > { %3442 = vmatmul.mubr.msk.f32.gmra.mrb[94].mxu0 %vm920_vm2, %v5906_v5 }
 0x10d   : > { %v5233_v62 = vpop.f32.mrb[4].mxu1  ;;  %3476 = vmatprep.mubr.f32.mxu0 %v5881_v6 }
 0x10e   : > { %v5236_v36 = vpop.f32.mrb[5].mxu1  ;;  %2175 = vmatmul.mubr.f32.gmra.mrb[110].mxu1 %v4757_v35 }
 0x10f   : > { %2179 = vmatprep.mubr.f32.mxu1 %v5907_v38 }
 0x110   : > { %3477 = vmatmul.mubr.msk.f32.vlgmr.msra.gmra.mrb[96].mxu0 %vm920_vm2, %v5882_v21 }
 0x111   : > { %v5242_v27 = vpop.f32.mrb[6].mxu1  ;;  %3479 = vmatprep.mubr.f32.mxu0 %v5883_v44  ;;  %v528_v44 = vld [vmem:[%s471_s11] sm:$0xff] }
 0x112   : > { %v5245_v37 = vpop.f32.mrb[7].mxu1  ;;  %3093 = vmatmul.mubr.msk.f32.gmra.mrb[112].mxu1 %vm4429_vm11, %v4771_v16 }
 0x113   : > { %2184 = vmatprep.mubr.f32.mxu1 %v5908_v1 }
 0x114   : > { %3480 = vmatmul.mubr.msk.f32.gmra.mrb[98].mxu0 %vm920_vm2, %v5884_v9 }
 0x115   : > { %v5253_v35 = vpop.f32.mrb[8].mxu1  ;;  %3482 = vmatprep.mubr.f32.mxu0 %v5885_v20  ;;  %v529_v20 = vld [vmem:[%s471_s11 + $0x8] sm:$0xff] }
 0x116   : > { %v5256_v38 = vpop.f32.mrb[9].mxu1  ;;  %2185 = vmatmul.mubr.f32.gmra.mrb[114].mxu1 %v4798_v55 }
 0x117   : > { %2189 = vmatprep.mubr.f32.mxu1 %v4231_v63 }
 0x118   : > { %3483 = vmatmul.mubr.msk.f32.gmra.mrb[100].mxu0 %vm920_vm2, %v5886_v50 }
 0x119   : > { %v5262_v6 = vpop.f32.mrb[10].mxu1  ;;  %3485 = vmatprep.mubr.f32.mxu0 %v5887_v33 }
 0x11a   : > { %v5265_v16 = vpop.f32.mrb[11].mxu1  ;;  %3095 = vmatmul.mubr.msk.f32.gmra.mrb[116].mxu1 %vm4429_vm11, %v4807_v51 }
 0x11b   : > { %2194 = vmatprep.mubr.f32.mxu1 %v4252_v14 }
 0x11c   : > { %3486 = vmatmul.mubr.msk.f32.gmra.mrb[102].mxu0 %vm920_vm2, %v5888_v3 }
 0x11d   : > { %v5273_v55 = vpop.f32.mrb[12].mxu1  ;;  %3488 = vmatprep.mubr.f32.mxu0 %v5889_v8 }
 0x11e   : > { %v5276_v63 = vpop.f32.mrb[13].mxu1  ;;  %2195 = vmatmul.mubr.f32.gmra.mrb[118].mxu1 %v4833_v7 }
 0x11f   : > { %2199 = vmatprep.mubr.f32.mxu1 %v4288_v41 }
 0x120   : > { %3489 = vmatmul.mubr.msk.f32.gmra.mrb[104].mxu0 %vm920_vm2, %v5890_v2 }
 0x121   : > { %v5282_v33 = vpop.f32.mrb[14].mxu1  ;;  %3491 = vmatprep.mubr.f32.mxu0 %v5891_v40 }
 0x122   : > { %v5285_v14 = vpop.f32.mrb[15].mxu1  ;;  %3097 = vmatmul.mubr.msk.f32.gmra.mrb[120].mxu1 %vm4429_vm11, %v4841_v29 }
 0x123   : > { %v1192_v3 = vpop.f32.mrb[0].mxu0  ;;  %2204 = vmatprep.mubr.f32.mxu1 %v4291_v42 }
 0x124   : > { %v5291_v51 = vadd.f32 %v1417_v46, %v1192_v3  ;;  %3492 = vmatmul.mubr.msk.f32.gmra.mrb[106].mxu0 %vm920_vm2, %v5892_v34  ;;  %v1194_v41 = vpop.f32.mrb[1].mxu0  ;;  %v5909_v34 = vld [vmem:[#allocation46_spill] sm:$0xff] }
 0x125   : > { %v5295_v7 = vpop.f32.mrb[16].mxu1  ;;  %3494 = vmatprep.mubr.f32.mxu0 %v5893_v32 }
 0x126   : > { %v5298_v40 = vpop.f32.mrb[17].mxu1  ;;  %2205 = vmatmul.mubr.f32.gmra.mrb[122].mxu1 %v4867_v10 }
 0x127   : > { %v1197_v50 = vpop.f32.mrb[2].mxu0  ;;  %2209 = vmatprep.mubr.f32.mxu1 %v4340_v24 }
 0x128   : > { %v5303_v29 = vadd.f32 %v3318_v49, %v1197_v50  ;;  %3495 = vmatmul.mubr.msk.f32.gmra.mrb[108].mxu0 %vm920_vm2, %v5894_v61  ;;  %v1199_v42 = vpop.f32.mrb[3].mxu0  ;;  %v5910_v61 = vld [vmem:[#allocation22_spill] sm:$0xff] }
 0x129   : > { %v5307_v9 = vpop.f32.mrb[18].mxu1  ;;  %3497 = vmatprep.mubr.f32.mxu0 %v5895_v11  ;;  %v5911_v42 = vld [vmem:[#allocation23_spill] sm:$0xff] }
 0x12a   : > { %v5313_v32 = vpop.f32.mrb[19].mxu1  ;;  %3099 = vmatmul.mubr.msk.f32.gmra.mrb[124].mxu1 %vm4429_vm11, %v4875_v60 }
 0x12b   : > { %v1202_v24 = vpop.f32.mrb[4].mxu0  ;;  %2214 = vmatprep.mubr.f32.mxu1 %v4343_v23  ;;  %v3789_v23 = vld [vmem:[%s5741_s4] ss:$0 sm:$0xff] }
 0x12c   : > { %v5319_v10 = vadd.f32 %v1427_v28, %v1202_v24  ;;  %3498 = vmatmul.mubr.msk.f32.gmra.mrb[110].mxu0 %vm920_vm2, %v5896_v18  ;;  %v1204_v21 = vpop.f32.mrb[5].mxu0  ;;  %v571_v11 = vmul.f32 %v3789_v23, %v528_v44  ;;  %v572_v18 = vmul.f32 %v3789_v23, %v529_v20  ;;  %v5912_v24 = vld [vmem:[#allocation3_spill] sm:$0xff] }
 0x12d   : > { %v5323_v8 = vpop.f32.mrb[20].mxu1  ;;  %3500 = vmatprep.mubr.f32.mxu0 %v5897_v31 }
 0x12e   : > { %v5326_v2 = vpop.f32.mrb[21].mxu1  ;;  %2215 = vmatmul.mubr.f32.gmra.mrb[126].mxu1 %v5909_v34  ;;  %v5913_v34 = vld [vmem:[#allocation24_spill] sm:$0xff] }
 0x12f   : > { %v1207_v60 = vpop.f32.mrb[6].mxu0  ;;  %2219 = vmatprep.mubr.f32.mxu1 %v5910_v61 }
 0x130   : > { %v5334_v49 = vadd.f32 %v5224_v53, %v1207_v60  ;;  %3501 = vmatmul.mubr.msk.f32.gmra.mrb[112].mxu0 %vm920_vm2, %v5898_v22  ;;  %v1209_v31 = vpop.f32.mrb[7].mxu0  ;;  %v3790_v53 = vld [vmem:[%s5742_s5] ss:$0 sm:$0xff] }
 0x131   : > { %v5338_v46 = vpop.f32.mrb[22].mxu1  ;;  %3503 = vmatprep.mubr.f32.mxu0 %v5899_v57  ;;  %v614_v3 = vadd.f32 %v3790_v53, %v571_v11  ;;  %v615_v22 = vadd.f32 %v3790_v53, %v572_v18  ;;  %v5914_v53 = vld [vmem:[#allocation45_spill] sm:$0xff] }
 0x132   : > { %v5341_v28 = vpop.f32.mrb[23].mxu1  ;;  %3101 = vmatmul.mubr.msk.f32.gmra.mrb[128].mxu1 %vm4429_vm11, %v4909_v30 }
 0x133   : > { %v1212_v1 = vpop.f32.mrb[8].mxu0  ;;  %2224 = vmatprep.mubr.f32.mxu1 %v4390_v17  ;;  %v688_v21 = vmul.f32 %v5912_v24, %v614_v3  ;;  %vm651_vm7 = vcmp.ge.f32.partialorder %v614_v3, 0.0  ;;  %vm652_vm9 = vcmp.ge.f32.partialorder %v615_v22, 0.0 }
 0x134   : > { %v5351_v41 = vadd.f32 %v5236_v36, %v1212_v1  ;;  %v1214_v50 = vpop.f32.mrb[9].mxu0  ;;  %3504 = vmatmul.mubr.msk.f32.gmra.mrb[114].mxu0 %vm920_vm2, %v5900_v26  ;;  %v689_v36 = vmul.f32 %v5912_v24, %v615_v22 }
 0x135   : > { %v5355_v57 = vpop.f32.mrb[24].mxu1  ;;  %3506 = vmatprep.mubr.f32.mxu0 %v5901_v12 }
 0x136   : > { %v5358_v30 = vpop.f32.mrb[25].mxu1  ;;  %2225 = vmatmul.mubr.f32.gmra.mrb[130].mxu1 %v4935_v48  ;;  %v725_v60 = vsel %vm652_vm9, %v615_v22, %v689_v36  ;;  %v5918_v36 = vld [vmem:[#allocation32_spill] sm:$0xff] }
 0x137   : > { %v1217_v17 = vpop.f32.mrb[10].mxu0  ;;  %2229 = vmatprep.mubr.f32.mxu1 %v5911_v42  ;;  %v5391_v11 = vmul.f32 0.0, %v725_v60  ;;  %v5916_v42 = vld [vmem:[#allocation44_spill] sm:$0xff]  ;;  %v5919_v60 = vld [vmem:[#allocation35_spill] sm:$0xff] }
 0x138   : > { %v5365_v44 = vadd.f32 %v5233_v62, %v1217_v17  ;;  %v1219_v20 = vpop.f32.mrb[11].mxu0  ;;  %3507 = vmatmul.mubr.msk.f32.gmra.mrb[116].mxu0 %vm920_vm2, %v5902_v47  ;;  %v724_v62 = vsel %vm651_vm7, %v614_v3, %v688_v21  ;;  %v5917_v21 = vld [vmem:[#allocation47_spill] sm:$0xff] }
 0x139   : > { %v5369_v26 = vpop.f32.mrb[26].mxu1  ;;  %3509 = vmatprep.mubr.f32.mxu0 %v5903_v4 }
 0x13a   : > { %v5372_v48 = vpop.f32.mrb[27].mxu1  ;;  %3103 = vmatmul.mubr.msk.f32.gmra.mrb[132].mxu1 %vm4429_vm11, %v4943_v56  ;;  %v5389_v56 = vmul.f32 0.0, %v724_v62 }
 0x13b   : > { %v1222_v12 = vpop.f32.mrb[12].mxu0  ;;  %2234 = vmatprep.mubr.f32.mxu1 %v5913_v34 }
 0x13c   : > { %v5379_v61 = vadd.f32 %v5245_v37, %v1222_v12  ;;  %v1224_v47 = vpop.f32.mrb[13].mxu0  ;;  %3510 = vmatmul.mubr.msk.f32.gmra.mrb[118].mxu0 %vm920_vm2, %v5904_v43 }
 0x13d   : > { %v5383_v23 = vpop.f32.mrb[28].mxu1  ;;  %3512 = vmatprep.mubr.f32.mxu0 %v5905_v19 }
 0x13e   : > { %v5386_v4 = vpop.f32.mrb[29].mxu1  ;;  %2235 = vmatmul.mubr.f32.gmra.mrb[134].mxu1 %v4969_v15  ;;  %v972_v15 = vrot.slane %v5389_v56, 1 }
 0x13f   : > { %v1227_v18 = vpop.f32.mrb[14].mxu0  ;;  %2239 = vmatprep.mubr.f32.mxu1 %v4448_v58  ;;  %v973_v58 = vrot.slane %v5391_v11, 1 }
 0x140   : > { %v5395_v37 = vadd.f32 %v5242_v27, %v1227_v18  ;;  %v1229_v31 = vpop.f32.mrb[15].mxu0  ;;  %3513 = vmatmul.mubr.msk.f32.gmra.mrb[120].mxu0 %vm920_vm2, %v4589_v13 }
 0x141   : > { %v5399_v43 = vpop.f32.mrb[30].mxu1  ;;  %3515 = vmatprep.mubr.f32.mxu0 %v4661_v52  ;;  %v974_v22 = vsel %vm920_vm2, %v972_v15, %v973_v58 }
 0x142   : > { %v5402_v19 = vpop.f32.mrb[31].mxu1  ;;  %3105 = vmatmul.mubr.msk.f32.gmra.mrb[136].mxu1 %vm4429_vm11, %v4977_v0 }
 0x143   : > { %v1232_v27 = vpop.f32.mrb[16].mxu0  ;;  %2244 = vmatprep.mubr.f32.mxu1 %v4451_v59  ;;  %v5915_v59 = vld [vmem:[#allocation31_spill] sm:$0xff] }
 0x144   : > { %v5411_v1 = vadd.f32 %v5256_v38, %v1232_v27  ;;  %v1234_v13 = vpop.f32.mrb[17].mxu0  ;;  %3516 = vmatmul.mubr.msk.f32.gmra.mrb[122].mxu0 %vm920_vm2, %v5906_v5 }
 0x145   : > { %v1642_v52 = vpop.f32.mrb[32].mxu1  ;;  %3518 = vmatprep.mubr.f32.mxu0 %v5914_v53  ;;  %v5921_v53 = vld [vmem:[#allocation48_spill] sm:$0xff] }
 0x146   : > { %v5417_v3 = vadd.f32 %v1642_v52, %v5291_v51  ;;  %v1644_v0 = vpop.f32.mrb[33].mxu1  ;;  %2245 = vmatmul.mubr.f32.gmra.mrb[138].mxu1 %v5003_v25 }
 0x147   : > { %v1237_v50 = vpop.f32.mrb[18].mxu0  ;;  %2249 = vmatprep.mubr.f32.mxu1 %v5915_v59  ;;  %v5922_v0 = vld [vmem:[#allocation38_spill] sm:$0xff] }
 0x148   : > { %v5423_v38 = vadd.f32 %v5253_v35, %v1237_v50  ;;  %v1239_v17 = vpop.f32.mrb[19].mxu0  ;;  %3519 = vmatmul.mubr.msk.f32.gmra.mrb[124].mxu0 %vm920_vm2, %v5916_v42  ;;  %v5924_v42 = vld [vmem:[#allocation39_spill] sm:$0xff] }
 0x149   : > { %v1647_v5 = vpop.f32.mrb[34].mxu1  ;;  %3521 = vmatprep.mubr.f32.mxu0 %v974_v22  ;;  %v5923_v17 = vld [vmem:[#allocation49_spill] sm:$0xff] }
 0x14a   : > { %v5428_v51 = vadd.f32 %v1647_v5, %v5303_v29  ;;  %v1649_v24 = vpop.f32.mrb[35].mxu1  ;;  %3107 = vmatmul.mubr.msk.f32.gmra.mrb[140].mxu1 %vm4429_vm11, %v5917_v21 }
 0x14b   : > { %v1242_v25 = vpop.f32.mrb[20].mxu0  ;;  %2254 = vmatprep.mubr.f32.mxu1 %v5918_v36  ;;  %v5925_v36 = vld [vmem:[#allocation50_spill] sm:$0xff] }
 0x14c   : > { %v5435_v35 = vadd.f32 %v5265_v16, %v1242_v25  ;;  %v1244_v20 = vpop.f32.mrb[21].mxu0  ;;  %3522 = vmatmul.mubr.msk.f32.gmra.mrb[126].mxu0 %vm920_vm2, %v973_v58  ;;  %v5920_v58 = vld [vmem:[#allocation36_spill] sm:$0xff] }
 0x14d   : > { %v1652_v12 = vpop.f32.mrb[36].mxu1  ;;  %v5926_v20 = vld [vmem:[#allocation42_spill] sm:$0xff] }
 0x14e   : > { %v5439_v34 = vadd.f32 %v1652_v12, %v5319_v10  ;;  %v1654_v29 = vpop.f32.mrb[37].mxu1  ;;  %2255 = vmatmul.mubr.f32.gmra.mrb[142].mxu1 %v5024_v39 }
 0x14f   : > { %v1247_v62 = vpop.f32.mrb[22].mxu0  ;;  %2259 = vmatprep.mubr.f32.mxu1 %v5919_v60 }
 0x150   : > { %v5444_v47 = vadd.f32 %v5262_v6, %v1247_v62  ;;  %v1249_v18 = vpop.f32.mrb[23].mxu0 }
 0x151   : > { %v1657_v31 = vpop.f32.mrb[38].mxu1  ;;  %v5927_v18 = vld [vmem:[#allocation51_spill] sm:$0xff] }
 0x152   : > { %v5447_v16 = vadd.f32 %v1657_v31, %v5334_v49  ;;  %v1659_v15 = vpop.f32.mrb[39].mxu1  ;;  %3109 = vmatmul.mubr.msk.f32.gmra.mrb[144].mxu1 %vm4429_vm11, %v5032_v45  ;;  %v5928_v31 = vld [vmem:[#allocation43_spill] sm:$0xff] }
 0x153   : > { %v1252_v10 = vpop.f32.mrb[24].mxu0  ;;  %2264 = vmatprep.mubr.f32.mxu1 %v5920_v58 }
 0x154   : > { %v5454_v39 = vadd.f32 %v5276_v63, %v1252_v10  ;;  %v1254_v27 = vpop.f32.mrb[25].mxu0 }
 0x155   : > { %v1662_v13 = vpop.f32.mrb[40].mxu1 }
 0x156   : > { %v5457_v6 = vadd.f32 %v1662_v13, %v5351_v41  ;;  %v1664_v52 = vpop.f32.mrb[41].mxu1  ;;  %2265 = vmatmul.mubr.f32.gmra.mrb[146].mxu1 %v5921_v53  ;;  %v5929_v13 = vld [vmem:[#allocation52_spill] sm:$0xff]  ;;  %v864_v53 = vrot.slane %v5391_v11, 7 }
 0x157   : > { %v1257_v49 = vpop.f32.mrb[26].mxu0  ;;  %2269 = vmatprep.mubr.f32.mxu1 %v5922_v0 }
 0x158   : > { %v5462_v22 = vadd.f32 %v5273_v55, %v1257_v49  ;;  %v1259_v45 = vpop.f32.mrb[27].mxu0 }
 0x159   : > { %v1667_v50 = vpop.f32.mrb[42].mxu1 }
 0x15a   : > { %v5465_v59 = vadd.f32 %v1667_v50, %v5365_v44  ;;  %v1669_v63 = vpop.f32.mrb[43].mxu1  ;;  %3111 = vmatmul.mubr.msk.f32.gmra.mrb[148].mxu1 %vm4429_vm11, %v5923_v17 }
 0x15b   : > { %v1262_v41 = vpop.f32.mrb[28].mxu0  ;;  %2274 = vmatprep.mubr.f32.mxu1 %v5924_v42 }
 0x15c   : > { %v5472_v5 = vadd.f32 %v5285_v14, %v1262_v41  ;;  %v1264_v24 = vpop.f32.mrb[29].mxu0 }
 0x15d   : > { %v1672_v21 = vpop.f32.mrb[44].mxu1 }
 0x15e   : > { %v5475_v55 = vadd.f32 %v1672_v21, %v5379_v61  ;;  %v1674_v25 = vpop.f32.mrb[45].mxu1  ;;  %2275 = vmatmul.mubr.f32.gmra.mrb[150].mxu1 %v5925_v36 }
 0x15f   : > { %v1267_v44 = vpop.f32.mrb[30].mxu0  ;;  %2279 = vmatprep.mubr.f32.mxu1 %v5926_v20 }
 0x160   : > { %v1493_v12 = vadd.f32 %v5282_v33, %v1267_v44  ;;  %v1269_v29 = vpop.f32.mrb[31].mxu0 }
 0x161   : > { %v1677_v62 = vpop.f32.mrb[46].mxu1 }
 0x162   : > { %v5481_v60 = vadd.f32 %v1677_v62, %v5395_v37  ;;  %v1679_v14 = vpop.f32.mrb[47].mxu1  ;;  %3113 = vmatmul.mubr.msk.f32.gmra.mrb[152].mxu1 %vm4429_vm11, %v5927_v18  ;;  %v863_v37 = vrot.slane %v5389_v56, 7 }
 0x163   : > { %v1272_v61 = vpop.f32.mrb[32].mxu0  ;;  %2284 = vmatprep.mubr.f32.mxu1 %v5928_v31 }
 0x164   : > { %v1498_v15 = vadd.f32 %v5298_v40, %v1272_v61  ;;  %v1274_v10 = vpop.f32.mrb[33].mxu0  ;;  %v865_v63 = vsel %vm811_vm8, %v863_v37, %v864_v53 }
 0x165   : > { %v1682_v58 = vpop.f32.mrb[48].mxu1 }
 0x166   : > { %v5489_v27 = vadd.f32 %v1682_v58, %v5411_v1  ;;  %v1684_v33 = vpop.f32.mrb[49].mxu1  ;;  %2285 = vmatmul.mubr.f32.gmra.mrb[154].mxu1 %v5929_v13 }
 0x167   : > { %v1277_v52 = vpop.f32.mrb[34].mxu0  ;;  %2289 = vmatprep.mubr.f32.mxu1 %v5389_v56 }
 0x168   : > { %v1503_v49 = vadd.f32 %v5295_v7, %v1277_v52  ;;  %v1279_v0 = vpop.f32.mrb[35].mxu0 }
 0x169   : > { %v1687_v45 = vpop.f32.mrb[50].mxu1 }
 0x16a   : > { %v5497_v40 = vadd.f32 %v1687_v45, %v5423_v38  ;;  %v1689_v50 = vpop.f32.mrb[51].mxu1  ;;  %3115 = vmatmul.mubr.msk.f32.gmra.mrb[156].mxu1 %vm4429_vm11, %v863_v37 }
 0x16b   : > { %v1282_v1 = vpop.f32.mrb[36].mxu0  ;;  %2294 = vmatprep.mubr.f32.mxu1 %v5391_v11 }
 0x16c   : > { %v1508_v56 = vadd.f32 %v5313_v32, %v1282_v1  ;;  %v1284_v17 = vpop.f32.mrb[37].mxu0 }
 0x16d   : > { %v1692_v41 = vpop.f32.mrb[52].mxu1 }
 0x16e   : > { %v5505_v7 = vadd.f32 %v1692_v41, %v5435_v35  ;;  %v1694_v42 = vpop.f32.mrb[53].mxu1  ;;  %2295 = vmatmul.mubr.f32.gmra.mrb[158].mxu1 %v865_v63 }
 0x16f   : > { %v1287_v38 = vpop.f32.mrb[38].mxu0 }
 0x170   : > { %v1513_v24 = vadd.f32 %v5307_v9, %v1287_v38  ;;  %v1289_v21 = vpop.f32.mrb[39].mxu0 }
 0x171   : > { %v1697_v54 = vpop.f32.mrb[54].mxu1 }
 0x172   : > { %v5509_v25 = vadd.f32 %v1697_v54, %v5444_v47  ;;  %v1699_v11 = vpop.f32.mrb[55].mxu1 }
 0x173   : > { %v1292_v36 = vpop.f32.mrb[40].mxu0 }
 0x174   : > { %v1518_v44 = vadd.f32 %v5326_v2, %v1292_v36  ;;  %v1294_v32 = vpop.f32.mrb[41].mxu0 }
 0x175   : > { %v1702_v20 = vpop.f32.mrb[56].mxu1 }
 0x176   : > { %v5513_v29 = vadd.f32 %v1702_v20, %v5454_v39  ;;  %v1704_v35 = vpop.f32.mrb[57].mxu1 }
 0x177   : > { %v1297_v62 = vpop.f32.mrb[42].mxu0 }
 0x178   : > { %v1523_v14 = vadd.f32 %v5323_v8, %v1297_v62  ;;  %v1299_v18 = vpop.f32.mrb[43].mxu0 }
 0x179   : > { %v1707_v9 = vpop.f32.mrb[58].mxu1 }
 0x17a   : > { %v5517_v61 = vadd.f32 %v1707_v9, %v5462_v22  ;;  %v1709_v47 = vpop.f32.mrb[59].mxu1 }
 0x17b   : > { %v1302_v31 = vpop.f32.mrb[44].mxu0 }
 0x17c   : > { %v1528_v10 = vadd.f32 %v5341_v28, %v1302_v31  ;;  %v1304_v58 = vpop.f32.mrb[45].mxu0 }
 0x17d   : > { %v1712_v2 = vpop.f32.mrb[60].mxu1 }
 0x17e   : > { %v5521_v33 = vadd.f32 %v1712_v2, %v5472_v5  ;;  %v1714_v39 = vpop.f32.mrb[61].mxu1 }
 0x17f   : > { %v1307_v13 = vpop.f32.mrb[46].mxu0 }
 0x180   : > { %v1533_v37 = vadd.f32 %v5338_v46, %v1307_v13  ;;  %v1309_v52 = vpop.f32.mrb[47].mxu0 }
 0x181   : > { %v1717_v8 = vpop.f32.mrb[62].mxu1 }
 0x182   : > { %v5524_v53 = vadd.f32 %v1717_v8, %v1493_v12  ;;  %v1719_v0 = vpop.f32.mrb[63].mxu1 }
 0x183   : > { %v1312_v22 = vpop.f32.mrb[48].mxu0 }
 0x184   : > { %v1538_v45 = vadd.f32 %v5358_v30, %v1312_v22  ;;  %v1314_v50 = vpop.f32.mrb[49].mxu0 }
 0x185   : > { %v1722_v1 = vpop.f32.mrb[64].mxu1 }
 0x186   : > { %v5527_v28 = vadd.f32 %v1722_v1, %v1498_v15  ;;  %v1724_v63 = vpop.f32.mrb[65].mxu1 }
 0x187   : > { %v1317_v17 = vpop.f32.mrb[50].mxu0 }
 0x188   : > { %v1543_v5 = vadd.f32 %v5355_v57, %v1317_v17  ;;  %v1319_v41 = vpop.f32.mrb[51].mxu0 }
 0x189   : > { %v1727_v42 = vpop.f32.mrb[66].mxu1 }
 0x18a   : > { %v5530_v38 = vadd.f32 %v1727_v42, %v1503_v49  ;;  %v1729_v46 = vpop.f32.mrb[67].mxu1 }
 0x18b   : > { %v1322_v21 = vpop.f32.mrb[52].mxu0 }
 0x18c   : > { %v1548_v12 = vadd.f32 %v5372_v48, %v1322_v21  ;;  %v1324_v54 = vpop.f32.mrb[53].mxu0 }
 0x18d   : > { %v1732_v11 = vpop.f32.mrb[68].mxu1 }
 0x18e   : > { %v5533_v36 = vadd.f32 %v1732_v11, %v1508_v56  ;;  %v1734_v30 = vpop.f32.mrb[69].mxu1 }
 0x18f   : > { %v1327_v32 = vpop.f32.mrb[54].mxu0 }
 0x190   : > { %v1553_v15 = vadd.f32 %v5369_v26, %v1327_v32  ;;  %v1329_v20 = vpop.f32.mrb[55].mxu0 }
 0x191   : > { %v1737_v35 = vpop.f32.mrb[70].mxu1 }
 0x192   : > { %v5536_v62 = vadd.f32 %v1737_v35, %v1513_v24  ;;  %v1739_v57 = vpop.f32.mrb[71].mxu1 }
 0x193   : > { %v1332_v18 = vpop.f32.mrb[56].mxu0 }
 0x194   : > { %v1558_v49 = vadd.f32 %v5386_v4, %v1332_v18  ;;  %v1334_v9 = vpop.f32.mrb[57].mxu0 }
 0x195   : > { %v1742_v47 = vpop.f32.mrb[72].mxu1 }
 0x196   : > { %v5539_v31 = vadd.f32 %v1742_v47, %v1518_v44  ;;  %v1744_v48 = vpop.f32.mrb[73].mxu1 }
 0x197   : > { %v1337_v58 = vpop.f32.mrb[58].mxu0 }
 0x198   : > { %v1563_v56 = vadd.f32 %v5383_v23, %v1337_v58  ;;  %v1339_v2 = vpop.f32.mrb[59].mxu0 }
 0x199   : > { %v1747_v39 = vpop.f32.mrb[74].mxu1 }
 0x19a   : > { %v5542_v13 = vadd.f32 %v1747_v39, %v1523_v14  ;;  %v1749_v26 = vpop.f32.mrb[75].mxu1 }
 0x19b   : > { %v1342_v52 = vpop.f32.mrb[60].mxu0 }
 0x19c   : > { %v1568_v24 = vadd.f32 %v5402_v19, %v1342_v52  ;;  %v1344_v8 = vpop.f32.mrb[61].mxu0 }
 0x19d   : > { %v1752_v0 = vpop.f32.mrb[76].mxu1 }
 0x19e   : > { %v5545_v22 = vadd.f32 %v1752_v0, %v1528_v10  ;;  %v1754_v4 = vpop.f32.mrb[77].mxu1 }
 0x19f   : > { %v1347_v50 = vpop.f32.mrb[62].mxu0 }
 0x1a0   : > { %v1573_v44 = vadd.f32 %v5399_v43, %v1347_v50  ;;  %v1349_v1 = vpop.f32.mrb[63].mxu0 }
 0x1a1   : > { %v1757_v63 = vpop.f32.mrb[78].mxu1 }
 0x1a2   : > { %v5548_v17 = vadd.f32 %v1757_v63, %v1533_v37  ;;  %v1759_v23 = vpop.f32.mrb[79].mxu1 }
 0x1a3   : > { %v3398_v41 = vpop.f32.mrb[64].mxu0 }
 0x1a4   : > { %v5551_v14 = vadd.f32 %v3398_v41, %v5428_v51  ;;  %v1867_v42 = vpop.f32.mrb[65].mxu0 }
 0x1a5   : > { %v1762_v46 = vpop.f32.mrb[80].mxu1  ;;  %v5554_v19 = vadd.f32 %v1867_v42, %v5417_v3 }
 0x1a6   : > { %v5556_v10 = vadd.f32 %v1762_v46, %v1538_v45  ;;  %v1764_v21 = vpop.f32.mrb[81].mxu1 }
 0x1a7   : > { %v3401_v54 = vpop.f32.mrb[66].mxu0 }
 0x1a8   : > { %v5559_v43 = vadd.f32 %v3401_v54, %v5447_v16  ;;  %v1877_v11 = vpop.f32.mrb[67].mxu0 }
 0x1a9   : > { %v1767_v37 = vpop.f32.mrb[82].mxu1  ;;  %v5562_v30 = vadd.f32 %v1877_v11, %v5439_v34 }
 0x1aa   : > { %v5564_v32 = vadd.f32 %v1767_v37, %v1543_v5  ;;  %v1769_v51 = vpop.f32.mrb[83].mxu1 }
 0x1ab   : > { %v3404_v20 = vpop.f32.mrb[68].mxu0 }
 0x1ac   : > { %v5567_v35 = vadd.f32 %v3404_v20, %v5465_v59  ;;  %v1887_v3 = vpop.f32.mrb[69].mxu0 }
 0x1ad   : > { %v1772_v45 = vpop.f32.mrb[84].mxu1  ;;  %v5570_v57 = vadd.f32 %v1887_v3, %v5457_v6 }
 0x1ae   : > { %v5572_v18 = vadd.f32 %v1772_v45, %v1548_v12  ;;  %v1774_v16 = vpop.f32.mrb[85].mxu1 }
 0x1af   : > { %v3407_v9 = vpop.f32.mrb[70].mxu0 }
 0x1b0   : > { %v5575_v47 = vadd.f32 %v3407_v9, %v5481_v60  ;;  %v1897_v34 = vpop.f32.mrb[71].mxu0 }
 0x1b1   : > { %v1777_v5 = vpop.f32.mrb[86].mxu1  ;;  %v5578_v48 = vadd.f32 %v1897_v34, %v5475_v55 }
 0x1b2   : > { %v1778_v58 = vadd.f32 %v1777_v5, %v1553_v15  ;;  %v1779_v59 = vpop.f32.mrb[87].mxu1 }
 0x1b3   : > { %v3410_v2 = vpop.f32.mrb[72].mxu0 }
 0x1b4   : > { %v5581_v39 = vadd.f32 %v3410_v2, %v5497_v40  ;;  %v1907_v6 = vpop.f32.mrb[73].mxu0 }
 0x1b5   : > { %v1782_v26 = vpop.f32.mrb[88].mxu1  ;;  %v5584_v12 = vadd.f32 %v1907_v6, %v5489_v27 }
 0x1b6   : > { %v1783_v52 = vadd.f32 %v1782_v26, %v1558_v49  ;;  %v1784_v8 = vpop.f32.mrb[89].mxu1 }
 0x1b7   : > { %v3413_v60 = vpop.f32.mrb[74].mxu0 }
 0x1b8   : > { %v5587_v0 = vadd.f32 %v3413_v60, %v5509_v25  ;;  %v1917_v4 = vpop.f32.mrb[75].mxu0 }
 0x1b9   : > { %v1787_v55 = vpop.f32.mrb[90].mxu1  ;;  %v5590_v15 = vadd.f32 %v1917_v4, %v5505_v7 }
 0x1ba   : > { %v1788_v50 = vadd.f32 %v1787_v55, %v1563_v56  ;;  %v1789_v1 = vpop.f32.mrb[91].mxu1 }
 0x1bb   : > { %v3416_v40 = vpop.f32.mrb[76].mxu0 }
 0x1bc   : > { %v5593_v63 = vadd.f32 %v3416_v40, %v5517_v61  ;;  %v1927_v23 = vpop.f32.mrb[77].mxu0 }
 0x1bd   : > { %v1792_v27 = vpop.f32.mrb[92].mxu1  ;;  %v5596_v49 = vadd.f32 %v1927_v23, %v5513_v29 }
 0x1be   : > { %v1793_v41 = vadd.f32 %v1792_v27, %v1568_v24  ;;  %v1794_v42 = vpop.f32.mrb[93].mxu1 }
 0x1bf   : > { %v3419_v25 = vpop.f32.mrb[78].mxu0 }
 0x1c0   : > { %v5599_v46 = vadd.f32 %v3419_v25, %v5524_v53  ;;  %v1937_v21 = vpop.f32.mrb[79].mxu0 }
 0x1c1   : > { %v1797_v7 = vpop.f32.mrb[94].mxu1  ;;  %v5602_v56 = vadd.f32 %v1937_v21, %v5521_v33 }
 0x1c2   : > { %v1798_v54 = vadd.f32 %v1797_v7, %v1573_v44  ;;  %v1799_v11 = vpop.f32.mrb[95].mxu1 }
 0x1c3   : > { %v3422_v61 = vpop.f32.mrb[80].mxu0 }
 0x1c4   : > { %v5605_v37 = vadd.f32 %v3422_v61, %v5530_v38  ;;  %v1947_v51 = vpop.f32.mrb[81].mxu0 }
 0x1c5   : > { %v5608_v29 = vadd.f32 %v1947_v51, %v5527_v28  ;;  %v2141_v24 = vpop.f32.mrb[96].mxu1 }
 0x1c6   : > { %v2143_v20 = vpop.f32.mrb[97].mxu1 }
 0x1c7   : > { %v3425_v3 = vpop.f32.mrb[82].mxu0 }
 0x1c8   : > { %v5611_v53 = vadd.f32 %v3425_v3, %v5536_v62  ;;  %v1957_v45 = vpop.f32.mrb[83].mxu0 }
 0x1c9   : > { %v5614_v33 = vadd.f32 %v1957_v45, %v5533_v36  ;;  %v2146_v44 = vpop.f32.mrb[98].mxu1 }
 0x1ca   : > { %v2148_v16 = vpop.f32.mrb[99].mxu1 }
 0x1cb   : > { %v3428_v9 = vpop.f32.mrb[84].mxu0 }
 0x1cc   : > { %v5617_v38 = vadd.f32 %v3428_v9, %v5542_v13  ;;  %v1967_v34 = vpop.f32.mrb[85].mxu0 }
 0x1cd   : > { %v5620_v28 = vadd.f32 %v1967_v34, %v5539_v31  ;;  %v2151_v5 = vpop.f32.mrb[100].mxu1 }
 0x1ce   : > { %v2153_v59 = vpop.f32.mrb[101].mxu1 }
 0x1cf   : > { %v3431_v2 = vpop.f32.mrb[86].mxu0 }
 0x1d0   : > { %v5623_v62 = vadd.f32 %v3431_v2, %v5548_v17  ;;  %v1977_v6 = vpop.f32.mrb[87].mxu0 }
 0x1d1   : > { %v5626_v36 = vadd.f32 %v1977_v6, %v5545_v22  ;;  %v2156_v26 = vpop.f32.mrb[102].mxu1 }
 0x1d2   : > { %v2158_v8 = vpop.f32.mrb[103].mxu1 }
 0x1d3   : > { %v3434_v60 = vpop.f32.mrb[88].mxu0 }
 0x1d4   : > { %v5629_v13 = vadd.f32 %v3434_v60, %v5564_v32  ;;  %v1987_v4 = vpop.f32.mrb[89].mxu0 }
 0x1d5   : > { %v5632_v31 = vadd.f32 %v1987_v4, %v5556_v10  ;;  %v2161_v55 = vpop.f32.mrb[104].mxu1 }
 0x1d6   : > { %v2163_v1 = vpop.f32.mrb[105].mxu1 }
 0x1d7   : > { %v3437_v40 = vpop.f32.mrb[90].mxu0 }
 0x1d8   : > { %v5634_v23 = vadd.f32 %v3437_v40, %v1778_v58  ;;  %v1997_v17 = vpop.f32.mrb[91].mxu0 }
 0x1d9   : > { %v5637_v27 = vadd.f32 %v1997_v17, %v5572_v18  ;;  %v2166_v22 = vpop.f32.mrb[106].mxu1 }
 0x1da   : > { %v2168_v42 = vpop.f32.mrb[107].mxu1 }
 0x1db   : > { %v3440_v25 = vpop.f32.mrb[92].mxu0 }
 0x1dc   : > { %v5639_v21 = vadd.f32 %v3440_v25, %v1788_v50  ;;  %v2007_v32 = vpop.f32.mrb[93].mxu0 }
 0x1dd   : > { %v5641_v7 = vadd.f32 %v2007_v32, %v1783_v52  ;;  %v2171_v10 = vpop.f32.mrb[108].mxu1 }
 0x1de   : > { %v2173_v11 = vpop.f32.mrb[109].mxu1 }
 0x1df   : > { %v3443_v61 = vpop.f32.mrb[94].mxu0 }
 0x1e0   : > { %v5643_v51 = vadd.f32 %v3443_v61, %v1798_v54  ;;  %v2017_v58 = vpop.f32.mrb[95].mxu0 }
 0x1e1   : > { %v5645_v20 = vadd.f32 %v2017_v58, %v1793_v41  ;;  %v2176_v3 = vpop.f32.mrb[110].mxu1 }
 0x1e2   : > { %v2178_v18 = vpop.f32.mrb[111].mxu1 }
 0x1e3   : > { %v3478_v45 = vpop.f32.mrb[96].mxu0 }
 0x1e4   : > { %v2372_v16 = vadd.f32 %v3478_v45, %v2146_v44  ;;  %v2366_v9 = vpop.f32.mrb[97].mxu0 }
 0x1e5   : > { %v2181_v52 = vpop.f32.mrb[112].mxu1  ;;  %v2367_v50 = vadd.f32 %v2366_v9, %v2141_v24 }
 0x1e6   : > { %v2526_v54 = vadd.f32 %v2372_v16, %v5551_v14  ;;  %v2183_v34 = vpop.f32.mrb[113].mxu1 }
 0x1e7   : > { %v2525_v41 = vadd.f32 %v2367_v50, %v5554_v19  ;;  %v3481_v59 = vpop.f32.mrb[98].mxu0 }
 0x1e8   : > { %2558 = vst [vmem:[%s5651_s20 + $0x8] sm:$0xff] %v2526_v54  ;;  %v2627_v2 = vmul.f32 %v2526_v54, %v2526_v54  ;;  %v2382_v44 = vadd.f32 %v3481_v59, %v2156_v26  ;;  %v2376_v6 = vpop.f32.mrb[99].mxu0 }
 0x1e9   : > { %2557 = vst [vmem:[%s5651_s20] sm:$0xff] %v2525_v41  ;;  %v2589_v8 = vadd.f32 %v2526_v54, %v2525_v41  ;;  %v2626_v60 = vmul.f32 %v2525_v41, %v2525_v41  ;;  %v2186_v4 = vpop.f32.mrb[114].mxu1  ;;  %v2377_v1 = vadd.f32 %v2376_v6, %v2151_v5 }
 0x1ea   : > { %v2528_v40 = vadd.f32 %v2382_v44, %v5559_v43  ;;  %v2188_v24 = vpop.f32.mrb[115].mxu1 }
 0x1eb   : > { %v2658_v17 = vadd.f32 %v2627_v2, %v2626_v60  ;;  %v2527_v14 = vadd.f32 %v2377_v1, %v5562_v30  ;;  %v3484_v42 = vpop.f32.mrb[100].mxu0 }
 0x1ec   : > { %2560 = vst [vmem:[%s5651_s20 + $0x18] sm:$0xff] %v2528_v40  ;;  %v2392_v19 = vadd.f32 %v3484_v42, %v2166_v22  ;;  %v2386_v25 = vpop.f32.mrb[101].mxu0  ;;  %v2629_v18 = vmul.f32 %v2528_v40, %v2528_v40 }
 0x1ed   : > { %2559 = vst [vmem:[%s5651_s20 + $0x10] sm:$0xff] %v2527_v14  ;;  %v2590_v26 = vadd.f32 %v2589_v8, %v2527_v14  ;;  %v2628_v32 = vmul.f32 %v2527_v14, %v2527_v14  ;;  %v2191_v11 = vpop.f32.mrb[116].mxu1  ;;  %v2387_v61 = vadd.f32 %v2386_v25, %v2161_v55 }
 0x1ee   : > { %v2530_v58 = vadd.f32 %v2392_v19, %v5567_v35  ;;  %v2193_v5 = vpop.f32.mrb[117].mxu1 }
 0x1ef   : > { %v2659_v43 = vadd.f32 %v2658_v17, %v2628_v32  ;;  %v2529_v45 = vadd.f32 %v2387_v61, %v5570_v57  ;;  %v2591_v16 = vadd.f32 %v2590_v26, %v2528_v40  ;;  %v3487_v30 = vpop.f32.mrb[102].mxu0 }
 0x1f0   : > { %2562 = vst [vmem:[%s5651_s20 + $0x28] sm:$0xff] %v2530_v58  ;;  %v2402_v9 = vadd.f32 %v3487_v30, %v2176_v3  ;;  %v2396_v22 = vpop.f32.mrb[103].mxu0  ;;  %v2631_v2 = vmul.f32 %v2530_v58, %v2530_v58 }
 0x1f1   : > { %2561 = vst [vmem:[%s5651_s20 + $0x20] sm:$0xff] %v2529_v45  ;;  %v2592_v50 = vadd.f32 %v2591_v16, %v2529_v45  ;;  %v2630_v54 = vmul.f32 %v2529_v45, %v2529_v45  ;;  %v2660_v34 = vadd.f32 %v2659_v43, %v2629_v18  ;;  %v2196_v41 = vpop.f32.mrb[118].mxu1  ;;  %v2397_v55 = vadd.f32 %v2396_v22, %v2171_v10 }
 0x1f2   : > { %v2532_v35 = vadd.f32 %v2402_v9, %v5575_v47  ;;  %v2198_v59 = vpop.f32.mrb[119].mxu1 }
 0x1f3   : > { %v2661_v44 = vadd.f32 %v2660_v34, %v2630_v54  ;;  %v2531_v57 = vadd.f32 %v2397_v55, %v5578_v48  ;;  %v2593_v6 = vadd.f32 %v2592_v50, %v2530_v58  ;;  %v3490_v8 = vpop.f32.mrb[104].mxu0 }
 0x1f4   : > { %2564 = vst [vmem:[%s5651_s20 + $0x38] sm:$0xff] %v2532_v35  ;;  %v2412_v3 = vadd.f32 %v3490_v8, %v2186_v4  ;;  %v2406_v60 = vpop.f32.mrb[105].mxu0  ;;  %v2633_v42 = vmul.f32 %v2532_v35, %v2532_v35 }
 0x1f5   : > { %2563 = vst [vmem:[%s5651_s20 + $0x30] sm:$0xff] %v2531_v57  ;;  %v2594_v1 = vadd.f32 %v2593_v6, %v2531_v57  ;;  %v2632_v40 = vmul.f32 %v2531_v57, %v2531_v57  ;;  %v2662_v24 = vadd.f32 %v2661_v44, %v2631_v2  ;;  %v2201_v17 = vpop.f32.mrb[120].mxu1  ;;  %v2407_v10 = vadd.f32 %v2406_v60, %v2181_v52 }
 0x1f6   : > { %v2534_v47 = vadd.f32 %v2412_v3, %v5581_v39  ;;  %v2203_v14 = vpop.f32.mrb[121].mxu1 }
 0x1f7   : > { %v2663_v19 = vadd.f32 %v2662_v24, %v2632_v40  ;;  %v2533_v48 = vadd.f32 %v2407_v10, %v5584_v12  ;;  %v2595_v25 = vadd.f32 %v2594_v1, %v2532_v35  ;;  %v3493_v26 = vpop.f32.mrb[106].mxu0 }
 0x1f8   : > { %2566 = vst [vmem:[%s5651_s20 + $0x48] sm:$0xff] %v2534_v47  ;;  %v2422_v4 = vadd.f32 %v3493_v26, %v2196_v41  ;;  %v2416_v32 = vpop.f32.mrb[107].mxu0  ;;  %v2635_v45 = vmul.f32 %v2534_v47, %v2534_v47 }
 0x1f9   : > { %2565 = vst [vmem:[%s5651_s20 + $0x40] sm:$0xff] %v2533_v48  ;;  %v2596_v61 = vadd.f32 %v2595_v25, %v2533_v48  ;;  %v2634_v58 = vmul.f32 %v2533_v48, %v2533_v48  ;;  %v2664_v5 = vadd.f32 %v2663_v19, %v2633_v42  ;;  %v2206_v18 = vpop.f32.mrb[122].mxu1  ;;  %v2417_v52 = vadd.f32 %v2416_v32, %v2191_v11 }
 0x1fa   : > { %v2536_v39 = vadd.f32 %v2422_v4, %v5587_v0  ;;  %v2208_v43 = vpop.f32.mrb[123].mxu1 }
 0x1fb   : > { %v2665_v16 = vadd.f32 %v2664_v5, %v2634_v58  ;;  %v2535_v12 = vadd.f32 %v2417_v52, %v5590_v15  ;;  %v2597_v30 = vadd.f32 %v2596_v61, %v2534_v47  ;;  %v3496_v9 = vpop.f32.mrb[108].mxu0 }
 0x1fc   : > { %2568 = vst [vmem:[%s5651_s20 + $0x58] sm:$0xff] %v2536_v39  ;;  %v2432_v22 = vadd.f32 %v3496_v9, %v2206_v18  ;;  %v2426_v50 = vpop.f32.mrb[109].mxu0  ;;  %v2637_v59 = vmul.f32 %v2536_v39, %v2536_v39 }
 0x1fd   : > { %2567 = vst [vmem:[%s5651_s20 + $0x50] sm:$0xff] %v2535_v12  ;;  %v2598_v54 = vadd.f32 %v2597_v30, %v2535_v12  ;;  %v2636_v34 = vmul.f32 %v2535_v12, %v2535_v12  ;;  %v2666_v41 = vadd.f32 %v2665_v16, %v2635_v45  ;;  %v2211_v55 = vpop.f32.mrb[124].mxu1  ;;  %v2427_v11 = vadd.f32 %v2426_v50, %v2201_v17 }
 0x1fe   : > { %v2538_v0 = vadd.f32 %v2432_v22, %v5593_v63  ;;  %v2213_v35 = vpop.f32.mrb[125].mxu1 }
 0x1ff   : > { %v2667_v2 = vadd.f32 %v2666_v41, %v2636_v34  ;;  %v2537_v15 = vadd.f32 %v2427_v11, %v5596_v49  ;;  %v2599_v44 = vadd.f32 %v2598_v54, %v2536_v39  ;;  %v3499_v57 = vpop.f32.mrb[110].mxu0 }
 0x200   : > { %2570 = vst [vmem:[%s5651_s20 + $0x68] sm:$0xff] %v2538_v0  ;;  %v2436_v6 = vpop.f32.mrb[111].mxu0  ;;  %v2639_v63 = vmul.f32 %v2538_v0, %v2538_v0 }
 0x201   : > { %2569 = vst [vmem:[%s5651_s20 + $0x60] sm:$0xff] %v2537_v15  ;;  %v2600_v8 = vadd.f32 %v2599_v44, %v2537_v15  ;;  %v2638_v3 = vmul.f32 %v2537_v15, %v2537_v15  ;;  %v2668_v60 = vadd.f32 %v2667_v2, %v2637_v59  ;;  %v2216_v1 = vpop.f32.mrb[126].mxu1  ;;  %v2437_v40 = vadd.f32 %v2436_v6, %v2211_v55 }
 0x202   : > { %v2442_v24 = vadd.f32 %v3499_v57, %v2216_v1  ;;  %v2218_v17 = vpop.f32.mrb[127].mxu1 }
 0x203   : > { %v2669_v10 = vadd.f32 %v2668_v60, %v2638_v3  ;;  %v2539_v47 = vadd.f32 %v2437_v40, %v5602_v56  ;;  %v2601_v14 = vadd.f32 %v2600_v8, %v2538_v0  ;;  %v3502_v49 = vpop.f32.mrb[112].mxu0 }
 0x204   : > { %v2540_v42 = vadd.f32 %v2442_v24, %v5599_v46  ;;  %v2446_v19 = vpop.f32.mrb[113].mxu0 }
 0x205   : > { %2571 = vst [vmem:[%s5651_s20 + $0x70] sm:$0xff] %v2539_v47  ;;  %v2602_v48 = vadd.f32 %v2601_v14, %v2539_v47  ;;  %v2640_v25 = vmul.f32 %v2539_v47, %v2539_v47  ;;  %v2670_v26 = vadd.f32 %v2669_v10, %v2639_v63  ;;  %v2221_v4 = vpop.f32.mrb[128].mxu1 }
 0x206   : > { %2572 = vst [vmem:[%s5651_s20 + $0x78] sm:$0xff] %v2540_v42  ;;  %v2447_v32 = vadd.f32 %v2446_v19, %v2221_v4  ;;  %v2223_v61 = vpop.f32.mrb[129].mxu1  ;;  %v2641_v58 = vmul.f32 %v2540_v42, %v2540_v42 }
 0x207   : > { %v2671_v5 = vadd.f32 %v2670_v26, %v2640_v25  ;;  %v2603_v18 = vadd.f32 %v2602_v48, %v2540_v42  ;;  %v3505_v52 = vpop.f32.mrb[114].mxu0 }
 0x208   : > { %v2541_v56 = vadd.f32 %v2447_v32, %v5608_v29  ;;  %v2456_v39 = vpop.f32.mrb[115].mxu0 }
 0x209   : > { %v2672_v43 = vadd.f32 %v2671_v5, %v2641_v58  ;;  %v2226_v46 = vpop.f32.mrb[130].mxu1 }
 0x20a   : > { %2573 = vst [vmem:[%s5651_s20 + $0x80] sm:$0xff] %v2541_v56  ;;  %v2604_v45 = vadd.f32 %v2603_v18, %v2541_v56  ;;  %v2642_v16 = vmul.f32 %v2541_v56, %v2541_v56  ;;  %v2452_v12 = vadd.f32 %v3502_v49, %v2226_v46  ;;  %v2228_v30 = vpop.f32.mrb[131].mxu1 }
 0x20b   : > { %v3508_v9 = vpop.f32.mrb[116].mxu0 }
 0x20c   : > { %v2673_v22 = vadd.f32 %v2672_v43, %v2642_v16  ;;  %v2542_v50 = vadd.f32 %v2452_v12, %v5605_v37  ;;  %v2466_v54 = vpop.f32.mrb[117].mxu0 }
 0x20d   : > { %v2231_v34 = vpop.f32.mrb[132].mxu1 }
 0x20e   : > { %2574 = vst [vmem:[%s5651_s20 + $0x88] sm:$0xff] %v2542_v50  ;;  %v2605_v41 = vadd.f32 %v2604_v45, %v2542_v50  ;;  %v2643_v55 = vmul.f32 %v2542_v50, %v2542_v50  ;;  %v2457_v11 = vadd.f32 %v2456_v39, %v2231_v34  ;;  %v2233_v29 = vpop.f32.mrb[133].mxu1 }
 0x20f   : > { %v3511_v0 = vpop.f32.mrb[118].mxu0 }
 0x210   : > { %v2674_v35 = vadd.f32 %v2673_v22, %v2643_v55  ;;  %v2543_v59 = vadd.f32 %v2457_v11, %v5614_v33  ;;  %v2476_v2 = vpop.f32.mrb[119].mxu0 }
 0x211   : > { %v2236_v15 = vpop.f32.mrb[134].mxu1 }
 0x212   : > { %2575 = vst [vmem:[%s5651_s20 + $0x90] sm:$0xff] %v2543_v59  ;;  %v2606_v44 = vadd.f32 %v2605_v41, %v2543_v59  ;;  %v2644_v57 = vmul.f32 %v2543_v59, %v2543_v59  ;;  %v2462_v6 = vadd.f32 %v3505_v52, %v2236_v15  ;;  %v2238_v8 = vpop.f32.mrb[135].mxu1 }
 0x213   : > { %v3514_v37 = vpop.f32.mrb[120].mxu0 }
 0x214   : > { %v2675_v3 = vadd.f32 %v2674_v35, %v2644_v57  ;;  %v2544_v60 = vadd.f32 %v2462_v6, %v5611_v53  ;;  %v2486_v1 = vpop.f32.mrb[121].mxu0 }
 0x215   : > { %v2241_v40 = vpop.f32.mrb[136].mxu1 }
 0x216   : > { %2576 = vst [vmem:[%s5651_s20 + $0x98] sm:$0xff] %v2544_v60  ;;  %v2607_v24 = vadd.f32 %v2606_v44, %v2544_v60  ;;  %v2645_v17 = vmul.f32 %v2544_v60, %v2544_v60  ;;  %v2467_v63 = vadd.f32 %v2466_v54, %v2241_v40  ;;  %v2243_v10 = vpop.f32.mrb[137].mxu1 }
 0x217   : > { %v3517_v33 = vpop.f32.mrb[122].mxu0 }
 0x218   : > { %v2676_v47 = vadd.f32 %v2675_v3, %v2645_v17  ;;  %v2545_v14 = vadd.f32 %v2467_v63, %v5620_v28  ;;  %v2496_v49 = vpop.f32.mrb[123].mxu0 }
 0x219   : > { %v2246_v42 = vpop.f32.mrb[138].mxu1 }
 0x21a   : > { %2577 = vst [vmem:[%s5651_s20 + $0xa0] sm:$0xff] %v2545_v14  ;;  %v2608_v19 = vadd.f32 %v2607_v24, %v2545_v14  ;;  %v2646_v48 = vmul.f32 %v2545_v14, %v2545_v14  ;;  %v2472_v25 = vadd.f32 %v3508_v9, %v2246_v42  ;;  %v2248_v26 = vpop.f32.mrb[139].mxu1 }
 0x21b   : > { %v5695_v53 = vpop.f32.mrb[124].mxu0 }
 0x21c   : > { %v2677_v4 = vadd.f32 %v2676_v47, %v2646_v48  ;;  %v2546_v32 = vadd.f32 %v2472_v25, %v5617_v38  ;;  %v2506_v61 = vpop.f32.mrb[125].mxu0 }
 0x21d   : > { %v2251_v58 = vpop.f32.mrb[140].mxu1 }
 0x21e   : > { %2578 = vst [vmem:[%s5651_s20 + $0xa8] sm:$0xff] %v2546_v32  ;;  %v2609_v5 = vadd.f32 %v2608_v19, %v2546_v32  ;;  %v2647_v18 = vmul.f32 %v2546_v32, %v2546_v32  ;;  %v2477_v28 = vadd.f32 %v2476_v2, %v2251_v58  ;;  %v2253_v52 = vpop.f32.mrb[141].mxu1 }
 0x21f   : > { %v5699_v56 = vpop.f32.mrb[126].mxu0 }
 0x220   : > { %v2678_v39 = vadd.f32 %v2677_v4, %v2647_v18  ;;  %v2547_v43 = vadd.f32 %v2477_v28, %v5626_v36  ;;  %v2516_v46 = vpop.f32.mrb[127].mxu0 }
 0x221   : > { %v2256_v45 = vpop.f32.mrb[142].mxu1 }
 0x222   : > { %2579 = vst [vmem:[%s5651_s20 + $0xb0] sm:$0xff] %v2547_v43  ;;  %v2610_v16 = vadd.f32 %v2609_v5, %v2547_v43  ;;  %v2648_v12 = vmul.f32 %v2547_v43, %v2547_v43  ;;  %v2482_v38 = vadd.f32 %v3511_v0, %v2256_v45  ;;  %v2258_v30 = vpop.f32.mrb[143].mxu1 }
 0x224   : > { %v2679_v9 = vadd.f32 %v2678_v39, %v2648_v12  ;;  %v2548_v22 = vadd.f32 %v2482_v38, %v5623_v62 }
 0x225   : > { %v2261_v50 = vpop.f32.mrb[144].mxu1 }
 0x226   : > { %2580 = vst [vmem:[%s5651_s20 + $0xb8] sm:$0xff] %v2548_v22  ;;  %v2611_v54 = vadd.f32 %v2610_v16, %v2548_v22  ;;  %v2649_v34 = vmul.f32 %v2548_v22, %v2548_v22  ;;  %v2487_v41 = vadd.f32 %v2486_v1, %v2261_v50  ;;  %v2263_v55 = vpop.f32.mrb[145].mxu1 }
 0x228   : > { %v2680_v11 = vadd.f32 %v2679_v9, %v2649_v34  ;;  %v2549_v36 = vadd.f32 %v2487_v41, %v5632_v31 }
 0x229   : > { %v2266_v29 = vpop.f32.mrb[146].mxu1 }
 0x22a   : > { %2581 = vst [vmem:[%s5651_s20 + $0xc0] sm:$0xff] %v2549_v36  ;;  %v2612_v35 = vadd.f32 %v2611_v54, %v2549_v36  ;;  %v2650_v59 = vmul.f32 %v2549_v36, %v2549_v36  ;;  %v2492_v0 = vadd.f32 %v3514_v37, %v2266_v29  ;;  %v2268_v2 = vpop.f32.mrb[147].mxu1 }
 0x22c   : > { %v2681_v15 = vadd.f32 %v2680_v11, %v2650_v59  ;;  %v2550_v62 = vadd.f32 %v2492_v0, %v5629_v13 }
 0x22d   : > { %v2271_v44 = vpop.f32.mrb[148].mxu1 }
 0x22e   : > { %2582 = vst [vmem:[%s5651_s20 + $0xc8] sm:$0xff] %v2550_v62  ;;  %v2613_v57 = vadd.f32 %v2612_v35, %v2550_v62  ;;  %v2651_v6 = vmul.f32 %v2550_v62, %v2550_v62  ;;  %v2497_v8 = vadd.f32 %v2496_v49, %v2271_v44  ;;  %v2273_v3 = vpop.f32.mrb[149].mxu1 }
 0x230   : > { %v2682_v60 = vadd.f32 %v2681_v15, %v2651_v6  ;;  %v2551_v31 = vadd.f32 %v2497_v8, %v5637_v27 }
 0x231   : > { %v2276_v1 = vpop.f32.mrb[150].mxu1 }
 0x232   : > { %2583 = vst [vmem:[%s5651_s20 + $0xd0] sm:$0xff] %v2551_v31  ;;  %v2614_v40 = vadd.f32 %v2613_v57, %v2551_v31  ;;  %v2652_v24 = vmul.f32 %v2551_v31, %v2551_v31  ;;  %v2502_v37 = vadd.f32 %v3517_v33, %v2276_v1  ;;  %v2278_v17 = vpop.f32.mrb[151].mxu1 }
 0x234   : > { %v2683_v63 = vadd.f32 %v2682_v60, %v2652_v24  ;;  %v2552_v13 = vadd.f32 %v2502_v37, %v5634_v23 }
 0x235   : > { %v2281_v10 = vpop.f32.mrb[152].mxu1 }
 0x236   : > { %2584 = vst [vmem:[%s5651_s20 + $0xd8] sm:$0xff] %v2552_v13  ;;  %v2615_v47 = vadd.f32 %v2614_v40, %v2552_v13  ;;  %v2653_v14 = vmul.f32 %v2552_v13, %v2552_v13  ;;  %v2507_v49 = vadd.f32 %v2506_v61, %v2281_v10  ;;  %v2283_v42 = vpop.f32.mrb[153].mxu1 }
 0x238   : > { %v2684_v19 = vadd.f32 %v2683_v63, %v2653_v14  ;;  %v2553_v27 = vadd.f32 %v2507_v49, %v5641_v7 }
 0x239   : > { %v2286_v48 = vpop.f32.mrb[154].mxu1 }
 0x23a   : > { %2585 = vst [vmem:[%s5651_s20 + $0xe0] sm:$0xff] %v2553_v27  ;;  %v2616_v25 = vadd.f32 %v2615_v47, %v2553_v27  ;;  %v2654_v26 = vmul.f32 %v2553_v27, %v2553_v27  ;;  %v2512_v33 = vadd.f32 %v5695_v53, %v2286_v48  ;;  %v2288_v4 = vpop.f32.mrb[155].mxu1 }
 0x23c   : > { %v2685_v32 = vadd.f32 %v2684_v19, %v2654_v26  ;;  %v2554_v23 = vadd.f32 %v2512_v33, %v5639_v21 }
 0x23d   : > { %v2291_v58 = vpop.f32.mrb[156].mxu1 }
 0x23e   : > { %2586 = vst [vmem:[%s5651_s20 + $0xe8] sm:$0xff] %v2554_v23  ;;  %v2617_v5 = vadd.f32 %v2616_v25, %v2554_v23  ;;  %v2655_v61 = vmul.f32 %v2554_v23, %v2554_v23  ;;  %v2517_v18 = vadd.f32 %v2516_v46, %v2291_v58  ;;  %v2293_v28 = vpop.f32.mrb[157].mxu1 }
 0x240   : > { %v2686_v52 = vadd.f32 %v2685_v32, %v2655_v61  ;;  %v2555_v7 = vadd.f32 %v2517_v18, %v5645_v20 }
 0x241   : > { %v2296_v39 = vpop.f32.mrb[158].mxu1 }
 0x242   : > { %2587 = vst [vmem:[%s5651_s20 + $0xf0] sm:$0xff] %v2555_v7  ;;  %v2618_v43 = vadd.f32 %v2617_v5, %v2555_v7  ;;  %v2656_v45 = vmul.f32 %v2555_v7, %v2555_v7  ;;  %v2522_v53 = vadd.f32 %v5699_v56, %v2296_v39  ;;  %v2298_v16 = vpop.f32.mrb[159].mxu1 }
 0x244   : > { %v2687_v12 = vadd.f32 %v2686_v52, %v2656_v45  ;;  %v2556_v21 = vadd.f32 %v2522_v53, %v5643_v51 }
 0x246   : > { %2588 = vst [vmem:[%s5651_s20 + $0xf8] sm:$0xff] %v2556_v21  ;;  %v2619_v38 = vadd.f32 %v2618_v43, %v2556_v21  ;;  %v2657_v30 = vmul.f32 %v2556_v21, %v2556_v21 }
 0x248   : > { %v2620_v9 = vrot.slane %v2619_v38, 4  ;;  %v2688_v46 = vadd.f32 %v2687_v12, %v2657_v30 }
 0x24a   : > { %v2621_v22 = vadd.f32 %v2620_v9, %v2619_v38  ;;  %v2689_v50 = vrot.slane %v2688_v46, 4 }
 0x24c   : > { %v2622_v54 = vrot.slane %v2621_v22, 2  ;;  %v2690_v20 = vadd.f32 %v2689_v50, %v2688_v46 }
 0x24e   : > { %v2623_v34 = vadd.f32 %v2622_v54, %v2621_v22  ;;  %v2691_v41 = vrot.slane %v2690_v20, 2 }
 0x250   : > { %v2624_v55 = vrot.slane %v2623_v34, 1  ;;  %v2692_v11 = vadd.f32 %v2691_v41, %v2690_v20 }
 0x252   : > { %v2693_v56 = vrot.slane %v2692_v11, 1  ;;  %v2625_v51 = vadd.f32 %v2624_v55, %v2623_v34 }
 0x254   : > { %v2694_v36 = vadd.f32 %v2693_v56, %v2692_v11 }
 0x256   : > { %v2695_v29 = vsel %vm811_vm8, %v2625_v51, %v2694_v36 }
 0x257   : > { %2696 = vst [vmem:[%s493_s24] sm:$0x3] %v2695_v29 }
 0x258 PF: > { %s20_s9 = sadd.s32 1, %s3813_s9   ;;  %s5930_s29 = smov %s3809_s30 }
 0x259   : > { %p17_p5 = scmp.ge.s32.totalorder %s20_s9, 4   ;;  %s5931_s30 = smov %s5933_s6 }
 0x25b   :  { %19 = sbr.rel (!%p17_p5) target bundleno = 2 (0x2), region = 98 }

</bundles_post_ra>
